<compile_context>
chip_gen: v7x
topology: tpu7x:2x2x1
jax: 0.10.0
libtpu: 0.0.40
codegen_flags: <defaults>
</compile_context>

<pallas_src>
import jax
import jax.numpy as jnp
from jax.experimental import pallas as pl
from jax.experimental.pallas import tpu as pltpu


def _round_up(a, m):
    return ((a + m - 1) // m) * m


def _tree_lstm_frontier_kernel(x_ref, hc_ref, wbig_ref, wfh_ref, b_ref, out_ref):
    TB = x_ref.shape[0]                 # nodes in this tile
    N = hc_ref.shape[0]                 # (padded) children per node
    H = wfh_ref.shape[-1]
    H2, H3 = 2 * H, 3 * H

    x = x_ref[...]                      # (TB, I)
    hc = hc_ref[...]                    # (N, TB, 2H)  [h | c] per child

    # Child-sum via N-1 exact f32 VPU adds (no MXU reduction, no XLU reduce).
    hc_sum = hc[0]
    for n in range(1, N):
        hc_sum = hc_sum + hc[n]
    h_sum = hc_sum[:, :H]               # (TB, H)

    # One fused K=(I+H) projection on the MXU:
    #   columns [0:3H]  : iou  = [x | h_sum] @ W_iou^T + b_iou
    #   columns [3H:4H] : f_in = x @ W_fi^T + b_fh   (h_sum rows hit zeros)
    xcat = jnp.concatenate([x, h_sum], axis=-1)                        # (TB, I+H)
    g4 = jnp.dot(xcat, wbig_ref[...],
                 preferred_element_type=jnp.float32) + b_ref[...]      # (TB, 4H)

    io = jax.nn.sigmoid(g4[:, :H2])     # one EUP pass over contiguous [i|o]
    i_g = io[:, :H]
    o_g = io[:, H:H2]
    u_g = jnp.tanh(g4[:, H2:H3])
    f_in = g4[:, H3:]                   # (TB, H), already includes b_fh

    # Per-child forget gates: one stacked matmul over all child rows.
    # wfh = [W_fh^T ; 0] so the c half of each [h|c] row contributes nothing.
    hf = jnp.dot(hc.reshape(N * TB, H2), wfh_ref[...],
                 preferred_element_type=jnp.float32).reshape(N, TB, H)

    fc = jnp.zeros_like(f_in)
    for n in range(N):
        f_n = jax.nn.sigmoid(hf[n] + f_in)          # (TB, H)
        fc = fc + f_n * hc[n, :, H:]                # exact f32 accumulation

    new_c = i_g * u_g + fc                          # (TB, H)
    new_h = o_g * jnp.tanh(new_c)                   # (TB, H)

    # Lane-dense output slab: [new_h | new_c | zero pad] -> unmasked stores.
    pad = out_ref.shape[-1] - H2
    parts = [new_h, new_c]
    if pad > 0:
        parts.append(jnp.zeros((TB, pad), jnp.float32))
    out_ref[...] = jnp.concatenate(parts, axis=-1).astype(out_ref.dtype)


def prepare_params(params, input_size, hidden_size):
    """One-time layout of the PyTorch nn.Linear parameters into fused slabs."""
    I, H = input_size, hidden_size
    dt = params["w_iou"].dtype
    w_iou_t = params["w_iou"].T                                      # (I+H, 3H)
    # Fused input-side slab (I+H, 4H): [:, :3H] = W_iou^T,
    # [:I, 3H:] = W_fi^T, [I:, 3H:] = 0 (h_sum rows must not feed f_in).
    w_fi_col = jnp.concatenate(
        [params["w_fi"].T, jnp.zeros((H, H), dt)], axis=0)           # (I+H, H)
    w_big = jnp.concatenate([w_iou_t, w_fi_col], axis=1)             # (I+H, 4H)
    b_big = jnp.concatenate(
        [params["b_iou"], params["b_fh"]]).reshape(1, 4 * H)         # (1, 4H)
    # Child-side forget slab (2H, H) = [W_fh^T ; 0], applied to [h|c] rows.
    w_fh2 = jnp.concatenate(
        [params["w_fh"].T, jnp.zeros((H, H), dt)], axis=0)           # (2H, H)
    return {"w_big": w_big, "w_fh2": w_fh2, "b_big": b_big,
            "input_size": I, "hidden_size": H}


def child_sum_tree_lstm_frontier(x, child_h, child_c, prepared, *, node_tile=128):
    """Batched cell over a frontier of B same-depth nodes.

    x: (B, I)   child_h, child_c: (B, N, H)  ->  new_h, new_c: (B, H) each.
    Variable fan-out: pad children with zero rows (exactly neutral).
    N == 0 (leaf frontier) is handled by substituting one zero child,
    matching the module's `states=None` init-state semantics.
    """
    B, I = x.shape
    _, N, H = child_h.shape
    assert I == prepared["input_size"] and H == prepared["hidden_size"]

    if N == 0:
        child_h = jnp.zeros((B, 1, H), x.dtype)
        child_c = jnp.zeros((B, 1, H), x.dtype)
        N = 1

    # Node tile: big enough to amortize per-step overhead, multiple of 8.
    TB = _round_up(min(node_tile, _round_up(B, 8)), 8)
    grid_n = _round_up(B, TB) // TB
    if grid_n == 1 and TB >= 16 and TB % 16 == 0:
        TB //= 2                      # >=2 grid steps -> v7x uses both TCs
    Bp = _round_up(B, TB)

    if Bp != B:
        pad = Bp - B
        x = jnp.pad(x, ((0, pad), (0, 0)))
        child_h = jnp.pad(child_h, ((0, pad), (0, 0), (0, 0)))
        child_c = jnp.pad(child_c, ((0, pad), (0, 0), (0, 0)))

    # One combined child slab: (N, Bp, 2H), row = [h | c].
    hc = jnp.concatenate([child_h, child_c], axis=-1).transpose(1, 0, 2)

    OUT_W = _round_up(2 * H, 128)     # lane-dense output width

    out = pl.pallas_call(
        _tree_lstm_frontier_kernel,
        out_shape=jax.ShapeDtypeStruct((Bp, OUT_W), jnp.float32),
        grid=(Bp // TB,),
        in_specs=[
            pl.BlockSpec((TB, I), lambda i: (i, 0)),              # x tile
            pl.BlockSpec((N, TB, 2 * H), lambda i: (0, i, 0)),    # child [h|c]
            pl.BlockSpec((I + H, 4 * H), lambda i: (0, 0)),       # W_big
            pl.BlockSpec((2 * H, H), lambda i: (0, 0)),           # W_fh slab
            pl.BlockSpec((1, 4 * H), lambda i: (0, 0)),           # b_big
        ],
        out_specs=pl.BlockSpec((TB, OUT_W), lambda i: (i, 0)),
        compiler_params=pltpu.CompilerParams(
            dimension_semantics=("parallel",)),
    )(x, hc, prepared["w_big"], prepared["w_fh2"], prepared["b_big"])

    return out[:B, :H], out[:B, H:2 * H]


def child_sum_tree_lstm_cell(x, child_h, child_c, prepared):
    """Single-node interface matching the original PyTorch forward.

    x: (I,)  child_h, child_c: (N, H)  ->  (new_h (H,), new_c (H,)).
    """
    new_h, new_c = child_sum_tree_lstm_frontier(
        x[None, :], child_h[None, ...], child_c[None, ...], prepared)
    return new_h[0], new_c[0]


def _reference(x, child_h, child_c, params):
    """Pure-JAX reference mirroring the PyTorch forward exactly (one node)."""
    H = child_h.shape[1]
    h_sum = child_h.sum(0)
    xcat = jnp.concatenate([x, h_sum], axis=0)
    iou = params["w_iou"] @ xcat + params["b_iou"]
    i = jax.nn.sigmoid(iou[:H])
    o = jax.nn.sigmoid(iou[H:2 * H])
    u = jnp.tanh(iou[2 * H:])
    f_in = params["w_fi"] @ x                              # (H,)
    f_hd = child_h @ params["w_fh"].T + params["b_fh"]     # (N, H)
    f = jax.nn.sigmoid(f_in[None, :] + f_hd)
    new_c = i * u + (f * child_c).sum(0)
    new_h = o * jnp.tanh(new_c)
    return new_h, new_c


if __name__ == "__main__":
    input_size = 32
    hidden_size = 32
    num_children = 4
    frontier = 256         # batch of same-depth tree nodes per pallas_call

    key = jax.random.PRNGKey(0)
    ks = jax.random.split(key, 8)

    # nn.Linear layouts: weight (out, in).
    params = {
        "w_iou": jax.random.normal(ks[0], (3 * hidden_size,
                                           input_size + hidden_size),
                                   jnp.float32) * 0.1,
        "b_iou": jax.random.normal(ks[1], (3 * hidden_size,), jnp.float32) * 0.1,
        "w_fi": jax.random.normal(ks[2], (hidden_size, input_size),
                                  jnp.float32) * 0.1,
        "w_fh": jax.random.normal(ks[3], (hidden_size, hidden_size),
                                  jnp.float32) * 0.1,
        "b_fh": jax.random.normal(ks[4], (hidden_size,), jnp.float32) * 0.1,
    }

    x = jax.random.normal(ks[5], (frontier, input_size), jnp.float32)
    child_h = jax.random.normal(ks[6], (frontier, num_children, hidden_size),
                                jnp.float32)
    child_c = jax.random.normal(ks[7], (frontier, num_children, hidden_size),
                                jnp.float32)

    # One-time parameter layout (hoisted out of the per-call path).
    prepared = prepare_params(params, input_size, hidden_size)

    # Batched frontier call (256 nodes -> two "parallel" grid steps of 128).
    new_h, new_c = child_sum_tree_lstm_frontier(x, child_h, child_c, prepared,
                                                node_tile=128)
    jax.block_until_ready((new_h, new_c))

    # Per-node pure-JAX reference.
    ref_h, ref_c = jax.vmap(
        lambda xi, hi, ci: _reference(xi, hi, ci, params))(x, child_h, child_c)
    assert new_h.shape == (frontier, hidden_size)
    assert new_c.shape == (frontier, hidden_size)
    assert jnp.allclose(new_h, ref_h, atol=2e-4, rtol=2e-4)
    assert jnp.allclose(new_c, ref_c, atol=2e-4, rtol=2e-4)

    # Single-node interface matching the original module's forward.
    sh, sc = child_sum_tree_lstm_cell(x[0], child_h[0], child_c[0], prepared)
    jax.block_until_ready((sh, sc))
    assert sh.shape == (hidden_size,) and sc.shape == (hidden_size,)
    assert jnp.allclose(sh, ref_h[0], atol=2e-4, rtol=2e-4)
    assert jnp.allclose(sc, ref_c[0], atol=2e-4, rtol=2e-4)

    # Leaf frontier (no children) == states=None (zero init hidden/cell).
    leaf_x = x[:3]
    lh, lc = child_sum_tree_lstm_frontier(
        leaf_x,
        jnp.zeros((3, 0, hidden_size), jnp.float32),
        jnp.zeros((3, 0, hidden_size), jnp.float32),
        prepared)
    jax.block_until_ready((lh, lc))
    zero_child = jnp.zeros((3, 1, hidden_size), jnp.float32)
    lref_h, lref_c = jax.vmap(
        lambda xi, hi, ci: _reference(xi, hi, ci, params))(
            leaf_x, zero_child, zero_child)
    assert jnp.allclose(lh, lref_h, atol=2e-4, rtol=2e-4)
    assert jnp.allclose(lc, lref_c, atol=2e-4, rtol=2e-4)

    print("KERNEL_OK")
</pallas_src>

<mosaic_0001>
module attributes {stable_mosaic.version = 11 : i64} {
  func.func @_tree_lstm_frontier_kernel(%arg0: i32, %arg1: memref<128x32xf32, #tpu.memory_space<vmem>>, %arg2: memref<4x128x64xf32, #tpu.memory_space<vmem>>, %arg3: memref<64x128xf32, #tpu.memory_space<vmem>>, %arg4: memref<64x32xf32, #tpu.memory_space<vmem>>, %arg5: memref<1x128xf32, #tpu.memory_space<vmem>>, %arg6: memref<128x128xf32, #tpu.memory_space<vmem>>) attributes {dimension_semantics = [#tpu.dimension_semantics<parallel>], iteration_bounds = array<i64: 2>, scalar_prefetch = 0 : i64, scratch_operands = 0 : i64, tpu.core_type = #tpu.core_type<tc>, window_params = [{transform_indices = @transform_0, window_bounds = array<i64: 128, 32>}, {transform_indices = @transform_1, window_bounds = array<i64: 4, 128, 64>}, {pipeline_mode = #tpu.pipeline_mode<synchronous>, transform_indices = @transform_2, window_bounds = array<i64: 64, 128>}, {pipeline_mode = #tpu.pipeline_mode<synchronous>, transform_indices = @transform_3, window_bounds = array<i64: 64, 32>}, {pipeline_mode = #tpu.pipeline_mode<synchronous>, transform_indices = @transform_4, window_bounds = array<i64: 1, 128>}, {transform_indices = @transform_5, window_bounds = array<i64: 128, 128>}]} {
    %c0 = arith.constant 0 : index
    %c0_0 = arith.constant 0 : index
    %0 = vector.load %arg1[%c0, %c0_0] : memref<128x32xf32, #tpu.memory_space<vmem>>, vector<128x32xf32>
    %c0_1 = arith.constant 0 : index
    %c0_2 = arith.constant 0 : index
    %c0_3 = arith.constant 0 : index
    %1 = vector.load %arg2[%c0_1, %c0_2, %c0_3] : memref<4x128x64xf32, #tpu.memory_space<vmem>>, vector<4x128x64xf32>
    %2 = vector.extract_strided_slice %1 {offsets = [0, 0, 0], sizes = [1, 128, 64], strides = [1, 1, 1]} : vector<4x128x64xf32> to vector<1x128x64xf32>
    %3 = vector.shape_cast %2 : vector<1x128x64xf32> to vector<128x64xf32>
    %4 = vector.extract_strided_slice %1 {offsets = [1, 0, 0], sizes = [1, 128, 64], strides = [1, 1, 1]} : vector<4x128x64xf32> to vector<1x128x64xf32>
    %5 = vector.shape_cast %4 : vector<1x128x64xf32> to vector<128x64xf32>
    %6 = arith.addf %3, %5 : vector<128x64xf32>
    %7 = vector.extract_strided_slice %1 {offsets = [2, 0, 0], sizes = [1, 128, 64], strides = [1, 1, 1]} : vector<4x128x64xf32> to vector<1x128x64xf32>
    %8 = vector.shape_cast %7 : vector<1x128x64xf32> to vector<128x64xf32>
    %9 = arith.addf %6, %8 : vector<128x64xf32>
    %10 = vector.extract_strided_slice %1 {offsets = [3, 0, 0], sizes = [1, 128, 64], strides = [1, 1, 1]} : vector<4x128x64xf32> to vector<1x128x64xf32>
    %11 = vector.shape_cast %10 : vector<1x128x64xf32> to vector<128x64xf32>
    %12 = arith.addf %9, %11 : vector<128x64xf32>
    %13 = vector.extract_strided_slice %12 {offsets = [0, 0], sizes = [128, 32], strides = [1, 1]} : vector<128x64xf32> to vector<128x32xf32>
    %14 = tpu.concatenate %0, %13 in 1 : vector<128x32xf32>, vector<128x32xf32> -> vector<128x64xf32>
    %c0_4 = arith.constant 0 : index
    %c0_5 = arith.constant 0 : index
    %15 = vector.load %arg3[%c0_4, %c0_5] : memref<64x128xf32, #tpu.memory_space<vmem>>, vector<64x128xf32>
    %cst = arith.constant dense<0.000000e+00> : vector<128x128xf32>
    %16 = tpu.matmul %14, %15, %cst {dimension_numbers = #tpu.dot_dimension_numbers<[1], [0], [0], [1], [0, 0, 1, 1], [], []>} : vector<128x64xf32>, vector<64x128xf32>, vector<128x128xf32> -> vector<128x128xf32>
    %c0_6 = arith.constant 0 : index
    %c0_7 = arith.constant 0 : index
    %17 = vector.load %arg5[%c0_6, %c0_7] : memref<1x128xf32, #tpu.memory_space<vmem>>, vector<1x128xf32>
    %18 = vector.broadcast %17 : vector<1x128xf32> to vector<128x128xf32>
    %19 = arith.addf %16, %18 : vector<128x128xf32>
    %20 = vector.extract_strided_slice %19 {offsets = [0, 0], sizes = [128, 64], strides = [1, 1]} : vector<128x128xf32> to vector<128x64xf32>
    %21 = arith.negf %20 : vector<128x64xf32>
    %22 = math.exp %21 : vector<128x64xf32>
    %cst_8 = arith.constant 1.000000e+00 : f32
    %23 = vector.broadcast %cst_8 : f32 to vector<128x64xf32>
    %24 = arith.addf %23, %22 : vector<128x64xf32>
    %25 = arith.divf %23, %24 : vector<128x64xf32>
    %26 = vector.extract_strided_slice %25 {offsets = [0, 0], sizes = [128, 32], strides = [1, 1]} : vector<128x64xf32> to vector<128x32xf32>
    %27 = vector.extract_strided_slice %25 {offsets = [0, 32], sizes = [128, 32], strides = [1, 1]} : vector<128x64xf32> to vector<128x32xf32>
    %28 = vector.extract_strided_slice %19 {offsets = [0, 64], sizes = [128, 32], strides = [1, 1]} : vector<128x128xf32> to vector<128x32xf32>
    %29 = math.tanh %28 : vector<128x32xf32>
    %30 = vector.extract_strided_slice %19 {offsets = [0, 96], sizes = [128, 32], strides = [1, 1]} : vector<128x128xf32> to vector<128x32xf32>
    %31 = vector.shape_cast %1 : vector<4x128x64xf32> to vector<512x64xf32>
    %c0_9 = arith.constant 0 : index
    %c0_10 = arith.constant 0 : index
    %32 = vector.load %arg4[%c0_9, %c0_10] : memref<64x32xf32, #tpu.memory_space<vmem>>, vector<64x32xf32>
    %cst_11 = arith.constant dense<0.000000e+00> : vector<512x32xf32>
    %33 = tpu.matmul %31, %32, %cst_11 {dimension_numbers = #tpu.dot_dimension_numbers<[1], [0], [0], [1], [0, 0, 1, 1], [], []>} : vector<512x64xf32>, vector<64x32xf32>, vector<512x32xf32> -> vector<512x32xf32>
    %34 = vector.shape_cast %33 : vector<512x32xf32> to vector<4x128x32xf32>
    %cst_12 = arith.constant 0.000000e+00 : f32
    %35 = vector.broadcast %cst_12 : f32 to vector<128x32xf32>
    %36 = vector.extract_strided_slice %34 {offsets = [0, 0, 0], sizes = [1, 128, 32], strides = [1, 1, 1]} : vector<4x128x32xf32> to vector<1x128x32xf32>
    %37 = vector.shape_cast %36 : vector<1x128x32xf32> to vector<128x32xf32>
    %38 = arith.addf %37, %30 : vector<128x32xf32>
    %39 = arith.negf %38 : vector<128x32xf32>
    %40 = math.exp %39 : vector<128x32xf32>
    %cst_13 = arith.constant 1.000000e+00 : f32
    %41 = vector.broadcast %cst_13 : f32 to vector<128x32xf32>
    %42 = arith.addf %41, %40 : vector<128x32xf32>
    %43 = arith.divf %41, %42 : vector<128x32xf32>
    %44 = vector.extract_strided_slice %1 {offsets = [0, 0, 32], sizes = [1, 128, 32], strides = [1, 1, 1]} : vector<4x128x64xf32> to vector<1x128x32xf32>
    %45 = vector.shape_cast %44 : vector<1x128x32xf32> to vector<128x32xf32>
    %46 = arith.mulf %43, %45 : vector<128x32xf32>
    %47 = arith.addf %35, %46 : vector<128x32xf32>
    %48 = vector.extract_strided_slice %34 {offsets = [1, 0, 0], sizes = [1, 128, 32], strides = [1, 1, 1]} : vector<4x128x32xf32> to vector<1x128x32xf32>
    %49 = vector.shape_cast %48 : vector<1x128x32xf32> to vector<128x32xf32>
    %50 = arith.addf %49, %30 : vector<128x32xf32>
    %51 = arith.negf %50 : vector<128x32xf32>
    %52 = math.exp %51 : vector<128x32xf32>
    %cst_14 = arith.constant 1.000000e+00 : f32
    %53 = vector.broadcast %cst_14 : f32 to vector<128x32xf32>
    %54 = arith.addf %53, %52 : vector<128x32xf32>
    %55 = arith.divf %53, %54 : vector<128x32xf32>
    %56 = vector.extract_strided_slice %1 {offsets = [1, 0, 32], sizes = [1, 128, 32], strides = [1, 1, 1]} : vector<4x128x64xf32> to vector<1x128x32xf32>
    %57 = vector.shape_cast %56 : vector<1x128x32xf32> to vector<128x32xf32>
    %58 = arith.mulf %55, %57 : vector<128x32xf32>
    %59 = arith.addf %47, %58 : vector<128x32xf32>
    %60 = vector.extract_strided_slice %34 {offsets = [2, 0, 0], sizes = [1, 128, 32], strides = [1, 1, 1]} : vector<4x128x32xf32> to vector<1x128x32xf32>
    %61 = vector.shape_cast %60 : vector<1x128x32xf32> to vector<128x32xf32>
    %62 = arith.addf %61, %30 : vector<128x32xf32>
    %63 = arith.negf %62 : vector<128x32xf32>
    %64 = math.exp %63 : vector<128x32xf32>
    %cst_15 = arith.constant 1.000000e+00 : f32
    %65 = vector.broadcast %cst_15 : f32 to vector<128x32xf32>
    %66 = arith.addf %65, %64 : vector<128x32xf32>
    %67 = arith.divf %65, %66 : vector<128x32xf32>
    %68 = vector.extract_strided_slice %1 {offsets = [2, 0, 32], sizes = [1, 128, 32], strides = [1, 1, 1]} : vector<4x128x64xf32> to vector<1x128x32xf32>
    %69 = vector.shape_cast %68 : vector<1x128x32xf32> to vector<128x32xf32>
    %70 = arith.mulf %67, %69 : vector<128x32xf32>
    %71 = arith.addf %59, %70 : vector<128x32xf32>
    %72 = vector.extract_strided_slice %34 {offsets = [3, 0, 0], sizes = [1, 128, 32], strides = [1, 1, 1]} : vector<4x128x32xf32> to vector<1x128x32xf32>
    %73 = vector.shape_cast %72 : vector<1x128x32xf32> to vector<128x32xf32>
    %74 = arith.addf %73, %30 : vector<128x32xf32>
    %75 = arith.negf %74 : vector<128x32xf32>
    %76 = math.exp %75 : vector<128x32xf32>
    %cst_16 = arith.constant 1.000000e+00 : f32
    %77 = vector.broadcast %cst_16 : f32 to vector<128x32xf32>
    %78 = arith.addf %77, %76 : vector<128x32xf32>
    %79 = arith.divf %77, %78 : vector<128x32xf32>
    %80 = vector.extract_strided_slice %1 {offsets = [3, 0, 32], sizes = [1, 128, 32], strides = [1, 1, 1]} : vector<4x128x64xf32> to vector<1x128x32xf32>
    %81 = vector.shape_cast %80 : vector<1x128x32xf32> to vector<128x32xf32>
    %82 = arith.mulf %79, %81 : vector<128x32xf32>
    %83 = arith.addf %71, %82 : vector<128x32xf32>
    %84 = arith.mulf %26, %29 : vector<128x32xf32>
    %85 = arith.addf %84, %83 : vector<128x32xf32>
    %86 = math.tanh %85 : vector<128x32xf32>
    %87 = arith.mulf %27, %86 : vector<128x32xf32>
    %cst_17 = arith.constant 0.000000e+00 : f32
    %88 = vector.broadcast %cst_17 : f32 to vector<128x64xf32>
    %89 = tpu.concatenate %87, %85, %88 in 1 : vector<128x32xf32>, vector<128x32xf32>, vector<128x64xf32> -> vector<128x128xf32>
    %c0_18 = arith.constant 0 : index
    %c0_19 = arith.constant 0 : index
    %90 = vector.load %arg6[%c0_18, %c0_19] : memref<128x128xf32, #tpu.memory_space<vmem>>, vector<128x128xf32>
    tpu.vector_store %arg6[%c0_18, %c0_19], %89 {strides = array<i32>} : memref<128x128xf32, #tpu.memory_space<vmem>>, vector<128x128xf32>,
    return
  }
  func.func @transform_0(%arg0: i32) -> (i32, i32) {
    %c0_i32 = arith.constant 0 : i32
    %c0_i32_0 = arith.constant 0 : i32
    return %arg0, %c0_i32 : i32, i32
  }
  func.func @transform_1(%arg0: i32) -> (i32, i32, i32) {
    %c0_i32 = arith.constant 0 : i32
    %c0_i32_0 = arith.constant 0 : i32
    %c0_i32_1 = arith.constant 0 : i32
    return %c0_i32, %arg0, %c0_i32_0 : i32, i32, i32
  }
  func.func @transform_2(%arg0: i32) -> (i32, i32) {
    %c0_i32 = arith.constant 0 : i32
    %c0_i32_0 = arith.constant 0 : i32
    %c0_i32_1 = arith.constant 0 : i32
    return %c0_i32, %c0_i32_0 : i32, i32
  }
  func.func @transform_3(%arg0: i32) -> (i32, i32) {
    %c0_i32 = arith.constant 0 : i32
    %c0_i32_0 = arith.constant 0 : i32
    %c0_i32_1 = arith.constant 0 : i32
    return %c0_i32, %c0_i32_0 : i32, i32
  }
  func.func @transform_4(%arg0: i32) -> (i32, i32) {
    %c0_i32 = arith.constant 0 : i32
    %c0_i32_0 = arith.constant 0 : i32
    %c0_i32_1 = arith.constant 0 : i32
    return %c0_i32, %c0_i32_0 : i32, i32
  }
  func.func @transform_5(%arg0: i32) -> (i32, i32) {
    %c0_i32 = arith.constant 0 : i32
    %c0_i32_0 = arith.constant 0 : i32
    return %arg0, %c0_i32 : i32, i32
  }
}

</mosaic_0001>

<bundles_post_ra>
// kernel: tpu_custom_call.1
= control target key start
LH: loop header
LB: loop body
LE: loop exit
PB: predicated region body
PF: predicated region fallthrough
CT: control target
= control target key end

     0   :  { %10 = vsyncpa [#allocation4], 0  ;;  %s5842_s0 = inlined_call_operand.vmem [shape: f32[256,32], index: 0, kind: input, shape index: {}]   ;;  %s5843_s1 = inlined_call_operand.vmem [shape: f32[4,256,64], index: 1, kind: input, shape index: {}]   ;;  %s5844_s2 = inlined_call_operand.vmem [shape: f32[64,128], index: 2, kind: input, shape index: {}]   ;;  %s5845_s3 = inlined_call_operand.vmem [shape: f32[64,32], index: 3, kind: input, shape index: {}]   ;;  %s5846_s4 = inlined_call_operand.vmem [shape: f32[1,128], index: 4, kind: input, shape index: {}]   ;;  %s5847_s5 = inlined_call_operand.hbm [shape: f32[256,128], index: 5, kind: output, shape index: {}]  }
   0x1   :  { %12 = vsyncpa [#allocation4 + $0x1], 0  ;;  %s3938_s18 = smov 0   ;;  %s3940_s19 = smov 0  }
   0x2   :  { %s3942_s20 = smov 0   ;;  %s3944_s21 = smov 0  }
   0x3 LB: > { %s3959_s22 = sadd.s32 4294967295, %s3900_s21   ;;  %s2943_s23 = sadd.s32 4294967294, %s3900_s21   ;;  %s3900_s21 = sphi %s3944_s21, %s6137_s21   ;;  %s3896_s20 = sphi %s3942_s20, %s6136_s20   ;;  %s3892_s19 = sphi %s3940_s19, %s6135_s19   ;;  %s3888_s18 = sphi %s3938_s18, %s6134_s18  }
   0x4   : > { %s3963_s24 = sadd.s32 1, %s3900_s21   ;;  %s51_s25 = sadd.s32 1, %s3896_s20 }
   0x5   : > { %s48_s26 = ssub.s32 %s3900_s21, %s3963_s24  ;;  %p58_p0 = scmp.ne.s32.totalorder %s3896_s20, %s3892_s19 }
   0x6   : > { %p49_p1 = scmp.eq.s32.totalorder %s48_s26, 0  ;;  %p59_p2 = scmp.eq.s32.totalorder %s3900_s21, 0 }
   0x7   : > { %p151_p3 = scmp.eq.s32.totalorder %s3959_s22, 1  ;;  %p156_p4 = scmp.ne.s32.totalorder %s3892_s19, %s3888_s18 }
   0x8   : > { %s3975_s27 = scalar_select %p49_p1, %s3896_s20, %s51_s25  }
   0x9   : > { %p60_p5 = por %p59_p2, %p58_p0  ;;  %p3977_p6 = por %p151_p3, %p58_p0 }
   0xa   : > { %p157_p7 = scmp.eq.s32.totalorder %s2943_s23, 1  ;;  %p2945_p9 = scmp.ge.s32.totalorder %s3900_s21, 2 }
   0xc   : > { %p3981_p8 = por %p157_p7, %p156_p4  ;;  %182 = sbr.rel (%p2945_p9) target bundleno = 55 (0x37), region = 28 }
  0x13   : > { %194 = sbr.rel (!%p60_p5) target bundleno = 55 (0x37), region = 36  ;;  %s196_s30 = sand.u32 (%p60_p5), 1, %s3896_s20  }
  0x14   : > { %s3120_s6 = sshll.u32 (%p60_p5), %s3900_s21, 7  ;;  %s2946_s7 = sshll.u32 (%p60_p5), %s196_s30, 9 }
  0x15   : > { %s3993_s10 = scalar_lea.vmem (%p60_p5), %s5843_s1, %s3120_s6  ;;  %s3998_s11 = scalar_lea.vmem (%p60_p5), [#allocation2], %s2946_s7 }
  0x16   : > { %v355_v0 = vld [vmem:[%s3993_s10] sm:$0xff] (%p60_p5)  ;;  %v357_v1 = vld [vmem:[%s3993_s10 + $0x8] sm:$0xff] (%p60_p5)  ;;  %v359_v2 = vld [vmem:[%s3993_s10 + $0x10] sm:$0xff] (%p60_p5) }
  0x17   : > { %356 = vst [vmem:[%s3998_s11] sm:$0xff] (%p60_p5), %v355_v0  ;;  %358 = vst [vmem:[%s3998_s11 + $0x8] sm:$0xff] (%p60_p5), %v357_v1  ;;  %v361_v3 = vld [vmem:[%s3993_s10 + $0x18] sm:$0xff] (%p60_p5)  ;;  %v363_v4 = vld [vmem:[%s3993_s10 + $0x20] sm:$0xff] (%p60_p5) }
  0x18   : > { %360 = vst [vmem:[%s3998_s11 + $0x10] sm:$0xff] (%p60_p5), %v359_v2  ;;  %v365_v5 = vld [vmem:[%s3993_s10 + $0x28] sm:$0xff] (%p60_p5)  ;;  %362 = vst [vmem:[%s3998_s11 + $0x18] sm:$0xff] (%p60_p5), %v361_v3  ;;  %v367_v6 = vld [vmem:[%s3993_s10 + $0x30] sm:$0xff] (%p60_p5) }
  0x19   : > { %364 = vst [vmem:[%s3998_s11 + $0x20] sm:$0xff] (%p60_p5), %v363_v4  ;;  %366 = vst [vmem:[%s3998_s11 + $0x28] sm:$0xff] (%p60_p5), %v365_v5  ;;  %v369_v7 = vld [vmem:[%s3993_s10 + $0x38] sm:$0xff] (%p60_p5)  ;;  %v371_v8 = vld [vmem:[%s3993_s10 + $0x40] sm:$0xff] (%p60_p5) }
  0x1a   : > { %368 = vst [vmem:[%s3998_s11 + $0x30] sm:$0xff] %v367_v6  ;;  %370 = vst [vmem:[%s3998_s11 + $0x38] sm:$0xff] %v369_v7  ;;  %v373_v9 = vld [vmem:[%s3993_s10 + $0x48] sm:$0xff]  ;;  %v375_v10 = vld [vmem:[%s3993_s10 + $0x50] sm:$0xff] }
  0x1b   : > { %372 = vst [vmem:[%s3998_s11 + $0x40] sm:$0xff] %v371_v8  ;;  %v377_v11 = vld [vmem:[%s3993_s10 + $0x58] sm:$0xff]  ;;  %374 = vst [vmem:[%s3998_s11 + $0x48] sm:$0xff] %v373_v9  ;;  %v379_v12 = vld [vmem:[%s3993_s10 + $0x60] sm:$0xff] }
  0x1c   : > { %376 = vst [vmem:[%s3998_s11 + $0x50] sm:$0xff] %v375_v10  ;;  %378 = vst [vmem:[%s3998_s11 + $0x58] sm:$0xff] %v377_v11  ;;  %v381_v13 = vld [vmem:[%s3993_s10 + $0x68] sm:$0xff]  ;;  %v383_v14 = vld [vmem:[%s3993_s10 + $0x70] sm:$0xff] }
  0x1d   : > { %380 = vst [vmem:[%s3998_s11 + $0x60] sm:$0xff] %v379_v12  ;;  %382 = vst [vmem:[%s3998_s11 + $0x68] sm:$0xff] %v381_v13  ;;  %v385_v15 = vld [vmem:[%s3993_s10 + $0x78] sm:$0xff]  ;;  %v387_v16 = vld [vmem:[%s3993_s10 + $0x100] sm:$0xff] }
  0x1e   : > { %384 = vst [vmem:[%s3998_s11 + $0x70] sm:$0xff] %v383_v14  ;;  %v389_v17 = vld [vmem:[%s3993_s10 + $0x108] sm:$0xff]  ;;  %386 = vst [vmem:[%s3998_s11 + $0x78] sm:$0xff] %v385_v15  ;;  %v391_v18 = vld [vmem:[%s3993_s10 + $0x110] sm:$0xff] }
  0x1f   : > { %388 = vst [vmem:[%s3998_s11 + $0x80] sm:$0xff] %v387_v16  ;;  %390 = vst [vmem:[%s3998_s11 + $0x88] sm:$0xff] %v389_v17  ;;  %v393_v19 = vld [vmem:[%s3993_s10 + $0x118] sm:$0xff]  ;;  %v395_v20 = vld [vmem:[%s3993_s10 + $0x120] sm:$0xff] }
  0x20   : > { %392 = vst [vmem:[%s3998_s11 + $0x90] sm:$0xff] %v391_v18  ;;  %394 = vst [vmem:[%s3998_s11 + $0x98] sm:$0xff] %v393_v19  ;;  %v397_v21 = vld [vmem:[%s3993_s10 + $0x128] sm:$0xff]  ;;  %v399_v22 = vld [vmem:[%s3993_s10 + $0x130] sm:$0xff] }
  0x21   : > { %396 = vst [vmem:[%s3998_s11 + $0xa0] sm:$0xff] %v395_v20  ;;  %v401_v23 = vld [vmem:[%s3993_s10 + $0x138] sm:$0xff]  ;;  %398 = vst [vmem:[%s3998_s11 + $0xa8] sm:$0xff] %v397_v21  ;;  %v403_v24 = vld [vmem:[%s3993_s10 + $0x140] sm:$0xff] }
  0x22   : > { %400 = vst [vmem:[%s3998_s11 + $0xb0] sm:$0xff] %v399_v22  ;;  %402 = vst [vmem:[%s3998_s11 + $0xb8] sm:$0xff] %v401_v23  ;;  %v405_v25 = vld [vmem:[%s3993_s10 + $0x148] sm:$0xff]  ;;  %v407_v26 = vld [vmem:[%s3993_s10 + $0x150] sm:$0xff] }
  0x23   : > { %404 = vst [vmem:[%s3998_s11 + $0xc0] sm:$0xff] %v403_v24  ;;  %406 = vst [vmem:[%s3998_s11 + $0xc8] sm:$0xff] %v405_v25  ;;  %v409_v27 = vld [vmem:[%s3993_s10 + $0x158] sm:$0xff]  ;;  %v411_v28 = vld [vmem:[%s3993_s10 + $0x160] sm:$0xff] }
  0x24   : > { %408 = vst [vmem:[%s3998_s11 + $0xd0] sm:$0xff] %v407_v26  ;;  %v413_v29 = vld [vmem:[%s3993_s10 + $0x168] sm:$0xff]  ;;  %410 = vst [vmem:[%s3998_s11 + $0xd8] sm:$0xff] %v409_v27  ;;  %v415_v30 = vld [vmem:[%s3993_s10 + $0x170] sm:$0xff] }
  0x25   : > { %412 = vst [vmem:[%s3998_s11 + $0xe0] sm:$0xff] %v411_v28  ;;  %414 = vst [vmem:[%s3998_s11 + $0xe8] sm:$0xff] %v413_v29  ;;  %v417_v31 = vld [vmem:[%s3993_s10 + $0x178] sm:$0xff]  ;;  %v419_v32 = vld [vmem:[%s3993_s10 + $0x200] sm:$0xff] }
  0x26   : > { %416 = vst [vmem:[%s3998_s11 + $0xf0] sm:$0xff] %v415_v30  ;;  %418 = vst [vmem:[%s3998_s11 + $0xf8] sm:$0xff] %v417_v31  ;;  %v421_v33 = vld [vmem:[%s3993_s10 + $0x208] sm:$0xff]  ;;  %v423_v34 = vld [vmem:[%s3993_s10 + $0x210] sm:$0xff] }
  0x27   : > { %420 = vst [vmem:[%s3998_s11 + $0x100] sm:$0xff] %v419_v32  ;;  %v425_v35 = vld [vmem:[%s3993_s10 + $0x218] sm:$0xff]  ;;  %422 = vst [vmem:[%s3998_s11 + $0x108] sm:$0xff] %v421_v33  ;;  %v427_v36 = vld [vmem:[%s3993_s10 + $0x220] sm:$0xff] }
  0x28   : > { %424 = vst [vmem:[%s3998_s11 + $0x110] sm:$0xff] %v423_v34  ;;  %426 = vst [vmem:[%s3998_s11 + $0x118] sm:$0xff] %v425_v35  ;;  %v429_v37 = vld [vmem:[%s3993_s10 + $0x228] sm:$0xff]  ;;  %v431_v38 = vld [vmem:[%s3993_s10 + $0x230] sm:$0xff] }
  0x29   : > { %428 = vst [vmem:[%s3998_s11 + $0x120] sm:$0xff] %v427_v36  ;;  %430 = vst [vmem:[%s3998_s11 + $0x128] sm:$0xff] %v429_v37  ;;  %v433_v39 = vld [vmem:[%s3993_s10 + $0x238] sm:$0xff]  ;;  %v435_v40 = vld [vmem:[%s3993_s10 + $0x240] sm:$0xff] }
  0x2a   : > { %432 = vst [vmem:[%s3998_s11 + $0x130] sm:$0xff] %v431_v38  ;;  %v437_v41 = vld [vmem:[%s3993_s10 + $0x248] sm:$0xff]  ;;  %434 = vst [vmem:[%s3998_s11 + $0x138] sm:$0xff] %v433_v39  ;;  %v439_v42 = vld [vmem:[%s3993_s10 + $0x250] sm:$0xff] }
  0x2b   : > { %436 = vst [vmem:[%s3998_s11 + $0x140] sm:$0xff] %v435_v40  ;;  %438 = vst [vmem:[%s3998_s11 + $0x148] sm:$0xff] %v437_v41  ;;  %v441_v43 = vld [vmem:[%s3993_s10 + $0x258] sm:$0xff]  ;;  %v443_v44 = vld [vmem:[%s3993_s10 + $0x260] sm:$0xff] }
  0x2c   : > { %440 = vst [vmem:[%s3998_s11 + $0x150] sm:$0xff] %v439_v42  ;;  %442 = vst [vmem:[%s3998_s11 + $0x158] sm:$0xff] %v441_v43  ;;  %v445_v45 = vld [vmem:[%s3993_s10 + $0x268] sm:$0xff]  ;;  %v447_v46 = vld [vmem:[%s3993_s10 + $0x270] sm:$0xff] }
  0x2d   : > { %444 = vst [vmem:[%s3998_s11 + $0x160] sm:$0xff] %v443_v44  ;;  %v449_v47 = vld [vmem:[%s3993_s10 + $0x278] sm:$0xff]  ;;  %446 = vst [vmem:[%s3998_s11 + $0x168] sm:$0xff] %v445_v45  ;;  %v451_v48 = vld [vmem:[%s3993_s10 + $0x300] sm:$0xff] }
  0x2e   : > { %448 = vst [vmem:[%s3998_s11 + $0x170] sm:$0xff] %v447_v46  ;;  %450 = vst [vmem:[%s3998_s11 + $0x178] sm:$0xff] %v449_v47  ;;  %v453_v49 = vld [vmem:[%s3993_s10 + $0x308] sm:$0xff]  ;;  %v455_v50 = vld [vmem:[%s3993_s10 + $0x310] sm:$0xff] }
  0x2f   : > { %452 = vst [vmem:[%s3998_s11 + $0x180] sm:$0xff] %v451_v48  ;;  %454 = vst [vmem:[%s3998_s11 + $0x188] sm:$0xff] %v453_v49  ;;  %v457_v51 = vld [vmem:[%s3993_s10 + $0x318] sm:$0xff]  ;;  %v459_v52 = vld [vmem:[%s3993_s10 + $0x320] sm:$0xff] }
  0x30   : > { %456 = vst [vmem:[%s3998_s11 + $0x190] sm:$0xff] %v455_v50  ;;  %v461_v53 = vld [vmem:[%s3993_s10 + $0x328] sm:$0xff]  ;;  %458 = vst [vmem:[%s3998_s11 + $0x198] sm:$0xff] %v457_v51  ;;  %v463_v54 = vld [vmem:[%s3993_s10 + $0x330] sm:$0xff] }
  0x31   : > { %460 = vst [vmem:[%s3998_s11 + $0x1a0] sm:$0xff] %v459_v52  ;;  %462 = vst [vmem:[%s3998_s11 + $0x1a8] sm:$0xff] %v461_v53  ;;  %v465_v55 = vld [vmem:[%s3993_s10 + $0x338] sm:$0xff]  ;;  %v467_v56 = vld [vmem:[%s3993_s10 + $0x340] sm:$0xff] }
  0x32   : > { %464 = vst [vmem:[%s3998_s11 + $0x1b0] sm:$0xff] %v463_v54  ;;  %466 = vst [vmem:[%s3998_s11 + $0x1b8] sm:$0xff] %v465_v55  ;;  %v469_v57 = vld [vmem:[%s3993_s10 + $0x348] sm:$0xff]  ;;  %v471_v58 = vld [vmem:[%s3993_s10 + $0x350] sm:$0xff] }
  0x33   : > { %468 = vst [vmem:[%s3998_s11 + $0x1c0] sm:$0xff] %v467_v56  ;;  %v473_v59 = vld [vmem:[%s3993_s10 + $0x358] sm:$0xff]  ;;  %470 = vst [vmem:[%s3998_s11 + $0x1c8] sm:$0xff] %v469_v57  ;;  %v475_v60 = vld [vmem:[%s3993_s10 + $0x360] sm:$0xff] }
  0x34   : > { %472 = vst [vmem:[%s3998_s11 + $0x1d0] sm:$0xff] %v471_v58  ;;  %474 = vst [vmem:[%s3998_s11 + $0x1d8] sm:$0xff] %v473_v59  ;;  %v477_v61 = vld [vmem:[%s3993_s10 + $0x368] sm:$0xff]  ;;  %v479_v62 = vld [vmem:[%s3993_s10 + $0x370] sm:$0xff] }
  0x35   : > { %476 = vst [vmem:[%s3998_s11 + $0x1e0] sm:$0xff] %v475_v60  ;;  %478 = vst [vmem:[%s3998_s11 + $0x1e8] sm:$0xff] %v477_v61  ;;  %v481_v63 = vld [vmem:[%s3993_s10 + $0x378] sm:$0xff] }
  0x36   : > { %480 = vst [vmem:[%s3998_s11 + $0x1f0] sm:$0xff] %v479_v62  ;;  %482 = vst [vmem:[%s3998_s11 + $0x1f8] sm:$0xff] %v481_v63 }
  0x37 PF: > { %p2949_p10 = scmp.ge.s32.totalorder %s3900_s21, 1  ;;  %p487_p11 = scmp.lt.s32.totalorder %s3900_s21, 3 }
  0x39   : > { %p488_p12 = pnand %p2949_p10, %p487_p11 }
  0x3b   : > { %491 = sbr.rel (%p488_p12) target bundleno = 951 (0x3b7), region = 74 }
  0x42   : > { %s4128_s12 = sand.u32 1, %s3892_s19   ;;  %v743_v0 = vld [vmem:[%s5844_s2] sm:$0xff]  ;;  %v744_v1 = vld [vmem:[%s5844_s2 + $0x8] sm:$0xff]  ;;  %v745_v2 = vld [vmem:[%s5844_s2 + $0x10] sm:$0xff]  ;;  %s3902_s16 = smov 32   ;;  %vm758_vm0 = vcmask 523264  }
  0x43   : > { %s2950_s25 = sshll.u32 %s4128_s12, 9  ;;  %v3370_v3 = vpack.c.bf16 %v744_v1, %v743_v0  ;;  %v746_v4 = vld [vmem:[%s5844_s2 + $0x18] sm:$0xff]  ;;  %v747_v6 = vld [vmem:[%s5844_s2 + $0x20] sm:$0xff]  ;;  %v748_v7 = vld [vmem:[%s5844_s2 + $0x28] sm:$0xff]  ;;  %s2952_s26 = sshll.u32 %s3959_s22, 4  ;;  %vm726_vm1 = vcmask 261120  }
  0x44   : > { %v3374_v5 = vpack.c.bf16 %v746_v4, %v745_v2  ;;  %s4149_s10 = scalar_lea.vmem [#allocation2], %s2950_s25  ;;  %v749_v14 = vld [vmem:[%s5844_s2 + $0x30] sm:$0xff]  ;;  %v750_v15 = vld [vmem:[%s5844_s2 + $0x38] sm:$0xff]  ;;  %v3378_v20 = vpack.c.bf16 %v748_v7, %v747_v6  ;;  %s3903_s25 = smov 96  }
  0x45   : > { %v4152_v8 = vld [vmem:[%s4149_s10] sm:$0xff]  ;;  %3371 = vmatprep.subr.bf16.mxu0 %v3370_v3  ;;  %v4163_v12 = vld [vmem:[%s4149_s10 + $0x10] sm:$0xff]  ;;  %v4183_v19 = vld [vmem:[%s4149_s10 + $0x8] sm:$0xff]  ;;  %v3382_v41 = vpack.c.bf16 %v750_v15, %v749_v14  ;;  %p527_p13 = scmp.lt.s32.totalorder %s2952_s26, 31  ;;  %s3904_s13 = smov 64  }
  0x46   : > { %v4155_v9 = vld [vmem:[%s4149_s10 + $0x80] sm:$0xff]  ;;  %v4166_v13 = vld [vmem:[%s4149_s10 + $0x90] sm:$0xff]  ;;  %3373 = vmatpush3.bf16.msra.mxu0 %v3370_v3  ;;  %v4190_v23 = vld [vmem:[%s4149_s10 + $0x88] sm:$0xff]  ;;  %s2951_s14 = sshll.u32 %s4128_s12, 7 }
  0x47   : > { %v4158_v10 = vld [vmem:[%s4149_s10 + $0x100] sm:$0xff]  ;;  %v614_v11 = vadd.f32 %v4155_v9, %v4152_v8  ;;  %v4178_v17 = vld [vmem:[%s4149_s10 + $0x110] sm:$0xff]  ;;  %v616_v18 = vadd.f32 %v4166_v13, %v4163_v12  ;;  %3375 = vmatprep.subr.bf16.mxu0 %v3374_v5  ;;  %v4193_v24 = vld [vmem:[%s4149_s10 + $0x108] sm:$0xff]  ;;  %v615_v26 = vadd.f32 %v4190_v23, %v4183_v19  ;;  %s6139_s26 = smov (!%p527_p13, %s2952_s26), 31 }
  0x48   : > { %v4175_v16 = vld [vmem:[%s4149_s10 + $0x180] sm:$0xff]  ;;  %v4187_v22 = vld [vmem:[%s4149_s10 + $0x190] sm:$0xff]  ;;  %v4199_v27 = vld [vmem:[%s4149_s10 + $0x18] sm:$0xff]  ;;  %s2953_s30 = sshll.u32 %s6139_s26, 3 }
  0x49   : > { %5888 = vst [vmem:[#allocation6_spill] sm:$0xff] %v4175_v16  ;;  %v630_v21 = vadd.f32 %v614_v11, %v4158_v10  ;;  %5889 = vst [vmem:[#allocation7_spill] sm:$0xff] %v4187_v22  ;;  %v632_v25 = vadd.f32 %v616_v18, %v4178_v17  ;;  %v4202_v28 = vld [vmem:[%s4149_s10 + $0x98] sm:$0xff]  ;;  %v4209_v31 = vld [vmem:[%s4149_s10 + $0x188] sm:$0xff]  ;;  %v631_v36 = vadd.f32 %v615_v26, %v4193_v24  ;;  %s4626_s8 = scalar_lea.vmem %s5842_s0, %s2953_s30  ;;  %s3905_s30 = smov [#allocation3]  }
  0x4a   : > { %v4205_v29 = vld [vmem:[%s4149_s10 + $0x118] sm:$0xff]  ;;  %5890 = vst [vmem:[#allocation8_spill] sm:$0xff] %v4209_v31  ;;  %v617_v32 = vadd.f32 %v4202_v28, %v4199_v27  ;;  %v4214_v33 = vld [vmem:[%s4149_s10 + $0x20] sm:$0xff]  ;;  %3377 = vmatpush3.bf16.msra.mxu0 %v3374_v5  ;;  %v4230_v40 = vld [vmem:[%s4149_s10 + $0x28] sm:$0xff]  ;;  %s3842_s6 = sshll.u32 %s3905_s30, 4  ;;  %s3843_s6 = int_to_ptr.vmem [resolvable:$false] %s3842_s6 }
  0x4b   : > { %v646_v30 = vadd.f32 %v630_v21, %v4175_v16  ;;  %v4217_v34 = vld [vmem:[%s4149_s10 + $0xa0] sm:$0xff]  ;;  %v648_v35 = vadd.f32 %v632_v25, %v4187_v22  ;;  %v4222_v37 = vld [vmem:[%s4149_s10 + $0x198] sm:$0xff]  ;;  %3379 = vmatprep.subr.bf16.mxu0 %v3378_v20  ;;  %v4238_v44 = vld [vmem:[%s4149_s10 + $0xa8] sm:$0xff]  ;;  %v647_v46 = vadd.f32 %v631_v36, %v4209_v31  ;;  %s3844_s7 = scalar_lea.vmem %s3843_s6, 4096 }
  0x4c   : > { %5891 = vst [vmem:[#allocation9_spill] sm:$0xff] %v4222_v37  ;;  %v4225_v38 = vld [vmem:[%s4149_s10 + $0x120] sm:$0xff]  ;;  %v618_v39 = vadd.f32 %v4217_v34, %v4214_v33  ;;  %v633_v42 = vadd.f32 %v617_v32, %v4205_v29  ;;  %v4241_v45 = vld [vmem:[%s4149_s10 + $0x128] sm:$0xff]  ;;  %v619_v48 = vadd.f32 %v4238_v44, %v4230_v40  ;;  %v4249_v49 = vld [vmem:[%s4149_s10 + $0x30] sm:$0xff] }
  0x4d   : > { %678 = vrot.lane.b32.xlu0 %v646_v30, %s3902_s16  ;;  %v4235_v43 = vld [vmem:[%s4149_s10 + $0x1a0] sm:$0xff]  ;;  %682 = vrot.lane.b32.xlu1 %v648_v35, %s3902_s16  ;;  %v4252_v50 = vld [vmem:[%s4149_s10 + $0xb0] sm:$0xff] }
  0x4e   : > { %5892 = vst [vmem:[#allocation10_spill] sm:$0xff] %v4235_v43  ;;  %v634_v47 = vadd.f32 %v618_v39, %v4225_v38  ;;  %v4255_v51 = vld [vmem:[%s4149_s10 + $0x130] sm:$0xff]  ;;  %v649_v52 = vadd.f32 %v633_v42, %v4222_v37  ;;  %v4259_v53 = vld [vmem:[%s4149_s10 + $0x1a8] sm:$0xff]  ;;  %v620_v54 = vadd.f32 %v4252_v50, %v4249_v49  ;;  %v4264_v55 = vld [vmem:[%s4149_s10 + $0x38] sm:$0xff]  ;;  %3381 = vmatpush3.bf16.msra.mxu0 %v3378_v20 }
  0x4f   : > { %5893 = vst [vmem:[#allocation11_spill] sm:$0xff] %v4259_v53  ;;  %v4267_v56 = vld [vmem:[%s4149_s10 + $0xb8] sm:$0xff]  ;;  %v635_v57 = vadd.f32 %v619_v48, %v4241_v45  ;;  %v4276_v60 = vld [vmem:[%s4149_s10 + $0x40] sm:$0xff]  ;;  %3383 = vmatprep.subr.bf16.mxu0 %v3382_v41  ;;  %v4281_v62 = vld [vmem:[%s4149_s10 + $0x1b0] sm:$0xff] }
  0x50   : > { %v4271_v58 = vld [vmem:[%s4149_s10 + $0x138] sm:$0xff]  ;;  %v621_v59 = vadd.f32 %v4267_v56, %v4264_v55  ;;  %v650_v61 = vadd.f32 %v634_v47, %v4235_v43  ;;  %5894 = vst [vmem:[#allocation12_spill] sm:$0xff] %v4281_v62  ;;  %v636_v63 = vadd.f32 %v620_v54, %v4255_v51  ;;  %v4288_v1 = vld [vmem:[%s4149_s10 + $0xc0] sm:$0xff]  ;;  %v4299_v6 = vld [vmem:[%s4149_s10 + $0x48] sm:$0xff] }
  0x51   : > { %680 = vrot.lane.b32.xlu0 %v647_v46, %s3902_s16  ;;  %v4285_v0 = vld [vmem:[%s4149_s10 + $0x1b8] sm:$0xff]  ;;  %684 = vrot.lane.b32.xlu1 %v649_v52, %s3902_s16  ;;  %v651_v2 = vadd.f32 %v635_v57, %v4259_v53  ;;  %v4294_v4 = vld [vmem:[%s4149_s10 + $0x140] sm:$0xff]  ;;  %v622_v5 = vadd.f32 %v4288_v1, %v4276_v60 }
  0x52   : > { %5895 = vst [vmem:[#allocation13_spill] sm:$0xff] %v4285_v0  ;;  %v637_v3 = vadd.f32 %v621_v59, %v4271_v58  ;;  %v4302_v7 = vld [vmem:[%s4149_s10 + $0xc8] sm:$0xff]  ;;  %3310 = vmatprep.mubr.msk.f32.mxu1 %vm758_vm0, %v4288_v1  ;;  %v4312_v15 = vld [vmem:[%s4149_s10 + $0x50] sm:$0xff]  ;;  %3385 = vmatpush3.bf16.msra.mxu0 %v3382_v41  ;;  %v4318_v20 = vld [vmem:[%s4149_s10 + $0x58] sm:$0xff]  ;;  %v652_v21 = vadd.f32 %v636_v63, %v4281_v62 }
  0x53   : > { %v4307_v11 = vld [vmem:[%s4149_s10 + $0x148] sm:$0xff]  ;;  %v623_v14 = vadd.f32 %v4302_v7, %v4299_v6  ;;  %v4315_v18 = vld [vmem:[%s4149_s10 + $0xd0] sm:$0xff]  ;;  %v4323_v25 = vld [vmem:[%s4149_s10 + $0x1c0] sm:$0xff]  ;;  %v638_v26 = vadd.f32 %v622_v5, %v4294_v4 }
  0x54   : > { %5896 = vst [vmem:[#allocation14_spill] sm:$0xff] %v4323_v25  ;;  %v4327_v30 = vld [vmem:[%s4149_s10 + $0x1c8] sm:$0xff]  ;;  %v624_v32 = vadd.f32 %v4315_v18, %v4312_v15  ;;  %v4332_v35 = vld [vmem:[%s4149_s10 + $0xd8] sm:$0xff]  ;;  %v653_v36 = vadd.f32 %v637_v3, %v4285_v0  ;;  %v4338_v41 = vld [vmem:[%s4149_s10 + $0x150] sm:$0xff] }
  0x55   : > { %686 = vrot.lane.b32.xlu0 %v650_v61, %s3902_s16  ;;  %5897 = vst [vmem:[#allocation15_spill] sm:$0xff] %v4327_v30  ;;  %688 = vrot.lane.b32.xlu1 %v651_v2, %s3902_s16  ;;  %v639_v39 = vadd.f32 %v623_v14, %v4307_v11  ;;  %v625_v42 = vadd.f32 %v4332_v35, %v4318_v20  ;;  %v4343_v46 = vld [vmem:[%s4149_s10 + $0x60] sm:$0xff]  ;;  %v4349_v48 = vld [vmem:[%s4149_s10 + $0x158] sm:$0xff] }
  0x56   : > { %v4346_v47 = vld [vmem:[%s4149_s10 + $0xe0] sm:$0xff]  ;;  %v4352_v52 = vld [vmem:[%s4149_s10 + $0x68] sm:$0xff]  ;;  %v654_v57 = vadd.f32 %v638_v26, %v4323_v25  ;;  %v4360_v59 = vld [vmem:[%s4149_s10 + $0x1d0] sm:$0xff]  ;;  %v640_v61 = vadd.f32 %v624_v32, %v4338_v41 }
  0x57   : > { %v4355_v54 = vld [vmem:[%s4149_s10 + $0xe8] sm:$0xff]  ;;  %5898 = vst [vmem:[#allocation16_spill] sm:$0xff] %v4360_v59  ;;  %v4364_v63 = vld [vmem:[%s4149_s10 + $0x1d8] sm:$0xff]  ;;  %v626_v2 = vadd.f32 %v4346_v47, %v4343_v46  ;;  %v655_v3 = vadd.f32 %v639_v39, %v4327_v30  ;;  %v641_v5 = vadd.f32 %v625_v42, %v4349_v48  ;;  %v4372_v14 = vld [vmem:[%s4149_s10 + $0x160] sm:$0xff] }
  0x58   : > { %5899 = vst [vmem:[#allocation17_spill] sm:$0xff] %v4364_v63  ;;  %v4377_v26 = vld [vmem:[%s4149_s10 + $0x70] sm:$0xff]  ;;  %v4383_v25 = vld [vmem:[%s4149_s10 + $0x168] sm:$0xff]  ;;  %v4389_v0 = vld [vmem:[%s4149_s10 + $0xf8] sm:$0xff]  ;;  %v656_v39 = vadd.f32 %v640_v61, %v4360_v59 }
  0x59   : > { %690 = vrot.lane.b32.xlu0 %v652_v21, %s3902_s16  ;;  %692 = vrot.lane.b32.xlu1 %v653_v36, %s3902_s16  ;;  %v627_v21 = vadd.f32 %v4355_v54, %v4352_v52  ;;  %v4380_v32 = vld [vmem:[%s4149_s10 + $0xf0] sm:$0xff]  ;;  %v4386_v36 = vld [vmem:[%s4149_s10 + $0x78] sm:$0xff]  ;;  %v642_v42 = vadd.f32 %v626_v2, %v4372_v14  ;;  %v657_v62 = vadd.f32 %v641_v5, %v4364_v63 }
  0x5a   : > { %v628_v30 = vadd.f32 %v4380_v32, %v4377_v26  ;;  %v4399_v53 = vld [vmem:[%s4149_s10 + $0x1e0] sm:$0xff]  ;;  %v4403_v37 = vld [vmem:[%s4149_s10 + $0x170] sm:$0xff]  ;;  %v4408_v61 = vld [vmem:[%s4149_s10 + $0x1e8] sm:$0xff] }
  0x5b   : > { %5900 = vst [vmem:[#allocation18_spill] sm:$0xff] %v4399_v53  ;;  %v643_v43 = vadd.f32 %v627_v21, %v4383_v25  ;;  %v4411_v2 = vld [vmem:[%s4149_s10 + $0x178] sm:$0xff]  ;;  %v1064_v21 = vld [vmem:[%s5845_s3] sm:$0xff]  ;;  %v1065_v63 = vld [vmem:[%s5845_s3 + $0x8] sm:$0xff] }
  0x5c   : > { %v644_v5 = vadd.f32 %v628_v30, %v4403_v37  ;;  %v1066_v59 = vld [vmem:[%s5845_s3 + $0x10] sm:$0xff]  ;;  %v4437_v31 = vld [vmem:[%s4149_s10 + $0x1f8] sm:$0xff] }
  0x5d   : > { %694 = vrot.lane.b32.xlu0 %v654_v57, %s3902_s16  ;;  %696 = vrot.lane.b32.xlu1 %v655_v3, %s3902_s16  ;;  %v629_v57 = vadd.f32 %v4389_v0, %v4386_v36  ;;  %v658_v3 = vadd.f32 %v642_v42, %v4399_v53  ;;  %v4428_v22 = vld [vmem:[%s4149_s10 + $0x1f0] sm:$0xff]  ;;  %v4431_v42 = vpack.c.bf16 %v1065_v63, %v1064_v21  ;;  %v1067_v53 = vld [vmem:[%s5845_s3 + $0x18] sm:$0xff]  ;;  %v5901_v21 = vld [vmem:[#allocation6_spill] sm:$0xff]  ;;  %s5742_s10 = scalar_lea.vmem [#allocation3], %s2951_s14 }
  0x5e   : > { %v4439_v16 = vpack.c.bf16 %v1067_v53, %v1066_v59  ;;  %v660_v63 = vadd.f32 %v644_v5, %v4428_v22  ;;  %s2863_s15 = sshll.u32 %s5742_s10, 4  ;;  %s5795_s15 = int_to_ptr.vmem [resolvable:$true] %s2863_s15 }
  0x5f   : > { %v645_v30 = vadd.f32 %v629_v57, %v4411_v2  ;;  %3402 = vmatprep.subr.bf16.mxu1 %v4431_v42  ;;  %3387 = vmatprep.subr.bf16.mxu0 %v4431_v42  ;;  %v1070_v57 = vld [vmem:[%s5845_s3 + $0x30] sm:$0xff]  ;;  %s3838_s26 = scalar_lea.vmem %s5795_s15, 2048  ;;  %p3845_p3 = scmp.lt.s32.totalorder %s5795_s15, %s3843_s6 }
  0x60   : > { %3406 = vmatpush3.bf16.msra.mxu1 %v4431_v42  ;;  %p3839_p0 = scmp.ne.s32.totalorder %s5795_s15, %s3838_s26  ;;  %p3846_p4 = scmp.lt.s32.totalorder %s3844_s7, %s3838_s26 }
  0x61   : > { %698 = vrot.lane.b32.xlu0 %v656_v39, %s3902_s16  ;;  %700 = vrot.lane.b32.xlu1 %v657_v62, %s3902_s16  ;;  %v659_v39 = vadd.f32 %v643_v43, %v4408_v61  ;;  %v1068_v62 = vld [vmem:[%s5845_s3 + $0x20] sm:$0xff]  ;;  %v1069_v43 = vld [vmem:[%s5845_s3 + $0x28] sm:$0xff]  ;;  %v661_v53 = vadd.f32 %v645_v30, %v4437_v31 }
  0x62   : > { %3403 = vmatprep.subr.bf16.mxu1 %v4439_v16  ;;  %v4455_v59 = vpack.c.bf16 %v1069_v43, %v1068_v62  ;;  %v5903_v30 = vld [vmem:[#allocation7_spill] sm:$0xff]  ;;  %v537_v62 = vld [vmem:[%s4626_s8 + $0x18] sm:$0xff]  ;;  %p3840_p1 = pnand %p3839_p0, %p3977_p6  ;;  %p3847_p5 = por %p3846_p4, %p3845_p3 }
  0x64   : > { %3407 = vmatpush3.bf16.msra.mxu1 %v4439_v16  ;;  %p3841_p2 = pneg %p3840_p1 }
  0x65   : > { %702 = vrot.lane.b32.xlu0 %v658_v3, %s3902_s16  ;;  %704 = vrot.lane.b32.xlu1 %v659_v39, %s3902_s16  ;;  %v1071_v3 = vld [vmem:[%s5845_s3 + $0x38] sm:$0xff]  ;;  %v5902_v39 = vld [vmem:[#allocation8_spill] sm:$0xff] }
  0x66   : > { %3404 = vmatprep.subr.bf16.mxu1 %v4455_v59  ;;  %v4467_v5 = vpack.c.bf16 %v1071_v3, %v1070_v57  ;;  %v539_v57 = vld [vmem:[%s4626_s8 + $0x28] sm:$0xff]  ;;  %p3848_p7 = pnand %p3847_p5, %p3841_p2 }
  0x68   : > { %3408 = vmatpush3.bf16.msra.mxu1 %v4455_v59 }
  0x69   : > { %706 = vrot.lane.b32.xlu0 %v660_v63, %s3902_s16  ;;  %708 = vrot.lane.b32.xlu1 %v661_v53, %s3902_s16  ;;  %v538_v53 = vld [vmem:[%s4626_s8 + $0x20] sm:$0xff] }
  0x6a   : > { %3405 = vmatprep.subr.bf16.mxu1 %v4467_v5 }
  0x6c   : > { %3409 = vmatpush3.bf16.msra.mxu1 %v4467_v5 }
  0x6d   : > { %1825 = vrot.lane.b32.xlu0 %v4152_v8, %s3903_s25  ;;  %1827 = vrot.lane.b32.xlu1 %v4183_v19, %s3903_s25 }
  0x6f   : > { %3311 = vmatmul.mubr.msk.f32.vlgmr.msra.gmra.mrb[0].mxu1 %vm758_vm0, %v4302_v7 }
  0x70   : > { %3313 = vmatprep.mubr.msk.f32.mxu1 %vm758_vm0, %v4315_v18 }
  0x71   : > { %1829 = vrot.lane.b32.xlu0 %v4163_v12, %s3903_s25  ;;  %1831 = vrot.lane.b32.xlu1 %v4199_v27, %s3903_s25 }
  0x73   : > { %3314 = vmatmul.mubr.msk.f32.gmra.mrb[2].mxu1 %vm758_vm0, %v4332_v35 }
  0x74   : > { %3316 = vmatprep.mubr.msk.f32.mxu1 %vm758_vm0, %v4346_v47 }
  0x75   : > { %1833 = vrot.lane.b32.xlu0 %v4214_v33, %s3903_s25  ;;  %1835 = vrot.lane.b32.xlu1 %v4230_v40, %s3903_s25 }
  0x77   : > { %3317 = vmatmul.mubr.msk.f32.gmra.mrb[4].mxu1 %vm758_vm0, %v4355_v54 }
  0x78   : > { %3319 = vmatprep.mubr.msk.f32.mxu1 %vm758_vm0, %v4380_v32 }
  0x79   : > { %1837 = vrot.lane.b32.xlu0 %v4249_v49, %s3903_s25  ;;  %1839 = vrot.lane.b32.xlu1 %v4264_v55, %s3903_s25 }
  0x7b   : > { %3320 = vmatmul.mubr.msk.f32.gmra.mrb[6].mxu1 %vm758_vm0, %v4389_v0 }
  0x7c   : > { %3322 = vmatprep.mubr.msk.f32.mxu1 %vm758_vm0, %v4158_v10 }
  0x7d   : > { %1841 = vrot.lane.b32.xlu0 %v4276_v60, %s3903_s25  ;;  %1843 = vrot.lane.b32.xlu1 %v4299_v6, %s3903_s25 }
  0x7f   : > { %3323 = vmatmul.mubr.msk.f32.gmra.mrb[8].mxu1 %vm758_vm0, %v4193_v24 }
  0x80   : > { %3325 = vmatprep.mubr.msk.f32.mxu1 %vm758_vm0, %v4178_v17 }
  0x81   : > { %1845 = vrot.lane.b32.xlu0 %v4312_v15, %s3903_s25  ;;  %1847 = vrot.lane.b32.xlu1 %v4318_v20, %s3903_s25 }
  0x83   : > { %3326 = vmatmul.mubr.msk.f32.gmra.mrb[10].mxu1 %vm758_vm0, %v4205_v29 }
  0x84   : > { %3328 = vmatprep.mubr.msk.f32.mxu1 %vm758_vm0, %v4225_v38 }
  0x85   : > { %1849 = vrot.lane.b32.xlu0 %v4343_v46, %s3903_s25  ;;  %1851 = vrot.lane.b32.xlu1 %v4352_v52, %s3903_s25 }
  0x87   : > { %3329 = vmatmul.mubr.msk.f32.gmra.mrb[12].mxu1 %vm758_vm0, %v4241_v45 }
  0x88   : > { %3331 = vmatprep.mubr.msk.f32.mxu1 %vm758_vm0, %v4255_v51 }
  0x89   : > { %1853 = vrot.lane.b32.xlu0 %v4377_v26, %s3903_s25  ;;  %1855 = vrot.lane.b32.xlu1 %v4386_v36, %s3903_s25 }
  0x8b   : > { %3332 = vmatmul.mubr.msk.f32.gmra.mrb[14].mxu1 %vm758_vm0, %v4271_v58 }
  0x8c   : > { %3334 = vmatprep.mubr.msk.f32.mxu1 %vm758_vm0, %v4294_v4 }
  0x8d   : > { %2017 = vrot.lane.b32.xlu0 %v4155_v9, %s3903_s25  ;;  %2019 = vrot.lane.b32.xlu1 %v4190_v23, %s3903_s25 }
  0x8f   : > { %3335 = vmatmul.mubr.msk.f32.gmra.mrb[16].mxu1 %vm758_vm0, %v4307_v11 }
  0x90   : > { %3337 = vmatprep.mubr.msk.f32.mxu1 %vm758_vm0, %v4338_v41 }
  0x91   : > { %2021 = vrot.lane.b32.xlu0 %v4166_v13, %s3903_s25  ;;  %2023 = vrot.lane.b32.xlu1 %v4202_v28, %s3903_s25 }
  0x93   : > { %3338 = vmatmul.mubr.msk.f32.gmra.mrb[18].mxu1 %vm758_vm0, %v4349_v48 }
  0x94   : > { %3340 = vmatprep.mubr.msk.f32.mxu1 %vm758_vm0, %v4372_v14 }
  0x95   : > { %2025 = vrot.lane.b32.xlu0 %v4217_v34, %s3903_s25  ;;  %2027 = vrot.lane.b32.xlu1 %v4238_v44, %s3903_s25 }
  0x97   : > { %3341 = vmatmul.mubr.msk.f32.gmra.mrb[20].mxu1 %vm758_vm0, %v4383_v25 }
  0x98   : > { %3343 = vmatprep.mubr.msk.f32.mxu1 %vm758_vm0, %v4403_v37 }
  0x99   : > { %2029 = vrot.lane.b32.xlu0 %v4252_v50, %s3903_s25  ;;  %2031 = vrot.lane.b32.xlu1 %v4267_v56, %s3903_s25 }
  0x9b   : > { %3344 = vmatmul.mubr.msk.f32.gmra.mrb[22].mxu1 %vm758_vm0, %v4411_v2 }
  0x9c   : > { %3346 = vmatprep.mubr.msk.f32.mxu1 %vm758_vm0, %v5901_v21 }
  0x9d   : > { %2033 = vrot.lane.b32.xlu0 %v4288_v1, %s3903_s25  ;;  %2035 = vrot.lane.b32.xlu1 %v4302_v7, %s3903_s25  ;;  %v5904_v1 = vld [vmem:[#allocation9_spill] sm:$0xff]  ;;  %v5905_v7 = vld [vmem:[#allocation10_spill] sm:$0xff] }
  0x9f   : > { %3347 = vmatmul.mubr.msk.f32.gmra.mrb[24].mxu1 %vm758_vm0, %v5902_v39 }
  0xa0   : > { %3349 = vmatprep.mubr.msk.f32.mxu1 %vm758_vm0, %v5903_v30 }
  0xa1   : > { %2037 = vrot.lane.b32.xlu0 %v4315_v18, %s3903_s25  ;;  %2039 = vrot.lane.b32.xlu1 %v4332_v35, %s3903_s25  ;;  %v5906_v18 = vld [vmem:[#allocation11_spill] sm:$0xff]  ;;  %v5907_v35 = vld [vmem:[#allocation12_spill] sm:$0xff] }
  0xa3   : > { %3350 = vmatmul.mubr.msk.f32.gmra.mrb[26].mxu1 %vm758_vm0, %v5904_v1 }
  0xa4   : > { %3352 = vmatprep.mubr.msk.f32.mxu1 %vm758_vm0, %v5905_v7 }
  0xa5   : > { %2041 = vrot.lane.b32.xlu0 %v4346_v47, %s3903_s25  ;;  %2043 = vrot.lane.b32.xlu1 %v4355_v54, %s3903_s25  ;;  %v5908_v47 = vld [vmem:[#allocation13_spill] sm:$0xff]  ;;  %v5909_v54 = vld [vmem:[#allocation14_spill] sm:$0xff] }
  0xa7   : > { %3353 = vmatmul.mubr.msk.f32.gmra.mrb[28].mxu1 %vm758_vm0, %v5906_v18 }
  0xa8   : > { %3355 = vmatprep.mubr.msk.f32.mxu1 %vm758_vm0, %v5907_v35 }
  0xa9   : > { %2045 = vrot.lane.b32.xlu0 %v4380_v32, %s3903_s25  ;;  %2047 = vrot.lane.b32.xlu1 %v4389_v0, %s3903_s25  ;;  %v5910_v0 = vld [vmem:[#allocation15_spill] sm:$0xff] }
  0xaa   : > { %v535_v32 = vld [vmem:[%s4626_s8 + $0x8] sm:$0xff] }
  0xab   : > { %3356 = vmatmul.mubr.msk.f32.gmra.mrb[30].mxu1 %vm758_vm0, %v5908_v47 }
  0xac   : > { %3358 = vmatprep.mubr.msk.f32.mxu1 %vm758_vm0, %v5909_v54 }
  0xad   : > { %2209 = vrot.lane.b32.xlu0 %v4158_v10, %s3903_s25  ;;  %2211 = vrot.lane.b32.xlu1 %v4193_v24, %s3903_s25  ;;  %v5911_v10 = vld [vmem:[#allocation16_spill] sm:$0xff]  ;;  %v5912_v24 = vld [vmem:[#allocation17_spill] sm:$0xff] }
  0xaf   : > { %3359 = vmatmul.mubr.msk.f32.gmra.mrb[32].mxu1 %vm758_vm0, %v5910_v0 }
  0xb0   : > { %3361 = vmatprep.mubr.msk.f32.mxu1 %vm758_vm0, %v5911_v10 }
  0xb1   : > { %2213 = vrot.lane.b32.xlu0 %v4178_v17, %s3903_s25  ;;  %2215 = vrot.lane.b32.xlu1 %v4205_v29, %s3903_s25  ;;  %v5913_v17 = vld [vmem:[#allocation18_spill] sm:$0xff] }
  0xb2   : > { %v534_v29 = vld [vmem:[%s4626_s8] sm:$0xff] }
  0xb3   : > { %3362 = vmatmul.mubr.msk.f32.gmra.mrb[34].mxu1 %vm758_vm0, %v5912_v24 }
  0xb4   : > { %3364 = vmatprep.mubr.msk.f32.mxu1 %vm758_vm0, %v5913_v17 }
  0xb5   : > { %2217 = vrot.lane.b32.xlu0 %v4225_v38, %s3903_s25  ;;  %2219 = vrot.lane.b32.xlu1 %v4241_v45, %s3903_s25 }
  0xb7   : > { %3365 = vmatmul.mubr.msk.f32.gmra.mrb[36].mxu1 %vm758_vm0, %v4408_v61 }
  0xb8   : > { %3367 = vmatprep.mubr.msk.f32.mxu1 %vm758_vm0, %v4428_v22 }
  0xb9   : > { %2221 = vrot.lane.b32.xlu0 %v4255_v51, %s3903_s25  ;;  %2223 = vrot.lane.b32.xlu1 %v4271_v58, %s3903_s25  ;;  %v536_v51 = vld [vmem:[%s4626_s8 + $0x10] sm:$0xff] }
  0xbb   : > { %3368 = vmatmul.mubr.msk.f32.gmra.mrb[38].mxu1 %vm758_vm0, %v4437_v31 }
  0xbd   : > { %2225 = vrot.lane.b32.xlu0 %v4294_v4, %s3903_s25  ;;  %2227 = vrot.lane.b32.xlu1 %v4307_v11, %s3903_s25 }
  0xbf   : > { %v679_v38 = vpop.permute.xlu0 %678  ;;  %v683_v58 = vpop.permute.xlu1 %682 }
  0xc0   : > { %v727_v45 = vsel %vm726_vm1, %v534_v29, %v679_v38  ;;  %v729_v4 = vsel %vm726_vm1, %v536_v51, %v683_v58 }
  0xc1   : > { %3234 = vmatprep.mubr.msk.f32.mxu0 %vm758_vm0, %v727_v45  ;;  %2229 = vrot.lane.b32.xlu0 %v4338_v41, %s3903_s25  ;;  %v541_v45 = vld [vmem:[%s4626_s8 + $0x38] sm:$0xff] }
  0xc2   : > { %2231 = vrot.lane.b32.xlu1 %v4349_v48, %s3903_s25 }
  0xc3   : > { %v681_v11 = vpop.permute.xlu0 %680  ;;  %v685_v63 = vpop.permute.xlu1 %684 }
  0xc4   : > { %v728_v43 = vsel %vm726_vm1, %v535_v32, %v681_v11  ;;  %v730_v41 = vsel %vm726_vm1, %v537_v62, %v685_v63  ;;  %v543_v32 = vld [vmem:[%s4626_s8 + $0x48] sm:$0xff]  ;;  %v545_v62 = vld [vmem:[%s4626_s8 + $0x58] sm:$0xff]  ;;  %v546_v63 = vld [vmem:[%s4626_s8 + $0x60] sm:$0xff] }
  0xc5   : > { %3235 = vmatmul.mubr.msk.f32.vlgmr.msra.gmra.mrb[0].mxu0 %vm758_vm0, %v728_v43  ;;  %2233 = vrot.lane.b32.xlu0 %v4372_v14, %s3903_s25  ;;  %v540_v14 = vld [vmem:[%s4626_s8 + $0x30] sm:$0xff] }
  0xc6   : > { %3237 = vmatprep.mubr.msk.f32.mxu0 %vm758_vm0, %v729_v4  ;;  %3389 = vmatpush3.bf16.msra.mxu0 %v4431_v42 }
  0xc7   : > { %v687_v48 = vpop.permute.xlu0 %686  ;;  %3391 = vmatprep.subr.bf16.mxu0 %v4439_v16  ;;  %2235 = vrot.lane.b32.xlu1 %v4383_v25, %s3903_s25  ;;  %v689_v29 = vpop.permute.xlu1 %688 }
  0xc8   : > { %v731_v3 = vsel %vm726_vm1, %v538_v53, %v687_v48  ;;  %v732_v38 = vsel %vm726_vm1, %v539_v57, %v689_v29  ;;  %v547_v53 = vld [vmem:[%s4626_s8 + $0x68] sm:$0xff]  ;;  %v548_v48 = vld [vmem:[%s4626_s8 + $0x70] sm:$0xff] }
  0xc9   : > { %3238 = vmatmul.mubr.msk.f32.gmra.mrb[2].mxu0 %vm758_vm0, %v730_v41  ;;  %2237 = vrot.lane.b32.xlu0 %v4403_v37, %s3903_s25  ;;  %v542_v37 = vld [vmem:[%s4626_s8 + $0x40] sm:$0xff] }
  0xca   : > { %3240 = vmatprep.mubr.msk.f32.mxu0 %vm758_vm0, %v731_v3  ;;  %3393 = vmatpush3.bf16.msra.mxu0 %v4439_v16  ;;  %v549_v3 = vld [vmem:[%s4626_s8 + $0x78] sm:$0xff] }
  0xcb   : > { %v691_v42 = vpop.permute.xlu0 %690  ;;  %3395 = vmatprep.subr.bf16.mxu0 %v4455_v59  ;;  %2239 = vrot.lane.b32.xlu1 %v4411_v2, %s3903_s25  ;;  %v693_v51 = vpop.permute.xlu1 %692 }
  0xcc   : > { %v733_v25 = vsel %vm726_vm1, %v540_v14, %v691_v42  ;;  %v734_v58 = vsel %vm726_vm1, %v541_v45, %v693_v51 }
  0xcd   : > { %3241 = vmatmul.mubr.msk.f32.gmra.mrb[4].mxu0 %vm758_vm0, %v732_v38  ;;  %2401 = vrot.lane.b32.xlu0 %v5901_v21, %s3903_s25  ;;  %v544_v21 = vld [vmem:[%s4626_s8 + $0x50] sm:$0xff] }
  0xce   : > { %3243 = vmatprep.mubr.msk.f32.mxu0 %vm758_vm0, %v733_v25  ;;  %3397 = vmatpush3.bf16.msra.mxu0 %v4455_v59 }
  0xcf   : > { %v695_v16 = vpop.permute.xlu0 %694  ;;  %3399 = vmatprep.subr.bf16.mxu0 %v4467_v5  ;;  %2403 = vrot.lane.b32.xlu1 %v5902_v39, %s3903_s25  ;;  %v697_v4 = vpop.permute.xlu1 %696 }
  0xd0   : > { %v735_v2 = vsel %vm726_vm1, %v542_v37, %v695_v16  ;;  %v736_v59 = vsel %vm726_vm1, %v543_v32, %v697_v4 }
  0xd1   : > { %3244 = vmatmul.mubr.msk.f32.gmra.mrb[6].mxu0 %vm758_vm0, %v734_v58  ;;  %2405 = vrot.lane.b32.xlu0 %v5903_v30, %s3903_s25 }
  0xd2   : > { %3246 = vmatprep.mubr.msk.f32.mxu0 %vm758_vm0, %v735_v2  ;;  %3401 = vmatpush3.bf16.msra.mxu0 %v4467_v5 }
  0xd3   : > { %v699_v11 = vpop.permute.xlu0 %698  ;;  %2407 = vrot.lane.b32.xlu1 %v5904_v1, %s3903_s25  ;;  %v701_v43 = vpop.permute.xlu1 %700 }
  0xd4   : > { %v737_v39 = vsel %vm726_vm1, %v544_v21, %v699_v11  ;;  %v738_v30 = vsel %vm726_vm1, %v545_v62, %v701_v43 }
  0xd5   : > { %3247 = vmatmul.mubr.msk.f32.gmra.mrb[8].mxu0 %vm758_vm0, %v736_v59  ;;  %2409 = vrot.lane.b32.xlu0 %v5905_v7, %s3903_s25 }
  0xd6   : > { %3249 = vmatprep.mubr.msk.f32.mxu0 %vm758_vm0, %v737_v39 }
  0xd7   : > { %v703_v5 = vpop.permute.xlu0 %702  ;;  %2411 = vrot.lane.b32.xlu1 %v5906_v18, %s3903_s25  ;;  %v705_v41 = vpop.permute.xlu1 %704 }
  0xd8   : > { %v739_v1 = vsel %vm726_vm1, %v546_v63, %v703_v5  ;;  %v740_v7 = vsel %vm726_vm1, %v547_v53, %v705_v41  ;;  %v4884_v63 = vld [vmem:[%s5846_s4] ss:$0 sm:$0xff] }
  0xd9   : > { %3250 = vmatmul.mubr.msk.f32.gmra.mrb[10].mxu0 %vm758_vm0, %v738_v30  ;;  %2413 = vrot.lane.b32.xlu0 %v5907_v35, %s3903_s25 }
  0xda   : > { %3252 = vmatprep.mubr.msk.f32.mxu0 %vm758_vm0, %v739_v1 }
  0xdb   : > { %v707_v57 = vpop.permute.xlu0 %706  ;;  %2415 = vrot.lane.b32.xlu1 %v5908_v47, %s3903_s25  ;;  %v709_v29 = vpop.permute.xlu1 %708 }
  0xdc   : > { %v741_v18 = vsel %vm726_vm1, %v548_v48, %v707_v57  ;;  %v742_v14 = vsel %vm726_vm1, %v549_v3, %v709_v29 }
  0xdd   : > { %3253 = vmatmul.mubr.msk.f32.gmra.mrb[12].mxu0 %vm758_vm0, %v740_v7  ;;  %2417 = vrot.lane.b32.xlu0 %v5909_v54, %s3903_s25 }
  0xde   : > { %3255 = vmatprep.mubr.msk.f32.mxu0 %vm758_vm0, %v741_v18 }
  0xdf   : > { %2419 = vrot.lane.b32.xlu1 %v5910_v0, %s3903_s25 }
  0xe1   : > { %3256 = vmatmul.mubr.msk.f32.gmra.mrb[14].mxu0 %vm758_vm0, %v742_v14  ;;  %2421 = vrot.lane.b32.xlu0 %v5911_v10, %s3903_s25 }
  0xe2   : > { %3274 = vmatprep.mubr.msk.f32.mxu0 %vm758_vm0, %v4152_v8  ;;  %v4783_v8 = vpop.permute.xlu1 %1827 }
  0xe3   : > { %2423 = vrot.lane.b32.xlu1 %v5912_v24, %s3903_s25  ;;  %5914 = vst [vmem:[#allocation6_spill] sm:$0xff] %v4783_v8 }
  0xe5   : > { %3275 = vmatmul.mubr.msk.f32.vlgmr.msra.gmra.mrb[16].mxu0 %vm758_vm0, %v4183_v19  ;;  %2425 = vrot.lane.b32.xlu0 %v5913_v17, %s3903_s25 }
  0xe6   : > { %3277 = vmatprep.mubr.msk.f32.mxu0 %vm758_vm0, %v4163_v12  ;;  %v4787_v12 = vpop.permute.xlu1 %1831 }
  0xe7   : > { %2427 = vrot.lane.b32.xlu1 %v4408_v61, %s3903_s25  ;;  %5916 = vst [vmem:[#allocation7_spill] sm:$0xff] %v4787_v12 }
  0xe9   : > { %3278 = vmatmul.mubr.msk.f32.gmra.mrb[18].mxu0 %vm758_vm0, %v4199_v27 }
  0xea   : > { %3280 = vmatprep.mubr.msk.f32.mxu0 %vm758_vm0, %v4214_v33 }
  0xed   : > { %3281 = vmatmul.mubr.msk.f32.gmra.mrb[20].mxu0 %vm758_vm0, %v4230_v40 }
  0xee   : > { %3283 = vmatprep.mubr.msk.f32.mxu0 %vm758_vm0, %v4249_v49 }
  0xf1   : > { %3284 = vmatmul.mubr.msk.f32.gmra.mrb[22].mxu0 %vm758_vm0, %v4264_v55 }
  0xf2   : > { %3286 = vmatprep.mubr.msk.f32.mxu0 %vm758_vm0, %v4276_v60 }
  0xf5   : > { %3287 = vmatmul.mubr.msk.f32.gmra.mrb[24].mxu0 %vm758_vm0, %v4299_v6 }
  0xf6   : > { %3289 = vmatprep.mubr.msk.f32.mxu0 %vm758_vm0, %v4312_v15 }
  0xf9   : > { %3290 = vmatmul.mubr.msk.f32.gmra.mrb[26].mxu0 %vm758_vm0, %v4318_v20 }
  0xfa   : > { %3292 = vmatprep.mubr.msk.f32.mxu0 %vm758_vm0, %v4343_v46 }
  0xfd   : > { %3293 = vmatmul.mubr.msk.f32.gmra.mrb[28].mxu0 %vm758_vm0, %v4352_v52 }
  0xfe   : > { %3295 = vmatprep.mubr.msk.f32.mxu0 %vm758_vm0, %v4377_v26 }
 0x101   : > { %3296 = vmatmul.mubr.msk.f32.gmra.mrb[30].mxu0 %vm758_vm0, %v4386_v36 }
 0x102   : > { %3298 = vmatprep.mubr.msk.f32.mxu0 %vm758_vm0, %v4155_v9  ;;  %v4785_v9 = vpop.permute.xlu0 %1825 }
 0x103   : > { %5915 = vst [vmem:[#allocation8_spill] sm:$0xff] %v4785_v9 }
 0x105   : > { %3299 = vmatmul.mubr.msk.f32.gmra.mrb[32].mxu0 %vm758_vm0, %v4190_v23  ;;  %v4793_v23 = vpop.permute.xlu1 %1835 }
 0x106   : > { %3301 = vmatprep.mubr.msk.f32.mxu0 %vm758_vm0, %v4166_v13  ;;  %v4789_v13 = vpop.permute.xlu0 %1829  ;;  %5918 = vst [vmem:[#allocation10_spill] sm:$0xff] %v4793_v23 }
 0x107   : > { %5917 = vst [vmem:[#allocation9_spill] sm:$0xff] %v4789_v13 }
 0x109   : > { %3302 = vmatmul.mubr.msk.f32.gmra.mrb[34].mxu0 %vm758_vm0, %v4202_v28 }
 0x10a   : > { %3304 = vmatprep.mubr.msk.f32.mxu0 %vm758_vm0, %v4217_v34  ;;  %v4799_v33 = vpop.permute.xlu0 %1833 }
 0x10b   : > { %5920 = vst [vmem:[#allocation12_spill] sm:$0xff] %v4799_v33 }
 0x10d   : > { %3305 = vmatmul.mubr.msk.f32.gmra.mrb[36].mxu0 %vm758_vm0, %v4238_v44 }
 0x10e   : > { %3307 = vmatprep.mubr.msk.f32.mxu0 %vm758_vm0, %v4252_v50  ;;  %v4809_v50 = vpop.permute.xlu1 %1839  ;;  %v4815_v60 = vpop.permute.xlu0 %1837 }
 0x10f   : > { %5925 = vst [vmem:[#allocation17_spill] sm:$0xff] %v4809_v50  ;;  %5927 = vst [vmem:[#allocation19_spill] sm:$0xff] %v4815_v60 }
 0x111   : > { %3308 = vmatmul.mubr.msk.f32.gmra.mrb[38].mxu0 %vm758_vm0, %v4267_v56 }
 0x112   : > { %v4825_v52 = vpop.permute.xlu1 %1843  ;;  %v4831_v61 = vpop.permute.xlu0 %1841 }
 0x113   : > { %5928 = vst [vmem:[#allocation20_spill] sm:$0xff] %v4825_v52  ;;  %5929 = vst [vmem:[#allocation21_spill] sm:$0xff] %v4831_v61 }
 0x116   : > { %v4841_v10 = vpop.permute.xlu1 %1847  ;;  %v4847_v38 = vpop.permute.xlu0 %1845 }
 0x117   : > { %5932 = vst [vmem:[#allocation24_spill] sm:$0xff] %v4841_v10  ;;  %5935 = vst [vmem:[#allocation27_spill] sm:$0xff] %v4847_v38 }
 0x11a   : > { %v4855_v51 = vpop.permute.xlu1 %1851  ;;  %v4857_v37 = vpop.permute.xlu0 %1849 }
 0x11b   : > { %5939 = vst [vmem:[#allocation31_spill] sm:$0xff] %v4855_v51  ;;  %5940 = vst [vmem:[#allocation32_spill] sm:$0xff] %v4857_v37 }
 0x11e   : > { %v4861_v16 = vpop.permute.xlu1 %1855  ;;  %v4863_v32 = vpop.permute.xlu0 %1853 }
 0x11f   : > { %5941 = vst [vmem:[#allocation33_spill] sm:$0xff] %v4861_v16  ;;  %5942 = vst [vmem:[#allocation34_spill] sm:$0xff] %v4863_v32 }
 0x122   : > { %v4865_v2 = vpop.permute.xlu1 %2019  ;;  %v4867_v4 = vpop.permute.xlu0 %2017 }
 0x123   : > { %5943 = vst [vmem:[#allocation35_spill] sm:$0xff] %v4865_v2  ;;  %5944 = vst [vmem:[#allocation36_spill] sm:$0xff] %v4867_v4 }
 0x126   : > { %v4869_v21 = vpop.permute.xlu1 %2023  ;;  %v4871_v59 = vpop.permute.xlu0 %2021 }
 0x127   : > { %5945 = vst [vmem:[#allocation37_spill] sm:$0xff] %v4869_v21  ;;  %5946 = vst [vmem:[#allocation38_spill] sm:$0xff] %v4871_v59 }
 0x12a   : > { %v4873_v11 = vpop.permute.xlu1 %2027  ;;  %v4875_v62 = vpop.permute.xlu0 %2025 }
 0x12b   : > { %5947 = vst [vmem:[#allocation39_spill] sm:$0xff] %v4873_v11  ;;  %5948 = vst [vmem:[#allocation40_spill] sm:$0xff] %v4875_v62 }
 0x12e   : > { %v4877_v39 = vpop.permute.xlu1 %2031  ;;  %v4879_v43 = vpop.permute.xlu0 %2029 }
 0x12f   : > { %5949 = vst [vmem:[#allocation41_spill] sm:$0xff] %v4877_v39  ;;  %5950 = vst [vmem:[#allocation42_spill] sm:$0xff] %v4879_v43 }
 0x132   : > { %v4889_v1 = vpop.permute.xlu1 %2035  ;;  %v4896_v48 = vpop.permute.xlu0 %2033 }
 0x133   : > { %5951 = vst [vmem:[#allocation43_spill] sm:$0xff] %v4889_v1  ;;  %5952 = vst [vmem:[#allocation44_spill] sm:$0xff] %v4896_v48 }
 0x136   : > { %v4910_v14 = vpop.permute.xlu1 %2039  ;;  %v4921_v37 = vpop.permute.xlu0 %2037 }
 0x137   : > { %5953 = vst [vmem:[#allocation45_spill] sm:$0xff] %v4910_v14  ;;  %5954 = vst [vmem:[#allocation46_spill] sm:$0xff] %v4921_v37 }
 0x13a   : > { %v4933_v10 = vpop.permute.xlu1 %2043 }
 0x13b   : > { %5955 = vst [vmem:[#allocation47_spill] sm:$0xff] %v4933_v10 }
 0x142   : > { %v4791_v19 = vpop.f32.mrb[0].mxu1 }
 0x143   : > { %v4795_v27 = vpop.f32.mrb[1].mxu1 }
 0x146   : > { %v4797_v28 = vpop.f32.mrb[2].mxu1 }
 0x147   : > { %5919 = vst [vmem:[#allocation11_spill] sm:$0xff] %v4797_v28  ;;  %v4801_v34 = vpop.f32.mrb[3].mxu1 }
 0x148   : > { %5921 = vst [vmem:[#allocation13_spill] sm:$0xff] %v4801_v34 }
 0x14a   : > { %v4803_v40 = vpop.f32.mrb[4].mxu1 }
 0x14b   : > { %5922 = vst [vmem:[#allocation14_spill] sm:$0xff] %v4803_v40  ;;  %v4805_v44 = vpop.f32.mrb[5].mxu1 }
 0x14c   : > { %5923 = vst [vmem:[#allocation15_spill] sm:$0xff] %v4805_v44 }
 0x14e   : > { %v4807_v49 = vpop.f32.mrb[6].mxu1 }
 0x14f   : > { %5924 = vst [vmem:[#allocation16_spill] sm:$0xff] %v4807_v49  ;;  %v4811_v55 = vpop.f32.mrb[7].mxu1 }
 0x150   : > { %5926 = vst [vmem:[#allocation18_spill] sm:$0xff] %v4811_v55 }
 0x152   : > { %v4813_v56 = vpop.f32.mrb[8].mxu1 }
 0x153   : > { %v4817_v6 = vpop.f32.mrb[9].mxu1 }
 0x156   : > { %v4819_v15 = vpop.f32.mrb[10].mxu1 }
 0x157   : > { %v4821_v20 = vpop.f32.mrb[11].mxu1 }
 0x15a   : > { %v4823_v46 = vpop.f32.mrb[12].mxu1 }
 0x15b   : > { %v4827_v26 = vpop.f32.mrb[13].mxu1 }
 0x15e   : > { %v4829_v36 = vpop.f32.mrb[14].mxu1 }
 0x15f   : > { %v4833_v35 = vpop.f32.mrb[15].mxu1 }
 0x162   : > { %v4835_v47 = vpop.f32.mrb[16].mxu1 }
 0x163   : > { %v4837_v54 = vpop.f32.mrb[17].mxu1 }
 0x164   : > { %5930 = vst [vmem:[#allocation22_spill] sm:$0xff] %v4837_v54 }
 0x166   : > { %v4839_v0 = vpop.f32.mrb[18].mxu1 }
 0x167   : > { %5931 = vst [vmem:[#allocation23_spill] sm:$0xff] %v4839_v0  ;;  %v4843_v24 = vpop.f32.mrb[19].mxu1 }
 0x168   : > { %5933 = vst [vmem:[#allocation25_spill] sm:$0xff] %v4843_v24 }
 0x16a   : > { %v4845_v17 = vpop.f32.mrb[20].mxu1 }
 0x16b   : > { %5934 = vst [vmem:[#allocation26_spill] sm:$0xff] %v4845_v17  ;;  %v4849_v42 = vpop.f32.mrb[21].mxu1 }
 0x16c   : > { %5936 = vst [vmem:[#allocation28_spill] sm:$0xff] %v4849_v42 }
 0x16e   : > { %v4851_v45 = vpop.f32.mrb[22].mxu1 }
 0x16f   : > { %5937 = vst [vmem:[#allocation29_spill] sm:$0xff] %v4851_v45  ;;  %v4853_v25 = vpop.f32.mrb[23].mxu1 }
 0x170   : > { %5938 = vst [vmem:[#allocation30_spill] sm:$0xff] %v4853_v25 }
 0x172   : > { %v4859_v58 = vpop.f32.mrb[24].mxu1 }
 0x173   : > { %v4900_v57 = vpop.f32.mrb[25].mxu1 }
 0x198   : > { %v3236_v30 = vpop.f32.mrb[0].mxu0 }
 0x199   : > { %v4887_v5 = vadd.f32 %v3236_v30, %v4884_v63  ;;  %v873_v53 = vpop.f32.mrb[1].mxu0  ;;  %v4912_v30 = vpop.f32.mrb[26].mxu1 }
 0x19a   : > { %v4892_v41 = vadd.f32 %v4884_v63, %v873_v53  ;;  %v4916_v32 = vpop.f32.mrb[27].mxu1 }
 0x19b   : > { %1667 = vrot.lane.b32.xlu1 %v4887_v5, %s3902_s16  ;;  %v4956_v10 = vpop.f32.mrb[28].mxu1  ;;  %3454 = vtanh.f32 %v4887_v5 }
 0x19c   : > { %v3239_v7 = vpop.f32.mrb[2].mxu0  ;;  %1665 = vrot.lane.b32.xlu0 %v4892_v41, %s3902_s16  ;;  %v4966_v43 = vpop.f32.mrb[29].mxu1  ;;  %3456 = vtanh.f32 %v4892_v41 }
 0x19d   : > { %v4903_v3 = vadd.f32 %v3239_v7, %v4884_v63  ;;  %v883_v18 = vpop.f32.mrb[3].mxu0  ;;  %v4987_v62 = vpop.f32.mrb[30].mxu1 }
 0x19e   : > { %v4906_v29 = vadd.f32 %v4884_v63, %v883_v18  ;;  %v5033_v4 = vpop.f32.mrb[31].mxu1 }
 0x19f   : > { %1671 = vrot.lane.b32.xlu1 %v4903_v3, %s3902_s16  ;;  %3458 = vtanh.f32 %v4903_v3  ;;  %v5054_v2 = vpop.f32.mrb[32].mxu1 }
 0x1a0   : > { %1669 = vrot.lane.b32.xlu0 %v4906_v29, %s3902_s16  ;;  %v3242_v53 = vpop.f32.mrb[4].mxu0  ;;  %3460 = vtanh.f32 %v4906_v29  ;;  %v5059_v25 = vpop.f32.mrb[33].mxu1 }
 0x1a1   : > { %v4919_v7 = vadd.f32 %v3242_v53, %v4884_v63  ;;  %v893_v16 = vpop.f32.mrb[5].mxu0  ;;  %5968 = vst [vmem:[#allocation60_spill] sm:$0xff] %v5059_v25 }
 0x1a2   : > { %v4924_v18 = vadd.f32 %v4884_v63, %v893_v16  ;;  %v4940_v16 = vpop.permute.xlu0 %2041 }
 0x1a3   : > { %1675 = vrot.lane.b32.xlu1 %v4919_v7, %s3902_s16  ;;  %5956 = vst [vmem:[#allocation48_spill] sm:$0xff] %v4940_v16  ;;  %3462 = vtanh.f32 %v4919_v7  ;;  %v2976_v25 = vmul.f32 -1.442695, %v4919_v7 }
 0x1a4   : > { %1673 = vrot.lane.b32.xlu0 %v4924_v18, %s3902_s16  ;;  %v3245_v51 = vpop.f32.mrb[6].mxu0  ;;  %3464 = vtanh.f32 %v4924_v18 }
 0x1a5   : > { %v4931_v38 = vadd.f32 %v3245_v51, %v4884_v63  ;;  %v903_v14 = vpop.f32.mrb[7].mxu0  ;;  %v3455_v13 = vpop.eup %3454 }
 0x1a6   : > { %v4936_v53 = vadd.f32 %v4884_v63, %v903_v14  ;;  %v4952_v14 = vpop.permute.xlu1 %2047  ;;  %v4961_v52 = vpop.permute.xlu0 %2045 }
 0x1a7   : > { %1679 = vrot.lane.b32.xlu1 %v4931_v38, %s3902_s16  ;;  %5957 = vst [vmem:[#allocation49_spill] sm:$0xff] %v4952_v14  ;;  %5958 = vst [vmem:[#allocation50_spill] sm:$0xff] %v4961_v52  ;;  %3466 = vtanh.f32 %v4931_v38 }
 0x1a8   : > { %1677 = vrot.lane.b32.xlu0 %v4936_v53, %s3902_s16  ;;  %v3248_v37 = vpop.f32.mrb[8].mxu0  ;;  %3468 = vtanh.f32 %v4936_v53 }
 0x1a9   : > { %v4945_v48 = vadd.f32 %v3248_v37, %v4884_v63  ;;  %v913_v51 = vpop.f32.mrb[9].mxu0 }
 0x1aa   : > { %v4948_v61 = vadd.f32 %v4884_v63, %v913_v51  ;;  %v4982_v52 = vpop.permute.xlu0 %2209 }
 0x1ab   : > { %1683 = vrot.lane.b32.xlu1 %v4945_v48, %s3902_s16  ;;  %5960 = vst [vmem:[#allocation52_spill] sm:$0xff] %v4982_v52  ;;  %3470 = vtanh.f32 %v4945_v48 }
 0x1ac   : > { %1681 = vrot.lane.b32.xlu0 %v4948_v61, %s3902_s16  ;;  %v3251_v16 = vpop.f32.mrb[10].mxu0  ;;  %3472 = vtanh.f32 %v4948_v61 }
 0x1ad   : > { %v4959_v1 = vadd.f32 %v3251_v16, %v4884_v63  ;;  %v923_v37 = vpop.f32.mrb[11].mxu0 }
 0x1ae   : > { %v4964_v51 = vadd.f32 %v4884_v63, %v923_v37  ;;  %v4980_v37 = vpop.permute.xlu1 %2211  ;;  %v5008_v59 = vpop.permute.xlu0 %2213 }
 0x1af   : > { %1687 = vrot.lane.b32.xlu1 %v4959_v1, %s3902_s16  ;;  %5959 = vst [vmem:[#allocation51_spill] sm:$0xff] %v4980_v37  ;;  %5962 = vst [vmem:[#allocation54_spill] sm:$0xff] %v5008_v59  ;;  %3474 = vtanh.f32 %v4959_v1 }
 0x1b0   : > { %1685 = vrot.lane.b32.xlu0 %v4964_v51, %s3902_s16  ;;  %v3254_v14 = vpop.f32.mrb[12].mxu0  ;;  %3476 = vtanh.f32 %v4964_v51 }
 0x1b1   : > { %v4973_v60 = vadd.f32 %v3254_v14, %v4884_v63  ;;  %v933_v16 = vpop.f32.mrb[13].mxu0 }
 0x1b2   : > { %v4976_v39 = vadd.f32 %v4884_v63, %v933_v16  ;;  %v5004_v23 = vpop.permute.xlu1 %2215 }
 0x1b3   : > { %1691 = vrot.lane.b32.xlu1 %v4973_v60, %s3902_s16  ;;  %5961 = vst [vmem:[#allocation53_spill] sm:$0xff] %v5004_v23  ;;  %v3457_v23 = vpop.eup %3456  ;;  %3478 = vtanh.f32 %v4973_v60 }
 0x1b4   : > { %1689 = vrot.lane.b32.xlu0 %v4976_v39, %s3902_s16  ;;  %v3257_v50 = vpop.f32.mrb[14].mxu0  ;;  %v3459_v12 = vpop.eup %3458  ;;  %3480 = vtanh.f32 %v4976_v39 }
 0x1b5   : > { %v4991_v14 = vadd.f32 %v3257_v50, %v4884_v63  ;;  %v943_v16 = vpop.f32.mrb[15].mxu0  ;;  %v3461_v52 = vpop.eup %3460 }
 0x1b6   : > { %v4994_v33 = vadd.f32 %v4884_v63, %v943_v16  ;;  %v5021_v59 = vpop.permute.xlu1 %2219 }
 0x1b7   : > { %1695 = vrot.lane.b32.xlu1 %v4991_v14, %s3902_s16  ;;  %5963 = vst [vmem:[#allocation55_spill] sm:$0xff] %v5021_v59  ;;  %v3463_v59 = vpop.eup %3462  ;;  %3482 = vtanh.f32 %v4991_v14 }
 0x1b8   : > { %1693 = vrot.lane.b32.xlu0 %v4994_v33, %s3902_s16  ;;  %v5001_v11 = vpop.f32.mrb[16].mxu0  ;;  %v3465_v37 = vpop.eup %3464  ;;  %3484 = vtanh.f32 %v4994_v33 }
 0x1b9   : > { %v5006_v50 = vpop.f32.mrb[17].mxu0 }
 0x1bb   : > { %2431 = vrot.lane.b32.xlu1 %v4437_v31, %s3903_s25  ;;  %v5025_v31 = vpop.permute.xlu0 %2217 }
 0x1bc   : > { %2429 = vrot.lane.b32.xlu0 %v4428_v22, %s3903_s25  ;;  %v5015_v63 = vpop.f32.mrb[18].mxu0  ;;  %5964 = vst [vmem:[#allocation56_spill] sm:$0xff] %v5025_v31 }
 0x1bd   : > { %v5018_v16 = vpop.f32.mrb[19].mxu0 }
 0x1bf   : > { %2499 = vrot.lane.b32.xlu1 %v3455_v13, %s3904_s13  ;;  %v5044_v9 = vpop.permute.xlu0 %2221 }
 0x1c0   : > { %2497 = vrot.lane.b32.xlu0 %v3457_v23, %s3904_s13  ;;  %v5027_v22 = vpop.f32.mrb[20].mxu0  ;;  %v5040_v23 = vpop.permute.xlu1 %2223  ;;  %5966 = vst [vmem:[#allocation58_spill] sm:$0xff] %v5044_v9 }
 0x1c1   : > { %v5030_v21 = vpop.f32.mrb[21].mxu0  ;;  %5965 = vst [vmem:[#allocation57_spill] sm:$0xff] %v5040_v23  ;;  %v3467_v23 = vpop.eup %3466 }
 0x1c2   : > { %v3469_v8 = vpop.eup %3468 }
 0x1c3   : > { %2503 = vrot.lane.b32.xlu1 %v3459_v12, %s3904_s13  ;;  %v3471_v45 = vpop.eup %3470 }
 0x1c4   : > { %2501 = vrot.lane.b32.xlu0 %v3461_v52, %s3904_s13  ;;  %v5037_v13 = vpop.f32.mrb[22].mxu0  ;;  %v5057_v9 = vpop.permute.xlu1 %2227 }
 0x1c5   : > { %v5042_v31 = vpop.f32.mrb[23].mxu0  ;;  %5967 = vst [vmem:[#allocation59_spill] sm:$0xff] %v5057_v9  ;;  %v3473_v49 = vpop.eup %3472 }
 0x1c6   : > { %v3475_v9 = vpop.eup %3474 }
 0x1c7   : > { %2507 = vrot.lane.b32.xlu1 %v3463_v59, %s3904_s13  ;;  %v5063_v59 = vpop.permute.xlu0 %2225  ;;  %v3477_v44 = vpop.eup %3476 }
 0x1c8   : > { %2505 = vrot.lane.b32.xlu0 %v3465_v37, %s3904_s13  ;;  %v5049_v12 = vpop.f32.mrb[24].mxu0  ;;  %5969 = vst [vmem:[#allocation61_spill] sm:$0xff] %v5063_v59 }
 0x1c9   : > { %v5052_v52 = vpop.f32.mrb[25].mxu0 }
 0x1cb   : > { %2511 = vrot.lane.b32.xlu1 %v3467_v23, %s3904_s13  ;;  %v5080_v42 = vpop.permute.xlu0 %2229 }
 0x1cc   : > { %2509 = vrot.lane.b32.xlu0 %v3469_v8, %s3904_s13  ;;  %v5065_v37 = vpop.f32.mrb[26].mxu0  ;;  %v5076_v8 = vpop.permute.xlu1 %2231  ;;  %5975 = vst [vmem:[#allocation67_spill] sm:$0xff] %v5080_v42 }
 0x1cd   : > { %5970 = vst [vmem:[#allocation62_spill] sm:$0xff] %v5065_v37  ;;  %v5068_v55 = vpop.f32.mrb[27].mxu0  ;;  %5973 = vst [vmem:[#allocation65_spill] sm:$0xff] %v5076_v8 }
 0x1ce   : > { %5971 = vst [vmem:[#allocation63_spill] sm:$0xff] %v5068_v55 }
 0x1cf   : > { %2515 = vrot.lane.b32.xlu1 %v3471_v45, %s3904_s13  ;;  %v5092_v8 = vpop.permute.xlu0 %2233 }
 0x1d0   : > { %2513 = vrot.lane.b32.xlu0 %v3473_v49, %s3904_s13  ;;  %v5073_v23 = vpop.f32.mrb[28].mxu0  ;;  %v3479_v49 = vpop.eup %3478  ;;  %5979 = vst [vmem:[#allocation71_spill] sm:$0xff] %v5092_v8 }
 0x1d1   : > { %5972 = vst [vmem:[#allocation64_spill] sm:$0xff] %v5073_v23  ;;  %v5078_v59 = vpop.f32.mrb[29].mxu0  ;;  %v3481_v40 = vpop.eup %3480 }
 0x1d2   : > { %5974 = vst [vmem:[#allocation66_spill] sm:$0xff] %v5078_v59  ;;  %v5089_v23 = vpop.permute.xlu1 %2235 }
 0x1d3   : > { %2519 = vrot.lane.b32.xlu1 %v3475_v9, %s3904_s13  ;;  %5978 = vst [vmem:[#allocation70_spill] sm:$0xff] %v5089_v23  ;;  %v3483_v9 = vpop.eup %3482  ;;  %v5106_v23 = vpop.permute.xlu0 %2237 }
 0x1d4   : > { %2517 = vrot.lane.b32.xlu0 %v3477_v44, %s3904_s13  ;;  %v5084_v45 = vpop.f32.mrb[30].mxu0  ;;  %v3485_v44 = vpop.eup %3484  ;;  %5981 = vst [vmem:[#allocation73_spill] sm:$0xff] %v5106_v23 }
 0x1d5   : > { %5976 = vst [vmem:[#allocation68_spill] sm:$0xff] %v5084_v45  ;;  %v5086_v17 = vpop.f32.mrb[31].mxu0 }
 0x1d6   : > { %5977 = vst [vmem:[#allocation69_spill] sm:$0xff] %v5086_v17  ;;  %v5102_v45 = vpop.permute.xlu1 %2239 }
 0x1d7   : > { %2523 = vrot.lane.b32.xlu1 %v3479_v49, %s3904_s13  ;;  %5980 = vst [vmem:[#allocation72_spill] sm:$0xff] %v5102_v45 }
 0x1d8   : > { %2521 = vrot.lane.b32.xlu0 %v3481_v40, %s3904_s13  ;;  %v5094_v42 = vpop.f32.mrb[32].mxu0  ;;  %v5108_v40 = vpop.f32.mrb[34].mxu1 }
 0x1d9   : > { %v5096_v59 = vpop.f32.mrb[33].mxu0  ;;  %5982 = vst [vmem:[#allocation74_spill] sm:$0xff] %v5108_v40  ;;  %v5112_v24 = vpop.f32.mrb[35].mxu1  ;;  %v2972_v40 = vmul.f32 -1.442695, %v4887_v5 }
 0x1da   : > { %5983 = vst [vmem:[#allocation75_spill] sm:$0xff] %v5112_v24  ;;  %v5116_v55 = vpop.permute.xlu1 %2403  ;;  %v5124_v45 = vpop.f32.mrb[36].mxu1  ;;  %v2971_v24 = vmul.f32 -1.442695, %v4892_v41  ;;  %v2978_v5 = vmul.f32 -1.442695, %v4931_v38 }
 0x1db   : > { %2527 = vrot.lane.b32.xlu1 %v3483_v9, %s3904_s13  ;;  %5984 = vst [vmem:[#allocation76_spill] sm:$0xff] %v5116_v55  ;;  %v5118_v9 = vpop.permute.xlu0 %2401  ;;  %5986 = vst [vmem:[#allocation78_spill] sm:$0xff] %v5124_v45  ;;  %v5126_v28 = vpop.f32.mrb[37].mxu1  ;;  %v2974_v55 = vmul.f32 -1.442695, %v4903_v3  ;;  %3486 = vpow2.f32 %v2972_v40 }
 0x1dc   : > { %2525 = vrot.lane.b32.xlu0 %v3485_v44, %s3904_s13  ;;  %v5100_v17 = vpop.f32.mrb[34].mxu0  ;;  %5985 = vst [vmem:[#allocation77_spill] sm:$0xff] %v5118_v9  ;;  %5987 = vst [vmem:[#allocation79_spill] sm:$0xff] %v5126_v28  ;;  %v2973_v9 = vmul.f32 -1.442695, %v4906_v29  ;;  %3488 = vpow2.f32 %v2971_v24  ;;  %v5155_v40 = vpop.f32.mrb[38].mxu1 }
 0x1dd   : > { %v5104_v49 = vpop.f32.mrb[35].mxu0  ;;  %v2975_v28 = vmul.f32 -1.442695, %v4924_v18  ;;  %3490 = vpow2.f32 %v2974_v55  ;;  %v2977_v41 = vmul.f32 -1.442695, %v4936_v53 }
 0x1de   : > { %v5128_v23 = vpop.permute.xlu1 %2407  ;;  %3492 = vpow2.f32 %v2973_v9  ;;  %v2980_v3 = vmul.f32 -1.442695, %v4945_v48  ;;  %v2979_v29 = vmul.f32 -1.442695, %v4948_v61  ;;  %v2982_v24 = vmul.f32 -1.442695, %v4959_v1 }
 0x1df   : > { %v5131_v37 = vpop.permute.xlu0 %2405  ;;  %3494 = vpow2.f32 %v2976_v25  ;;  %v2981_v38 = vmul.f32 -1.442695, %v4964_v51  ;;  %v2984_v25 = vmul.f32 -1.442695, %v4973_v60  ;;  %v2983_v1 = vmul.f32 -1.442695, %v4976_v39 }
 0x1e0   : > { %v5110_v8 = vpop.f32.mrb[36].mxu0  ;;  %3496 = vpow2.f32 %v2975_v28 }
 0x1e1   : > { %v5114_v34 = vpop.f32.mrb[37].mxu0  ;;  %3498 = vpow2.f32 %v2978_v5 }
 0x1e2   : > { %v5137_v54 = vpop.permute.xlu1 %2411  ;;  %3500 = vpow2.f32 %v2977_v41 }
 0x1e3   : > { %5988 = vst [vmem:[#allocation80_spill] sm:$0xff] %v5137_v54  ;;  %v5140_v45 = vpop.permute.xlu0 %2409  ;;  %3502 = vpow2.f32 %v2980_v3 }
 0x1e4   : > { %v5120_v44 = vpop.f32.mrb[38].mxu0  ;;  %5989 = vst [vmem:[#allocation81_spill] sm:$0xff] %v5140_v45  ;;  %3504 = vpow2.f32 %v2979_v29  ;;  %v5160_v29 = vpop.f32.mrb[39].mxu1 }
 0x1e5   : > { %v5122_v0 = vpop.f32.mrb[39].mxu0  ;;  %v3487_v55 = vpop.eup %3486  ;;  %3506 = vpow2.f32 %v2982_v24 }
 0x1e6   : > { %v5146_v7 = vpop.permute.xlu1 %2415  ;;  %v3489_v53 = vpop.eup %3488  ;;  %v1001_v48 = vadd.f32 1.0, %v3487_v55  ;;  %3508 = vpow2.f32 %v2981_v38 }
 0x1e7   : > { %5990 = vst [vmem:[#allocation82_spill] sm:$0xff] %v5146_v7  ;;  %v5149_v18 = vpop.permute.xlu0 %2413  ;;  %v3491_v28 = vpop.eup %3490  ;;  %v1000_v3 = vadd.f32 1.0, %v3489_v53  ;;  %3510 = vpow2.f32 %v2984_v25 }
 0x1e8   : > { %5991 = vst [vmem:[#allocation83_spill] sm:$0xff] %v5149_v18  ;;  %v3493_v9 = vpop.eup %3492  ;;  %v1003_v24 = vadd.f32 1.0, %v3491_v28  ;;  %3512 = vrcp.f32 %v1001_v48 }
 0x1e9   : > { %v3495_v41 = vpop.eup %3494  ;;  %v1002_v55 = vadd.f32 1.0, %v3493_v9  ;;  %3514 = vpow2.f32 %v2983_v1  ;;  %v2986_v1 = vmul.f32 -1.442695, %v4991_v14 }
 0x1ea   : > { %v5153_v61 = vpop.permute.xlu1 %2419  ;;  %v3497_v51 = vpop.eup %3496  ;;  %3516 = vrcp.f32 %v1000_v3 }
 0x1eb   : > { %5992 = vst [vmem:[#allocation84_spill] sm:$0xff] %v5153_v61  ;;  %v5158_v5 = vpop.permute.xlu0 %2417  ;;  %v3499_v60 = vpop.eup %3498  ;;  %v1005_v61 = vadd.f32 1.0, %v3495_v41  ;;  %v1004_v38 = vadd.f32 1.0, %v3497_v51  ;;  %3518 = vrcp.f32 %v1003_v24  ;;  %v2985_v24 = vmul.f32 -1.442695, %v4994_v33 }
 0x1ec   : > { %5993 = vst [vmem:[#allocation85_spill] sm:$0xff] %v5158_v5  ;;  %v3501_v18 = vpop.eup %3500  ;;  %v1007_v5 = vadd.f32 1.0, %v3499_v60  ;;  %3520 = vrcp.f32 %v1002_v55 }
 0x1ed   : > { %v3503_v7 = vpop.eup %3502  ;;  %v1006_v54 = vadd.f32 1.0, %v3501_v18  ;;  %3522 = vrcp.f32 %v1005_v61 }
 0x1ee   : > { %v5162_v45 = vpop.permute.xlu1 %2423  ;;  %v3505_v39 = vpop.eup %3504  ;;  %v1009_v25 = vadd.f32 1.0, %v3503_v7  ;;  %3524 = vrcp.f32 %v1004_v38 }
 0x1ef   : > { %5994 = vst [vmem:[#allocation86_spill] sm:$0xff] %v5162_v45  ;;  %v5164_v53 = vpop.permute.xlu0 %2421  ;;  %v3507_v28 = vpop.eup %3506  ;;  %v1008_v48 = vadd.f32 1.0, %v3505_v39  ;;  %3526 = vrcp.f32 %v1007_v5 }
 0x1f0   : > { %5995 = vst [vmem:[#allocation87_spill] sm:$0xff] %v5164_v53  ;;  %v3509_v9 = vpop.eup %3508  ;;  %3528 = vrcp.f32 %v1006_v54  ;;  %v1011_v41 = vadd.f32 1.0, %v3507_v28 }
 0x1f1   : > { %v3511_v51 = vpop.eup %3510  ;;  %3530 = vrcp.f32 %v1009_v25  ;;  %v1010_v7 = vadd.f32 1.0, %v3509_v9 }
 0x1f2   : > { %v5167_v3 = vpop.permute.xlu1 %2427  ;;  %v5172_v18 = vpop.eup %3512  ;;  %3532 = vrcp.f32 %v1008_v48  ;;  %v1013_v14 = vadd.f32 1.0, %v3511_v51 }
 0x1f3   : > { %5996 = vst [vmem:[#allocation88_spill] sm:$0xff] %v5167_v3  ;;  %v5170_v60 = vpop.permute.xlu0 %2425  ;;  %v3515_v61 = vpop.eup %3514  ;;  %3534 = vpow2.f32 %v2986_v1 }
 0x1f4   : > { %5997 = vst [vmem:[#allocation89_spill] sm:$0xff] %v5170_v60  ;;  %v5174_v55 = vpop.eup %3516  ;;  %3536 = vrcp.f32 %v1011_v41  ;;  %v1012_v38 = vadd.f32 1.0, %v3515_v61 }
 0x1f5   : > { %v5176_v54 = vpop.eup %3518  ;;  %3538 = vpow2.f32 %v2985_v24 }
 0x1f6   : > { %5998 = vst [vmem:[#allocation90_spill] sm:$0xff] %v5176_v54  ;;  %v5178_v5 = vpop.eup %3520  ;;  %3540 = vrcp.f32 %v1010_v7  ;;  %v6029_v54 = vld [vmem:[#allocation28_spill] sm:$0xff] }
 0x1f7   : > { %5999 = vst [vmem:[#allocation91_spill] sm:$0xff] %v5178_v5  ;;  %v5180_v39 = vpop.eup %3522  ;;  %3542 = vrcp.f32 %v1013_v14 }
 0x1f8   : > { %6000 = vst [vmem:[#allocation92_spill] sm:$0xff] %v5180_v39  ;;  %v5186_v41 = vpop.eup %3524  ;;  %3544 = vrcp.f32 %v1012_v38 }
 0x1f9   : > { %6001 = vst [vmem:[#allocation93_spill] sm:$0xff] %v5186_v41  ;;  %v5190_v7 = vpop.eup %3526 }
 0x1fa   : > { %6002 = vst [vmem:[#allocation94_spill] sm:$0xff] %v5190_v7 }
 0x20d   : > { %v1668_v33 = vpop.permute.xlu1 %1667 }
 0x20e   : > { %v1714_v28 = vadd.f32 %v5001_v11, %v1668_v33  ;;  %v2098_v25 = vadd.f32 %v4813_v56, %v1668_v33  ;;  %v2290_v48 = vadd.f32 %v4859_v58, %v1668_v33  ;;  %v1906_v9 = vadd.f32 %v5094_v42, %v1668_v33  ;;  %v1666_v1 = vpop.permute.xlu0 %1665  ;;  %v5193_v56 = vpop.eup %3528 }
 0x20f   : > { %v1713_v51 = vadd.f32 %v1666_v1, %v5006_v50  ;;  %v1905_v24 = vadd.f32 %v1666_v1, %v5096_v59  ;;  %v2097_v11 = vadd.f32 %v1666_v1, %v4817_v6  ;;  %6003 = vst [vmem:[#allocation95_spill] sm:$0xff] %v5193_v56  ;;  %v2289_v42 = vadd.f32 %v1666_v1, %v4900_v57  ;;  %v5196_v41 = vpop.eup %3530 }
 0x210   : > { %v3052_v61 = vmul.f32 -1.442695, %v1714_v28  ;;  %v3084_v60 = vmul.f32 -1.442695, %v2098_v25  ;;  %v3100_v39 = vmul.f32 -1.442695, %v2290_v48  ;;  %v5199_v28 = vpop.eup %3532 }
 0x211   : > { %v3068_v58 = vmul.f32 -1.442695, %v1906_v9  ;;  %v1672_v33 = vpop.permute.xlu1 %1671  ;;  %6004 = vst [vmem:[#allocation96_spill] sm:$0xff] %v5196_v41  ;;  %v3051_v50 = vmul.f32 -1.442695, %v1713_v51  ;;  %6005 = vst [vmem:[#allocation97_spill] sm:$0xff] %v5199_v28  ;;  %v5204_v48 = vpop.eup %3534 }
 0x212   : > { %3546 = vpow2.f32 %v3052_v61  ;;  %v3067_v14 = vmul.f32 -1.442695, %v1905_v24  ;;  %v1716_v59 = vadd.f32 %v5015_v63, %v1672_v33  ;;  %v1670_v7 = vpop.permute.xlu0 %1669  ;;  %v2100_v6 = vadd.f32 %v4819_v15, %v1672_v33  ;;  %6006 = vst [vmem:[#allocation98_spill] sm:$0xff] %v5204_v48  ;;  %v5210_v63 = vpop.eup %3536 }
 0x213   : > { %3548 = vpow2.f32 %v3084_v60  ;;  %v2292_v25 = vadd.f32 %v4912_v30, %v1672_v33  ;;  %v1908_v38 = vadd.f32 %v5100_v17, %v1672_v33  ;;  %v3083_v57 = vmul.f32 -1.442695, %v2097_v11  ;;  %6007 = vst [vmem:[#allocation99_spill] sm:$0xff] %v5210_v63  ;;  %v5212_v24 = vpop.eup %3538 }
 0x214   : > { %3550 = vpow2.f32 %v3100_v39  ;;  %v1715_v9 = vadd.f32 %v1670_v7, %v5018_v16  ;;  %v5208_v1 = vadd.f32 %v1670_v7, %v5104_v49  ;;  %v3099_v51 = vmul.f32 -1.442695, %v2289_v42  ;;  %6008 = vst [vmem:[#allocation100_spill] sm:$0xff] %v5212_v24  ;;  %v5217_v39 = vpop.eup %3540  ;;  %v6025_v24 = vld [vmem:[#allocation78_spill] sm:$0xff] }
 0x215   : > { %3552 = vpow2.f32 %v3068_v58  ;;  %v1676_v60 = vpop.permute.xlu1 %1675  ;;  %v3054_v15 = vmul.f32 -1.442695, %v1716_v59  ;;  %v3086_v30 = vmul.f32 -1.442695, %v2100_v6  ;;  %v5215_v17 = vadd.f32 %v1670_v7, %v4821_v20  ;;  %6009 = vst [vmem:[#allocation101_spill] sm:$0xff] %v5217_v39  ;;  %v5234_v33 = vpop.eup %3542 }
 0x216   : > { %3554 = vpow2.f32 %v3051_v50  ;;  %v5220_v16 = vadd.f32 %v1670_v7, %v4916_v32  ;;  %v5223_v49 = vadd.f32 %v5027_v22, %v1676_v60  ;;  %v5226_v61 = vadd.f32 %v4823_v46, %v1676_v60  ;;  %v1674_v11 = vpop.permute.xlu0 %1673  ;;  %6010 = vst [vmem:[#allocation102_spill] sm:$0xff] %v5234_v33  ;;  %v5239_v46 = vpop.eup %3544 }
 0x217   : > { %3556 = vpow2.f32 %v3067_v14  ;;  %v3102_v58 = vmul.f32 -1.442695, %v2292_v25  ;;  %v5229_v42 = vadd.f32 %v4956_v10, %v1676_v60  ;;  %v5232_v20 = vadd.f32 %v5110_v8, %v1676_v60  ;;  %6011 = vst [vmem:[#allocation103_spill] sm:$0xff] %v5239_v46 }
 0x218   : > { %3558 = vpow2.f32 %v3083_v57  ;;  %v3070_v32 = vmul.f32 -1.442695, %v1908_v38  ;;  %v3053_v22 = vmul.f32 -1.442695, %v1715_v9  ;;  %v5237_v50 = vadd.f32 %v1674_v11, %v5030_v21 }
 0x219   : > { %3560 = vpow2.f32 %v3099_v51  ;;  %v1680_v7 = vpop.permute.xlu1 %1679  ;;  %v5242_v14 = vadd.f32 %v1674_v11, %v5114_v34  ;;  %v5245_v10 = vadd.f32 %v1674_v11, %v4827_v26  ;;  %v5248_v8 = vadd.f32 %v1674_v11, %v4966_v43 }
 0x21a   : > { %3562 = vpow2.f32 %v3054_v15  ;;  %v5251_v6 = vadd.f32 %v5037_v13, %v1680_v7  ;;  %v5254_v21 = vadd.f32 %v4829_v36, %v1680_v7  ;;  %v1678_v57 = vpop.permute.xlu0 %1677  ;;  %v5257_v43 = vadd.f32 %v4987_v62, %v1680_v7 }
 0x21b   : > { %3564 = vpow2.f32 %v3086_v30  ;;  %v5260_v15 = vadd.f32 %v5120_v44, %v1680_v7  ;;  %v5263_v36 = vadd.f32 %v1678_v57, %v5042_v31  ;;  %v5272_v7 = vadd.f32 %v1678_v57, %v5033_v4 }
 0x21c   : > { %v3547_v59 = vpop.eup %3546  ;;  %3566 = vpow2.f32 %v3102_v58  ;;  %v5266_v58 = vadd.f32 %v1678_v57, %v5122_v0 }
 0x21d   : > { %v3549_v25 = vpop.eup %3548  ;;  %v1778_v38 = vadd.f32 1.0, %v3547_v59  ;;  %3568 = vpow2.f32 %v3070_v32  ;;  %v1684_v32 = vpop.permute.xlu1 %1683 }
 0x21e   : > { %v3551_v34 = vpop.eup %3550  ;;  %v2162_v9 = vadd.f32 1.0, %v3549_v25  ;;  %3570 = vpow2.f32 %v3053_v22  ;;  %v1682_v0 = vpop.permute.xlu0 %1681  ;;  %v5282_v4 = vadd.f32 %v4835_v47, %v1684_v32 }
 0x21f   : > { %v3553_v26 = vpop.eup %3552  ;;  %3572 = vrcp.f32 %v1778_v38  ;;  %v2354_v51 = vadd.f32 1.0, %v3551_v34  ;;  %v5269_v38 = vadd.f32 %v1678_v57, %v4833_v35  ;;  %v5275_v34 = vadd.f32 %v5049_v12, %v1684_v32 }
 0x220   : > { %v3555_v60 = vpop.eup %3554  ;;  %3574 = vrcp.f32 %v2162_v9  ;;  %v1970_v13 = vadd.f32 1.0, %v3553_v26 }
 0x221   : > { %v3557_v30 = vpop.eup %3556  ;;  %3576 = vrcp.f32 %v2354_v51  ;;  %v1777_v11 = vadd.f32 1.0, %v3555_v60  ;;  %v5278_v51 = vadd.f32 %v4791_v19, %v1684_v32  ;;  %v1688_v12 = vpop.permute.xlu1 %1687  ;;  %v5288_v19 = vadd.f32 %v1682_v0, %v5052_v52 }
 0x222   : > { %v3559_v22 = vpop.eup %3558  ;;  %3578 = vrcp.f32 %v1970_v13  ;;  %v1969_v62 = vadd.f32 1.0, %v3557_v30 }
 0x223   : > { %v3561_v59 = vpop.eup %3560  ;;  %3580 = vrcp.f32 %v1777_v11  ;;  %v2161_v25 = vadd.f32 1.0, %v3559_v22  ;;  %v3069_v11 = vmul.f32 -1.442695, %v5208_v1  ;;  %v5294_v1 = vadd.f32 %v1682_v0, %v4795_v27 }
 0x224   : > { %v3563_v44 = vpop.eup %3562  ;;  %3582 = vrcp.f32 %v1969_v62  ;;  %v2353_v31 = vadd.f32 1.0, %v3561_v59  ;;  %v5285_v62 = vadd.f32 %v5054_v2, %v1684_v32  ;;  %v1686_v32 = vpop.permute.xlu0 %1685 }
 0x225   : > { %v3565_v9 = vpop.eup %3564  ;;  %3584 = vrcp.f32 %v2161_v25  ;;  %v1780_v26 = vadd.f32 1.0, %v3563_v44  ;;  %v3085_v44 = vmul.f32 -1.442695, %v5215_v17  ;;  %v6014_v17 = vld [vmem:[#allocation62_spill] sm:$0xff] }
 0x226   : > { %v3567_v60 = vpop.eup %3566  ;;  %3586 = vrcp.f32 %v2353_v31  ;;  %v2164_v35 = vadd.f32 1.0, %v3565_v9  ;;  %v3101_v31 = vmul.f32 -1.442695, %v5220_v16  ;;  %v6012_v9 = vld [vmem:[#allocation22_spill] sm:$0xff]  ;;  %v5309_v27 = vadd.f32 %v6014_v17, %v1688_v12  ;;  %v1692_v17 = vpop.permute.xlu1 %1691 }
 0x227   : > { %v3569_v13 = vpop.eup %3568  ;;  %3588 = vrcp.f32 %v1780_v26  ;;  %v2356_v30 = vadd.f32 1.0, %v3567_v60  ;;  %v5300_v2 = vadd.f32 %v1682_v0, %v6012_v9  ;;  %v3056_v26 = vmul.f32 -1.442695, %v5223_v49  ;;  %v6013_v60 = vld [vmem:[#allocation60_spill] sm:$0xff] }
 0x228   : > { %v3571_v57 = vpop.eup %3570  ;;  %3590 = vrcp.f32 %v2164_v35  ;;  %v1972_v22 = vadd.f32 1.0, %v3569_v13  ;;  %v5306_v35 = vadd.f32 %v1682_v0, %v6013_v60  ;;  %v3088_v16 = vmul.f32 -1.442695, %v5226_v61  ;;  %v6017_v0 = vld [vmem:[#allocation74_spill] sm:$0xff] }
 0x229   : > { %v5290_v59 = vpop.eup %3572  ;;  %3592 = vrcp.f32 %v2356_v30  ;;  %v1779_v25 = vadd.f32 1.0, %v3571_v57  ;;  %v6015_v30 = vld [vmem:[#allocation11_spill] sm:$0xff]  ;;  %v3104_v49 = vmul.f32 -1.442695, %v5229_v42  ;;  %v5324_v60 = vadd.f32 %v6017_v0, %v1688_v12  ;;  %v6020_v42 = vld [vmem:[#allocation25_spill] sm:$0xff] }
 0x22a   : > { %v5296_v47 = vpop.eup %3574  ;;  %3594 = vrcp.f32 %v1972_v22  ;;  %v5315_v57 = vadd.f32 %v6015_v30, %v1688_v12  ;;  %v6016_v22 = vld [vmem:[#allocation23_spill] sm:$0xff]  ;;  %v3072_v61 = vmul.f32 -1.442695, %v5232_v20 }
 0x22b   : > { %v5302_v52 = vpop.eup %3576  ;;  %3596 = vrcp.f32 %v1779_v25  ;;  %v5318_v9 = vadd.f32 %v6016_v22, %v1688_v12  ;;  %v3055_v22 = vmul.f32 -1.442695, %v5237_v50  ;;  %v5339_v12 = vadd.f32 %v1686_v32, %v6020_v42  ;;  %v6021_v20 = vld [vmem:[#allocation75_spill] sm:$0xff] }
 0x22c   : > { %v5311_v13 = vpop.eup %3578  ;;  %3598 = vpow2.f32 %v3069_v11  ;;  %v6018_v11 = vld [vmem:[#allocation63_spill] sm:$0xff]  ;;  %v5345_v63 = vadd.f32 %v1686_v32, %v6021_v20  ;;  %v3087_v50 = vmul.f32 -1.442695, %v5245_v10  ;;  %v6026_v10 = vld [vmem:[#allocation66_spill] sm:$0xff] }
 0x22d   : > { %v5320_v25 = vpop.eup %3580  ;;  %3600 = vpow2.f32 %v3085_v44  ;;  %v5330_v30 = vadd.f32 %v1686_v32, %v6018_v11  ;;  %v6019_v44 = vld [vmem:[#allocation13_spill] sm:$0xff]  ;;  %v6022_v11 = vld [vmem:[#allocation64_spill] sm:$0xff] }
 0x22e   : > { %v5326_v46 = vpop.eup %3582  ;;  %3602 = vpow2.f32 %v3101_v31  ;;  %v5336_v39 = vadd.f32 %v1686_v32, %v6019_v44  ;;  %v3071_v31 = vmul.f32 -1.442695, %v5242_v14  ;;  %v5348_v28 = vadd.f32 %v6022_v11, %v1692_v17  ;;  %v6023_v44 = vld [vmem:[#allocation14_spill] sm:$0xff] }
 0x22f   : > { %v5332_v33 = vpop.eup %3584  ;;  %3604 = vpow2.f32 %v3056_v26  ;;  %v1690_v26 = vpop.permute.xlu0 %1689  ;;  %v5354_v42 = vadd.f32 %v6023_v44, %v1692_v17  ;;  %v3103_v14 = vmul.f32 -1.442695, %v5248_v8  ;;  %v3058_v11 = vmul.f32 -1.442695, %v5251_v6 }
 0x230   : > { %v5341_v0 = vpop.eup %3586  ;;  %3606 = vpow2.f32 %v3088_v16  ;;  %v6024_v16 = vld [vmem:[#allocation26_spill] sm:$0xff]  ;;  %v5369_v48 = vadd.f32 %v1690_v26, %v6026_v10  ;;  %v1696_v44 = vpop.permute.xlu1 %1695  ;;  %v3090_v8 = vmul.f32 -1.442695, %v5254_v21  ;;  %v5378_v3 = vadd.f32 %v1690_v26, %v6029_v54  ;;  %v6032_v10 = vld [vmem:[#allocation68_spill] sm:$0xff] }
 0x231   : > { %v5350_v41 = vpop.eup %3588  ;;  %3608 = vpow2.f32 %v3104_v49  ;;  %v5360_v32 = vadd.f32 %v6024_v16, %v1692_v17  ;;  %v5366_v49 = vadd.f32 %v6025_v24, %v1692_v17  ;;  %v6031_v24 = vld [vmem:[#allocation79_spill] sm:$0xff]  ;;  %v5386_v53 = vadd.f32 %v6032_v10, %v1696_v44 }
 0x232   : > { %v5356_v56 = vpop.eup %3590  ;;  %3610 = vpow2.f32 %v3072_v61  ;;  %v6027_v61 = vld [vmem:[#allocation15_spill] sm:$0xff]  ;;  %6030 = vst [vmem:[#allocation60_spill] sm:$0xff] %v5378_v3  ;;  %v5383_v6 = vadd.f32 %v1690_v26, %v6031_v24 }
 0x233   : > { %v5362_v20 = vpop.eup %3592  ;;  %3612 = vpow2.f32 %v3055_v22  ;;  %v5375_v16 = vadd.f32 %v1690_v26, %v6027_v61  ;;  %6033 = vst [vmem:[#allocation62_spill] sm:$0xff] %v5386_v53  ;;  %v6034_v61 = vld [vmem:[#allocation16_spill] sm:$0xff]  ;;  %v6036_v26 = vld [vmem:[#allocation29_spill] sm:$0xff]  ;;  %v5398_v53 = vmul.f32 -1.442695, %v5260_v15 }
 0x234   : > { %v5371_v5 = vpop.eup %3594  ;;  %3614 = vpow2.f32 %v3071_v31  ;;  %v1694_v31 = vpop.permute.xlu0 %1693  ;;  %v5395_v24 = vadd.f32 %v6036_v26, %v1696_v44  ;;  %v5412_v15 = vmul.f32 -1.442695, %v5266_v58  ;;  %v5426_v58 = vmul.f32 -1.442695, %v5272_v7 }
 0x235   : > { %6028 = vst [vmem:[#allocation22_spill] sm:$0xff] %v5375_v16  ;;  %v5380_v22 = vpop.eup %3596  ;;  %3616 = vpow2.f32 %v3087_v50  ;;  %v5389_v16 = vadd.f32 %v6034_v61, %v1696_v44  ;;  %v5392_v50 = vmul.f32 -1.442695, %v5257_v43  ;;  %v6039_v43 = vld [vmem:[#allocation69_spill] sm:$0xff]  ;;  %v5409_v26 = vpop.permute.xlu1 %2431  ;;  %v5441_v7 = vmul.f32 -1.442695, %v5285_v62 }
 0x236   : > { %v3599_v17 = vpop.eup %3598  ;;  %3618 = vpow2.f32 %v3103_v14  ;;  %6037 = vst [vmem:[#allocation23_spill] sm:$0xff] %v5395_v24  ;;  %6041 = vst [vmem:[#allocation13_spill] sm:$0xff] %v5409_v26 }
 0x237   : > { %v3601_v45 = vpop.eup %3600  ;;  %v1971_v21 = vadd.f32 1.0, %v3599_v17  ;;  %3620 = vpow2.f32 %v3058_v11  ;;  %6035 = vst [vmem:[#allocation11_spill] sm:$0xff] %v5389_v16  ;;  %v5401_v11 = vadd.f32 %v5155_v40, %v1696_v44 }
 0x238   : > { %v3603_v54 = vpop.eup %3602  ;;  %v2163_v3 = vadd.f32 1.0, %v3601_v45  ;;  %3622 = vpow2.f32 %v3090_v8  ;;  %v5404_v45 = vmul.f32 -1.442695, %v5263_v36  ;;  %v5407_v8 = vadd.f32 %v1694_v31, %v6039_v43 }
 0x239   : > { %v3605_v14 = vpop.eup %3604  ;;  %3624 = vrcp.f32 %v1971_v21  ;;  %v2355_v10 = vadd.f32 1.0, %v3603_v54  ;;  %6038 = vst [vmem:[#allocation74_spill] sm:$0xff] %v5401_v11  ;;  %v6042_v54 = vld [vmem:[#allocation18_spill] sm:$0xff]  ;;  %v5418_v36 = vmul.f32 -1.442695, %v5269_v38  ;;  %v6052_v11 = vld [vmem:[#allocation36_spill] sm:$0xff] }
 0x23a   : > { %v3607_v17 = vpop.eup %3606  ;;  %3626 = vrcp.f32 %v2163_v3  ;;  %v1782_v61 = vadd.f32 1.0, %v3605_v14  ;;  %6040 = vst [vmem:[#allocation63_spill] sm:$0xff] %v5407_v8  ;;  %v5415_v40 = vadd.f32 %v1694_v31, %v6042_v54  ;;  %v6044_v14 = vld [vmem:[#allocation30_spill] sm:$0xff]  ;;  %v5423_v8 = vpop.permute.xlu0 %2429  ;;  %v5432_v38 = vmul.f32 -1.442695, %v5275_v34 }
 0x23b   : > { %v3609_v24 = vpop.eup %3608  ;;  %3628 = vrcp.f32 %v2355_v10  ;;  %v2166_v21 = vadd.f32 1.0, %v3607_v17  ;;  %v5421_v43 = vadd.f32 %v1694_v31, %v6044_v14  ;;  %6046 = vst [vmem:[#allocation64_spill] sm:$0xff] %v5423_v8  ;;  %v5429_v17 = vadd.f32 %v1694_v31, %v5160_v29 }
 0x23c   : > { %6043 = vst [vmem:[#allocation25_spill] sm:$0xff] %v5415_v40  ;;  %v3611_v44 = vpop.eup %3610  ;;  %3630 = vrcp.f32 %v1782_v61  ;;  %v2358_v3 = vadd.f32 1.0, %v3609_v24  ;;  %v5435_v61 = vmul.f32 -1.442695, %v5278_v51  ;;  %v2065_v16 = vmul.f32 %v5326_v46, %v6052_v11 }
 0x23d   : > { %6045 = vst [vmem:[#allocation75_spill] sm:$0xff] %v5421_v43  ;;  %v3613_v26 = vpop.eup %3612  ;;  %3632 = vrcp.f32 %v2166_v21  ;;  %v1974_v10 = vadd.f32 1.0, %v3611_v44  ;;  %6047 = vst [vmem:[#allocation14_spill] sm:$0xff] %v5429_v17  ;;  %v5438_v21 = vmul.f32 -1.442695, %v5282_v4  ;;  %v2500_v44 = vpop.permute.xlu1 %2499  ;;  %v6051_v43 = vld [vmem:[#allocation8_spill] sm:$0xff] }
 0x23e   : > { %v3615_v54 = vpop.eup %3614  ;;  %3634 = vrcp.f32 %v2358_v3  ;;  %v1781_v24 = vadd.f32 1.0, %v3613_v26  ;;  %v6048_v26 = vld [vmem:[#allocation6_spill] sm:$0xff]  ;;  %v6049_v3 = vld [vmem:[#allocation35_spill] sm:$0xff]  ;;  %v1873_v62 = vmul.f32 %v5320_v25, %v6051_v43  ;;  %v6054_v43 = vld [vmem:[#allocation52_spill] sm:$0xff] }
 0x23f   : > { %v3617_v14 = vpop.eup %3616  ;;  %3636 = vrcp.f32 %v1974_v10  ;;  %v1973_v8 = vadd.f32 1.0, %v3615_v54  ;;  %v1874_v34 = vmul.f32 %v5290_v59, %v6048_v26  ;;  %v2066_v51 = vmul.f32 %v5311_v13, %v6049_v3  ;;  %v6050_v54 = vld [vmem:[#allocation51_spill] sm:$0xff]  ;;  %v2498_v59 = vpop.permute.xlu0 %2497  ;;  %v6053_v3 = vld [vmem:[#allocation76_spill] sm:$0xff] }
 0x240   : > { %v3619_v29 = vpop.eup %3618  ;;  %3638 = vrcp.f32 %v1781_v24  ;;  %v2165_v31 = vadd.f32 1.0, %v3617_v14  ;;  %v2258_v4 = vmul.f32 %v5296_v47, %v6050_v54  ;;  %v2081_v25 = vadd.f32 %v2065_v16, %v1873_v62 }
 0x241   : > { %v3621_v17 = vpop.eup %3620  ;;  %3640 = vrcp.f32 %v1973_v8  ;;  %v2357_v10 = vadd.f32 1.0, %v3619_v29  ;;  %v2082_v14 = vadd.f32 %v2066_v51, %v1874_v34  ;;  %v2450_v8 = vmul.f32 %v5302_v52, %v6053_v3  ;;  %v6055_v34 = vld [vmem:[#allocation77_spill] sm:$0xff] }
 0x242   : > { %v3623_v40 = vpop.eup %3622  ;;  %3642 = vrcp.f32 %v2165_v31  ;;  %v1784_v24 = vadd.f32 1.0, %v3621_v17  ;;  %v2546_v29 = vmul.f32 %v5172_v18, %v2500_v44  ;;  %v2257_v17 = vmul.f32 %v5332_v33, %v6054_v43  ;;  %v6058_v33 = vld [vmem:[#allocation53_spill] sm:$0xff] }
 0x243   : > { %v3625_v26 = vpop.eup %3624  ;;  %3644 = vrcp.f32 %v2357_v10  ;;  %v2168_v13 = vadd.f32 1.0, %v3623_v40  ;;  %v2274_v54 = vadd.f32 %v2258_v4, %v2082_v14  ;;  %v2449_v46 = vmul.f32 %v5341_v0, %v6055_v34  ;;  %v6056_v40 = vld [vmem:[#allocation7_spill] sm:$0xff]  ;;  %v6057_v4 = vld [vmem:[#allocation37_spill] sm:$0xff] }
 0x244   : > { %v3627_v47 = vpop.eup %3626  ;;  %3646 = vrcp.f32 %v1784_v24  ;;  %v2545_v11 = vmul.f32 %v5174_v55, %v2498_v59  ;;  %v1876_v51 = vmul.f32 %v5350_v41, %v6056_v40  ;;  %v2273_v10 = vadd.f32 %v2257_v17, %v2081_v25  ;;  %v6059_v0 = vld [vmem:[#allocation9_spill] sm:$0xff]  ;;  %v6060_v59 = vld [vmem:[#allocation38_spill] sm:$0xff]  ;;  %v6063_v34 = vld [vmem:[#allocation39_spill] sm:$0xff] }
 0x245   : > { %v3629_v31 = vpop.eup %3628  ;;  %3648 = vrcp.f32 %v2168_v13  ;;  %v2466_v44 = vadd.f32 %v2450_v8, %v2274_v54  ;;  %v2068_v16 = vmul.f32 %v5371_v5, %v6057_v4  ;;  %v2260_v24 = vmul.f32 %v5356_v56, %v6058_v33  ;;  %v6061_v25 = vld [vmem:[#allocation54_spill] sm:$0xff] }
 0x246   : > { %v3631_v52 = vpop.eup %3630  ;;  %3650 = vpow2.f32 %v5392_v50  ;;  %v1875_v14 = vmul.f32 %v5380_v22, %v6059_v0  ;;  %v2067_v13 = vmul.f32 %v3625_v26, %v6060_v59  ;;  %v2465_v3 = vadd.f32 %v2449_v46, %v2273_v10  ;;  %v6066_v10 = vld [vmem:[#allocation40_spill] sm:$0xff] }
 0x247   : > { %v3633_v62 = vpop.eup %3632  ;;  %3652 = vpow2.f32 %v5398_v53  ;;  %v5473_v50 = vadd.f32 %v2546_v29, %v2466_v44  ;;  %v2084_v8 = vadd.f32 %v2068_v16, %v1876_v51  ;;  %v3059_v53 = vmul.f32 -1.442695, %v5288_v19  ;;  %v6067_v16 = vld [vmem:[#allocation80_spill] sm:$0xff] }
 0x248   : > { %v3635_v41 = vpop.eup %3634  ;;  %3654 = vpow2.f32 %v5404_v45  ;;  %v2083_v5 = vadd.f32 %v2067_v13, %v1875_v14  ;;  %v2259_v56 = vmul.f32 %v3627_v47, %v6061_v25  ;;  %v5479_v22 = vadd.f32 %v2545_v11, %v2465_v3  ;;  %v6068_v0 = vld [vmem:[#allocation56_spill] sm:$0xff] }
 0x249   : > { %v3637_v54 = vpop.eup %3636  ;;  %3656 = vpow2.f32 %v5412_v15  ;;  %v2452_v45 = vmul.f32 %v5362_v20, %v5128_v23  ;;  %v2276_v26 = vadd.f32 %v2260_v24, %v2084_v8  ;;  %2755 = vrot.lane.b32.xlu1 %v5473_v50, %s3902_s16  ;;  %v3075_v19 = vmul.f32 -1.442695, %v5294_v1  ;;  %v6062_v23 = vld [vmem:[#allocation10_spill] sm:$0xff] }
 0x24a   : > { %v3639_v43 = vpop.eup %3638  ;;  %3658 = vpow2.f32 %v5418_v36  ;;  %v2275_v15 = vadd.f32 %v2259_v56, %v2083_v5  ;;  %v2451_v47 = vmul.f32 %v3629_v31, %v5131_v37  ;;  %2753 = vrot.lane.b32.xlu0 %v5479_v22, %s3902_s16  ;;  %v1878_v20 = vmul.f32 %v3631_v52, %v6062_v23  ;;  %v6064_v37 = vld [vmem:[#allocation12_spill] sm:$0xff] }
 0x24b   : > { %v3641_v29 = vpop.eup %3640  ;;  %3660 = vpow2.f32 %v5426_v58  ;;  %v5489_v36 = vadd.f32 %v2452_v45, %v2276_v26  ;;  %v2070_v46 = vmul.f32 %v3637_v54, %v6063_v34  ;;  %v3091_v1 = vmul.f32 -1.442695, %v5300_v2 }
 0x24c   : > { %v3643_v17 = vpop.eup %3642  ;;  %3662 = vpow2.f32 %v5432_v38  ;;  %v5497_v58 = vadd.f32 %v2451_v47, %v2275_v15  ;;  %v1877_v31 = vmul.f32 %v3639_v43, %v6064_v37  ;;  %v6065_v38 = vld [vmem:[#allocation55_spill] sm:$0xff]  ;;  %v2069_v4 = vmul.f32 %v3641_v29, %v6066_v10 }
 0x24d   : > { %v3645_v11 = vpop.eup %3644  ;;  %3664 = vpow2.f32 %v5435_v61  ;;  %v2262_v51 = vmul.f32 %v3633_v62, %v6065_v38  ;;  %v2086_v44 = vadd.f32 %v2070_v46, %v1878_v20  ;;  %v2454_v61 = vmul.f32 %v3635_v41, %v6067_v16 }
 0x24e   : > { %v3647_v40 = vpop.eup %3646  ;;  %3666 = vpow2.f32 %v5438_v21  ;;  %v2085_v24 = vadd.f32 %v2069_v4, %v1877_v31  ;;  %v2261_v14 = vmul.f32 %v3643_v17, %v6068_v0  ;;  %v6069_v21 = vld [vmem:[#allocation81_spill] sm:$0xff]  ;;  %v3107_v38 = vmul.f32 -1.442695, %v5306_v35 }
 0x24f   : > { %v5503_v52 = vpop.eup %3648  ;;  %3668 = vpow2.f32 %v5441_v7  ;;  %v2278_v2 = vadd.f32 %v2262_v51, %v2086_v44  ;;  %v2453_v62 = vmul.f32 %v3645_v11, %v6069_v21  ;;  %v3062_v10 = vmul.f32 -1.442695, %v5309_v27  ;;  %v6070_v4 = vld [vmem:[#allocation17_spill] sm:$0xff]  ;;  %v6072_v21 = vld [vmem:[#allocation19_spill] sm:$0xff] }
 0x250   : > { %v3651_v33 = vpop.eup %3650  ;;  %3670 = vpow2.f32 %v3059_v53  ;;  %v2277_v5 = vadd.f32 %v2261_v14, %v2085_v24  ;;  %v1880_v16 = vmul.f32 %v3647_v40, %v6070_v4  ;;  %v3094_v24 = vmul.f32 -1.442695, %v5318_v9  ;;  %v6071_v14 = vld [vmem:[#allocation41_spill] sm:$0xff] }
 0x251   : > { %v3653_v59 = vpop.eup %3652  ;;  %v2360_v13 = vadd.f32 1.0, %v3651_v33  ;;  %3672 = vpow2.f32 %v3075_v19  ;;  %v5509_v54 = vadd.f32 %v2454_v61, %v2278_v2  ;;  %v3078_v33 = vmul.f32 -1.442695, %v5315_v57  ;;  %v6081_v4 = vld [vmem:[#allocation21_spill] sm:$0xff] }
 0x252   : > { %v3655_v3 = vpop.eup %3654  ;;  %v1976_v8 = vadd.f32 1.0, %v3653_v59  ;;  %3674 = vpow2.f32 %v3091_v1  ;;  %v5511_v56 = vadd.f32 %v2453_v62, %v2277_v5  ;;  %v3110_v0 = vmul.f32 -1.442695, %v5324_v60  ;;  %v6074_v5 = vld [vmem:[#allocation42_spill] sm:$0xff] }
 0x253   : > { %v3657_v7 = vpop.eup %3656  ;;  %3676 = vrcp.f32 %v2360_v13  ;;  %v1783_v41 = vadd.f32 1.0, %v3655_v3  ;;  %v3061_v13 = vmul.f32 -1.442695, %v5330_v30  ;;  %v3077_v27 = vmul.f32 -1.442695, %v5336_v39  ;;  %v6073_v3 = vld [vmem:[#allocation57_spill] sm:$0xff] }
 0x254   : > { %v3659_v25 = vpop.eup %3658  ;;  %3678 = vrcp.f32 %v1976_v8  ;;  %v1975_v53 = vadd.f32 1.0, %v3657_v7  ;;  %v2264_v57 = vmul.f32 %v5503_v52, %v6073_v3  ;;  %v3093_v60 = vmul.f32 -1.442695, %v5339_v12 }
 0x255   : > { %v3661_v43 = vpop.eup %3660  ;;  %3680 = vrcp.f32 %v1783_v41  ;;  %v2167_v45 = vadd.f32 1.0, %v3659_v25  ;;  %v3109_v41 = vmul.f32 -1.442695, %v5345_v63  ;;  %v6075_v25 = vld [vmem:[#allocation82_spill] sm:$0xff]  ;;  %v3064_v52 = vmul.f32 -1.442695, %v5348_v28 }
 0x256   : > { %v3663_v26 = vpop.eup %3662  ;;  %3682 = vrcp.f32 %v1975_v53  ;;  %v2359_v29 = vadd.f32 1.0, %v3661_v43  ;;  %v3112_v28 = vmul.f32 -1.442695, %v5366_v49 }
 0x257   : > { %v3665_v19 = vpop.eup %3664  ;;  %3684 = vrcp.f32 %v2167_v45  ;;  %v1786_v15 = vadd.f32 1.0, %v3663_v26  ;;  %v6076_v45 = vld [vmem:[#allocation58_spill] sm:$0xff] }
 0x258   : > { %v3667_v47 = vpop.eup %3666  ;;  %3686 = vrcp.f32 %v2359_v29  ;;  %v1978_v17 = vadd.f32 1.0, %v3665_v19  ;;  %v6077_v19 = vld [vmem:[#allocation83_spill] sm:$0xff] }
 0x259   : > { %v3669_v23 = vpop.eup %3668  ;;  %3688 = vrcp.f32 %v1786_v15  ;;  %v2170_v20 = vadd.f32 1.0, %v3667_v47  ;;  %v6078_v47 = vld [vmem:[#allocation20_spill] sm:$0xff] }
 0x25a   : > { %v3671_v34 = vpop.eup %3670  ;;  %3690 = vrcp.f32 %v1978_v17  ;;  %v2362_v46 = vadd.f32 1.0, %v3669_v23 }
 0x25b   : > { %v3673_v11 = vpop.eup %3672  ;;  %3692 = vrcp.f32 %v2170_v20  ;;  %v1785_v1 = vadd.f32 1.0, %v3671_v34  ;;  %v6079_v20 = vld [vmem:[#allocation43_spill] sm:$0xff] }
 0x25c   : > { %v3675_v37 = vpop.eup %3674  ;;  %3694 = vrcp.f32 %v2362_v46  ;;  %v1977_v31 = vadd.f32 1.0, %v3673_v11  ;;  %v3080_v11 = vmul.f32 -1.442695, %v5354_v42 }
 0x25d   : > { %v3677_v51 = vpop.eup %3676  ;;  %3696 = vrcp.f32 %v1785_v1  ;;  %v2169_v44 = vadd.f32 1.0, %v3675_v37  ;;  %v3096_v37 = vmul.f32 -1.442695, %v5360_v32 }
 0x25e   : > { %v3679_v61 = vpop.eup %3678  ;;  %3698 = vrcp.f32 %v1977_v31  ;;  %v2456_v30 = vmul.f32 %v3677_v51, %v6075_v25  ;;  %v6080_v51 = vld [vmem:[#allocation59_spill] sm:$0xff] }
 0x25f   : > { %v3681_v2 = vpop.eup %3680  ;;  %3700 = vrcp.f32 %v2169_v44  ;;  %v2072_v59 = vmul.f32 %v3679_v61, %v6071_v14 }
 0x260   : > { %v3683_v35 = vpop.eup %3682  ;;  %3702 = vpow2.f32 %v3107_v38  ;;  %v1879_v40 = vmul.f32 %v3681_v2, %v6072_v21 }
 0x261   : > { %v3685_v62 = vpop.eup %3684  ;;  %3704 = vpow2.f32 %v3062_v10  ;;  %v2088_v8 = vadd.f32 %v2072_v59, %v1880_v16  ;;  %v2071_v9 = vmul.f32 %v3683_v35, %v6074_v5  ;;  %v6084_v35 = vld [vmem:[#allocation61_spill] sm:$0xff] }
 0x262   : > { %v3687_v7 = vpop.eup %3686  ;;  %3706 = vpow2.f32 %v3078_v33  ;;  %v2263_v26 = vmul.f32 %v3685_v62, %v6076_v45  ;;  %v6082_v33 = vld [vmem:[#allocation44_spill] sm:$0xff] }
 0x263   : > { %v3689_v53 = vpop.eup %3688  ;;  %3708 = vpow2.f32 %v3094_v24  ;;  %v2280_v39 = vadd.f32 %v2264_v57, %v2088_v8  ;;  %v2087_v43 = vadd.f32 %v2071_v9, %v1879_v40  ;;  %v2455_v15 = vmul.f32 %v3687_v7, %v6077_v19  ;;  %v6083_v24 = vld [vmem:[#allocation84_spill] sm:$0xff] }
 0x264   : > { %v3691_v29 = vpop.eup %3690  ;;  %3710 = vpow2.f32 %v3110_v0  ;;  %v1882_v17 = vmul.f32 %v3689_v53, %v6078_v47 }
 0x265   : > { %v3693_v23 = vpop.eup %3692  ;;  %3712 = vpow2.f32 %v3061_v13  ;;  %v5533_v12 = vadd.f32 %v2456_v30, %v2280_v39  ;;  %v2279_v63 = vadd.f32 %v2263_v26, %v2087_v43  ;;  %v2074_v34 = vmul.f32 %v3691_v29, %v6079_v20  ;;  %v6085_v20 = vld [vmem:[#allocation22_spill] sm:$0xff] }
 0x266   : > { %v3695_v46 = vpop.eup %3694  ;;  %3714 = vpow2.f32 %v3077_v27  ;;  %v2266_v44 = vmul.f32 %v3693_v23, %v6080_v51  ;;  %v3111_v51 = vmul.f32 -1.442695, %v5383_v6 }
 0x267   : > { %v3697_v1 = vpop.eup %3696  ;;  %3716 = vpow2.f32 %v3093_v60  ;;  %v5539_v31 = vadd.f32 %v2455_v15, %v2279_v63  ;;  %v2090_v10 = vadd.f32 %v2074_v34, %v1882_v17  ;;  %v2458_v0 = vmul.f32 %v3695_v46, %v6083_v24  ;;  %v6091_v24 = vld [vmem:[#allocation11_spill] sm:$0xff] }
 0x268   : > { %v3699_v38 = vpop.eup %3698  ;;  %3718 = vpow2.f32 %v3109_v41  ;;  %v1881_v16 = vmul.f32 %v3697_v1, %v6081_v4  ;;  %v3063_v17 = vmul.f32 -1.442695, %v5369_v48  ;;  %v3079_v34 = vmul.f32 -1.442695, %v6085_v20  ;;  %v6089_v48 = vld [vmem:[#allocation62_spill] sm:$0xff] }
 0x269   : > { %v3701_v61 = vpop.eup %3700  ;;  %3720 = vpow2.f32 %v3064_v52  ;;  %v2073_v2 = vmul.f32 %v3699_v38, %v6082_v33  ;;  %v2282_v32 = vadd.f32 %v2266_v44, %v2090_v10  ;;  %v6088_v44 = vld [vmem:[#allocation24_spill] sm:$0xff]  ;;  %v6090_v33 = vld [vmem:[#allocation45_spill] sm:$0xff] }
 0x26a   : > { %v3703_v42 = vpop.eup %3702  ;;  %3722 = vpow2.f32 %v3080_v11  ;;  %v2265_v13 = vmul.f32 %v3701_v61, %v6084_v35  ;;  %v6086_v11 = vld [vmem:[#allocation60_spill] sm:$0xff] }
 0x26b   : > { %v3705_v14 = vpop.eup %3704  ;;  %v2361_v49 = vadd.f32 1.0, %v3703_v42  ;;  %3724 = vpow2.f32 %v3096_v37  ;;  %v2089_v59 = vadd.f32 %v2073_v2, %v1881_v16  ;;  %v5546_v40 = vadd.f32 %v2458_v0, %v2282_v32  ;;  %v6087_v37 = vld [vmem:[#allocation85_spill] sm:$0xff]  ;;  %v5559_v32 = vpop.permute.xlu1 %2503 }
 0x26c   : > { %v3707_v27 = vpop.eup %3706  ;;  %v1788_v21 = vadd.f32 1.0, %v3705_v14  ;;  %3726 = vpow2.f32 %v3112_v28  ;;  %v3095_v1 = vmul.f32 -1.442695, %v6086_v11  ;;  %v3066_v16 = vmul.f32 -1.442695, %v6089_v48 }
 0x26d   : > { %v3709_v62 = vpop.eup %3708  ;;  %3728 = vrcp.f32 %v2361_v49  ;;  %v1980_v3 = vadd.f32 1.0, %v3707_v27  ;;  %v2281_v57 = vadd.f32 %v2265_v13, %v2089_v59  ;;  %v3082_v0 = vmul.f32 -1.442695, %v6091_v24  ;;  %v6092_v49 = vld [vmem:[#allocation23_spill] sm:$0xff]  ;;  %v6093_v59 = vld [vmem:[#allocation65_spill] sm:$0xff] }
 0x26e   : > { %v3711_v8 = vpop.eup %3710  ;;  %3730 = vrcp.f32 %v1788_v21  ;;  %v2172_v5 = vadd.f32 1.0, %v3709_v62  ;;  %v3098_v6 = vmul.f32 -1.442695, %v6092_v49  ;;  %v6094_v21 = vld [vmem:[#allocation74_spill] sm:$0xff] }
 0x26f   : > { %v3713_v9 = vpop.eup %3712  ;;  %3732 = vrcp.f32 %v1980_v3  ;;  %v2364_v7 = vadd.f32 1.0, %v3711_v8  ;;  %v3114_v62 = vmul.f32 -1.442695, %v6094_v21  ;;  %v6095_v3 = vld [vmem:[#allocation63_spill] sm:$0xff] }
 0x270   : > { %v3715_v60 = vpop.eup %3714  ;;  %3734 = vrcp.f32 %v2172_v5  ;;  %v1787_v41 = vadd.f32 1.0, %v3713_v9  ;;  %v6096_v8 = vld [vmem:[#allocation27_spill] sm:$0xff] }
 0x271   : > { %v3717_v25 = vpop.eup %3716  ;;  %3736 = vrcp.f32 %v2364_v7  ;;  %v1979_v30 = vadd.f32 1.0, %v3715_v60  ;;  %v5566_v7 = vpop.permute.xlu0 %2501  ;;  %v6097_v60 = vld [vmem:[#allocation86_spill] sm:$0xff] }
 0x272   : > { %v3719_v53 = vpop.eup %3718  ;;  %3738 = vrcp.f32 %v1787_v41  ;;  %v2171_v39 = vadd.f32 1.0, %v3717_v25 }
 0x273   : > { %v3721_v43 = vpop.eup %3720  ;;  %3740 = vrcp.f32 %v1979_v30  ;;  %v2363_v45 = vadd.f32 1.0, %v3719_v53  ;;  %v6098_v30 = vld [vmem:[#allocation46_spill] sm:$0xff] }
 0x274   : > { %v3723_v26 = vpop.eup %3722  ;;  %3742 = vrcp.f32 %v2171_v39  ;;  %v1790_v29 = vadd.f32 1.0, %v3721_v43  ;;  %v6099_v43 = vld [vmem:[#allocation25_spill] sm:$0xff] }
 0x275   : > { %v3725_v52 = vpop.eup %3724  ;;  %3744 = vrcp.f32 %v2363_v45  ;;  %v1982_v19 = vadd.f32 1.0, %v3723_v26  ;;  %v3081_v45 = vmul.f32 -1.442695, %v6099_v43  ;;  %v6100_v26 = vld [vmem:[#allocation75_spill] sm:$0xff]  ;;  %v2506_v48 = vpop.permute.xlu0 %2505 }
 0x276   : > { %v3727_v15 = vpop.eup %3726  ;;  %3746 = vrcp.f32 %v1790_v29  ;;  %v2174_v47 = vadd.f32 1.0, %v3725_v52  ;;  %v3097_v29 = vmul.f32 -1.442695, %v6100_v26 }
 0x277   : > { %v3729_v23 = vpop.eup %3728  ;;  %3748 = vrcp.f32 %v1982_v19  ;;  %v2366_v63 = vadd.f32 1.0, %v3727_v15 }
 0x278   : > { %v3731_v46 = vpop.eup %3730  ;;  %3750 = vrcp.f32 %v2174_v47  ;;  %v2457_v28 = vmul.f32 %v3729_v23, %v6087_v37  ;;  %v6101_v47 = vld [vmem:[#allocation67_spill] sm:$0xff] }
 0x279   : > { %v3733_v38 = vpop.eup %3732  ;;  %3752 = vrcp.f32 %v2366_v63  ;;  %v1884_v10 = vmul.f32 %v3731_v46, %v6088_v44  ;;  %v6102_v63 = vld [vmem:[#allocation14_spill] sm:$0xff]  ;;  %v6103_v46 = vld [vmem:[#allocation31_spill] sm:$0xff] }
 0x27a   : > { %v3735_v4 = vpop.eup %3734  ;;  %3754 = vpow2.f32 %v3063_v17  ;;  %v5555_v61 = vadd.f32 %v2457_v28, %v2281_v57  ;;  %v2076_v2 = vmul.f32 %v3733_v38, %v6090_v33  ;;  %v3065_v57 = vmul.f32 -1.442695, %v6095_v3  ;;  %v6104_v28 = vld [vmem:[#allocation87_spill] sm:$0xff]  ;;  %v6106_v33 = vld [vmem:[#allocation70_spill] sm:$0xff] }
 0x27b   : > { %v3737_v42 = vpop.eup %3736  ;;  %3756 = vpow2.f32 %v3079_v34  ;;  %v2268_v35 = vmul.f32 %v3735_v4, %v6093_v59  ;;  %v3113_v20 = vmul.f32 -1.442695, %v6102_v63  ;;  %v2508_v34 = vpop.permute.xlu1 %2507 }
 0x27c   : > { %v3739_v14 = vpop.eup %3738  ;;  %3758 = vpow2.f32 %v3095_v1  ;;  %v2092_v13 = vadd.f32 %v2076_v2, %v1884_v10  ;;  %v2460_v41 = vmul.f32 %v3737_v42, %v6097_v60 }
 0x27d   : > { %v3741_v27 = vpop.eup %3740  ;;  %3760 = vpow2.f32 %v3111_v51  ;;  %v1883_v5 = vmul.f32 %v3739_v14, %v6096_v8  ;;  %v6105_v51 = vld [vmem:[#allocation47_spill] sm:$0xff] }
 0x27e   : > { %v3743_v9 = vpop.eup %3742  ;;  %3762 = vpow2.f32 %v3066_v16  ;;  %v2284_v25 = vadd.f32 %v2268_v35, %v2092_v13  ;;  %v2075_v53 = vmul.f32 %v3741_v27, %v6098_v30 }
 0x27f   : > { %v3745_v39 = vpop.eup %3744  ;;  %3764 = vpow2.f32 %v3082_v0  ;;  %v2267_v17 = vmul.f32 %v3743_v9, %v6101_v47  ;;  %v2512_v21 = vpop.permute.xlu1 %2511 }
 0x280   : > { %v3747_v52 = vpop.eup %3746  ;;  %3766 = vpow2.f32 %v3098_v6  ;;  %v5572_v19 = vadd.f32 %v2460_v41, %v2284_v25  ;;  %v2091_v15 = vadd.f32 %v2075_v53, %v1883_v5  ;;  %v2459_v38 = vmul.f32 %v3745_v39, %v6104_v28  ;;  %v6107_v6 = vld [vmem:[#allocation88_spill] sm:$0xff]  ;;  %v2510_v41 = vpop.permute.xlu0 %2509  ;;  %v6108_v39 = vld [vmem:[#allocation90_spill] sm:$0xff] }
 0x281   : > { %v3749_v23 = vpop.eup %3748  ;;  %3768 = vpow2.f32 %v3114_v62  ;;  %v1886_v11 = vmul.f32 %v3747_v52, %v6103_v46  ;;  %v2548_v43 = vmul.f32 %v6108_v39, %v5559_v32 }
 0x282   : > { %v3751_v1 = vpop.eup %3750  ;;  %3770 = vpow2.f32 %v3065_v57  ;;  %v2283_v37 = vadd.f32 %v2267_v17, %v2091_v15  ;;  %v2078_v44 = vmul.f32 %v3749_v23, %v6105_v51  ;;  %v6110_v23 = vld [vmem:[#allocation92_spill] sm:$0xff] }
 0x283   : > { %v3753_v10 = vpop.eup %3752  ;;  %3772 = vpow2.f32 %v3081_v45  ;;  %v2270_v2 = vmul.f32 %v3751_v1, %v6106_v33  ;;  %v2516_v15 = vpop.permute.xlu1 %2515  ;;  %v2550_v63 = vmul.f32 %v6110_v23, %v2508_v34  ;;  %v5592_v32 = vadd.f32 %v2548_v43, %v5489_v36  ;;  %v6113_v33 = vld [vmem:[#allocation32_spill] sm:$0xff] }
 0x284   : > { %v3755_v4 = vpop.eup %3754  ;;  %3774 = vpow2.f32 %v3097_v29  ;;  %v5579_v16 = vadd.f32 %v2459_v38, %v2283_v37  ;;  %v2094_v42 = vadd.f32 %v2078_v44, %v1886_v11  ;;  %v2462_v59 = vmul.f32 %v3753_v10, %v6107_v6  ;;  %v6109_v29 = vld [vmem:[#allocation91_spill] sm:$0xff]  ;;  %v2514_v37 = vpop.permute.xlu0 %2513  ;;  %v6111_v38 = vld [vmem:[#allocation93_spill] sm:$0xff]  ;;  %v6112_v10 = vld [vmem:[#allocation94_spill] sm:$0xff] }
 0x285   : > { %v3757_v24 = vpop.eup %3756  ;;  %v1789_v0 = vadd.f32 1.0, %v3755_v4  ;;  %3776 = vpow2.f32 %v3113_v20  ;;  %v2547_v52 = vmul.f32 %v6109_v29, %v5566_v7  ;;  %v2549_v51 = vmul.f32 %v6111_v38, %v2506_v48 }
 0x286   : > { %v3759_v14 = vpop.eup %3758  ;;  %v1981_v49 = vadd.f32 1.0, %v3757_v24  ;;  %3778 = vtanh.f32 %v5473_v50  ;;  %v2286_v35 = vadd.f32 %v2270_v2, %v2094_v42  ;;  %v5600_v44 = vadd.f32 %v2550_v63, %v5509_v54  ;;  %v6114_v42 = vld [vmem:[#allocation98_spill] sm:$0xff] }
 0x287   : > { %v3761_v13 = vpop.eup %3760  ;;  %3780 = vrcp.f32 %v1789_v0  ;;  %v2173_v27 = vadd.f32 1.0, %v3759_v14  ;;  %v5595_v7 = vadd.f32 %v2547_v52, %v5497_v58  ;;  %v2552_v4 = vmul.f32 %v6112_v10, %v2512_v21  ;;  %v2520_v58 = vpop.permute.xlu1 %2519  ;;  %v6115_v0 = vld [vmem:[#allocation48_spill] sm:$0xff]  ;;  %v6118_v21 = vld [vmem:[#allocation71_spill] sm:$0xff]  ;;  %v6123_v52 = vld [vmem:[#allocation97_spill] sm:$0xff] }
 0x288   : > { %v3763_v62 = vpop.eup %3762  ;;  %3782 = vrcp.f32 %v1981_v49  ;;  %v2365_v3 = vadd.f32 1.0, %v3761_v13  ;;  %v5584_v57 = vadd.f32 %v2462_v59, %v2286_v35  ;;  %v1015_v24 = vadd.f32 1.0, %v6114_v42  ;;  %v6116_v49 = vld [vmem:[#allocation100_spill] sm:$0xff]  ;;  %v6117_v59 = vld [vmem:[#allocation95_spill] sm:$0xff] }
 0x289   : > { %v3765_v8 = vpop.eup %3764  ;;  %3784 = vrcp.f32 %v2173_v27  ;;  %v1792_v5 = vadd.f32 1.0, %v3763_v62  ;;  %v1014_v6 = vadd.f32 1.0, %v6116_v49  ;;  %v2551_v54 = vmul.f32 %v6117_v59, %v2510_v41  ;;  %v2518_v41 = vpop.permute.xlu0 %2517 }
 0x28a   : > { %v3767_v9 = vpop.eup %3766  ;;  %3786 = vrcp.f32 %v2365_v3  ;;  %v1984_v60 = vadd.f32 1.0, %v3765_v8  ;;  %v5612_v13 = vadd.f32 %v2549_v51, %v5511_v56  ;;  %v6119_v3 = vld [vmem:[#allocation33_spill] sm:$0xff] }
 0x28b   : > { %v3769_v50 = vpop.eup %3768  ;;  %3788 = vrcp.f32 %v1792_v5  ;;  %v2176_v25 = vadd.f32 1.0, %v3767_v9  ;;  %v5618_v5 = vadd.f32 %v2552_v4, %v5533_v12  ;;  %v6120_v9 = vld [vmem:[#allocation96_spill] sm:$0xff] }
 0x28c   : > { %v3771_v30 = vpop.eup %3770  ;;  %3790 = vrcp.f32 %v1984_v60  ;;  %v2368_v53 = vadd.f32 1.0, %v3769_v50  ;;  %v2554_v60 = vmul.f32 %v6120_v9, %v2516_v15  ;;  %v6124_v12 = vld [vmem:[#allocation72_spill] sm:$0xff]  ;;  %v2524_v15 = vpop.permute.xlu1 %2523 }
 0x28d   : > { %v3773_v45 = vpop.eup %3772  ;;  %3792 = vrcp.f32 %v2176_v25  ;;  %v1791_v26 = vadd.f32 1.0, %v3771_v30  ;;  %v6121_v25 = vld [vmem:[#allocation49_spill] sm:$0xff]  ;;  %v2522_v49 = vpop.permute.xlu0 %2521 }
 0x28e   : > { %v3775_v47 = vpop.eup %3774  ;;  %3794 = vrcp.f32 %v2368_v53  ;;  %v1983_v17 = vadd.f32 1.0, %v3773_v45  ;;  %v6122_v53 = vld [vmem:[#allocation89_spill] sm:$0xff]  ;;  %v5632_v51 = vadd.f32 %v2554_v60, %v5546_v40 }
 0x28f   : > { %v3777_v20 = vpop.eup %3776  ;;  %3796 = vrcp.f32 %v1791_v26  ;;  %v2175_v46 = vadd.f32 1.0, %v3775_v47  ;;  %v5624_v26 = vadd.f32 %v2551_v54, %v5539_v31  ;;  %v2553_v47 = vmul.f32 %v6123_v52, %v2514_v37  ;;  %v6126_v31 = vld [vmem:[#allocation99_spill] sm:$0xff]  ;;  %v6130_v40 = vld [vmem:[#allocation73_spill] sm:$0xff] }
 0x290   : > { %v3779_v11 = vpop.eup %3778  ;;  %3798 = vrcp.f32 %v1983_v17  ;;  %v2367_v1 = vadd.f32 1.0, %v3777_v20 }
 0x291   : > { %v3781_v28 = vpop.eup %3780  ;;  %3800 = vrcp.f32 %v2175_v46  ;;  %2611 = vrot.lane.b32.xlu1 %v3779_v11, %s3902_s16 }
 0x292   : > { %v3783_v34 = vpop.eup %3782  ;;  %3802 = vrcp.f32 %v2367_v1  ;;  %v1885_v36 = vmul.f32 %v3781_v28, %v6113_v33  ;;  %v6125_v1 = vld [vmem:[#allocation34_spill] sm:$0xff]  ;;  %v6127_v33 = vld [vmem:[#allocation13_spill] sm:$0xff] }
 0x293   : > { %v3785_v2 = vpop.eup %3784  ;;  %3804 = vtanh.f32 %v5479_v22  ;;  %v2077_v14 = vmul.f32 %v3783_v34, %v6115_v0  ;;  %v2556_v34 = vmul.f32 %v6126_v31, %v2520_v58  ;;  %v5638_v0 = vadd.f32 %v2553_v47, %v5555_v61 }
 0x294   : > { %v3787_v48 = vpop.eup %3786  ;;  %3806 = vtanh.f32 %v5592_v32  ;;  %v2269_v62 = vmul.f32 %v3785_v2, %v6118_v21  ;;  %v6128_v2 = vld [vmem:[#allocation50_spill] sm:$0xff] }
 0x295   : > { %v3789_v35 = vpop.eup %3788  ;;  %3808 = vtanh.f32 %v5595_v7  ;;  %v2093_v27 = vadd.f32 %v2077_v14, %v1885_v36  ;;  %v2461_v43 = vmul.f32 %v3787_v48, %v6122_v53  ;;  %v6129_v14 = vld [vmem:[#allocation101_spill] sm:$0xff]  ;;  %v2572_v21 = vadd.f32 %v2556_v34, %v5572_v19  ;;  %v6133_v53 = vld [vmem:[#allocation103_spill] sm:$0xff] }
 0x296   : > { %v3791_v22 = vpop.eup %3790  ;;  %v1888_v8 = vmul.f32 %v3789_v35, %v6119_v3  ;;  %3810 = vtanh.f32 %v5600_v44  ;;  %v2555_v48 = vmul.f32 %v6129_v14, %v2518_v41  ;;  %v2528_v41 = vpop.permute.xlu1 %2527 }
 0x297   : > { %v3793_v50 = vpop.eup %3792  ;;  %3812 = vrcp.f32 %v1015_v24  ;;  %v2080_v30 = vmul.f32 %v3791_v22, %v6121_v25  ;;  %v2285_v56 = vadd.f32 %v2269_v62, %v2093_v27  ;;  %v6131_v62 = vld [vmem:[#allocation102_spill] sm:$0xff] }
 0x298   : > { %v3795_v45 = vpop.eup %3794  ;;  %3814 = vrcp.f32 %v1014_v6  ;;  %v2272_v63 = vmul.f32 %v3793_v50, %v6124_v12  ;;  %v2558_v61 = vmul.f32 %v6131_v62, %v2524_v15 }
 0x299   : > { %v3797_v17 = vpop.eup %3796  ;;  %v2096_v20 = vadd.f32 %v2080_v30, %v1888_v8  ;;  %3816 = vtanh.f32 %v5612_v13  ;;  %v2477_v46 = vadd.f32 %v2461_v43, %v2285_v56  ;;  %v2464_v36 = vmul.f32 %v3795_v45, %v6127_v33  ;;  %v6132_v8 = vld [vmem:[#allocation64_spill] sm:$0xff] }
 0x29a   : > { %v3799_v11 = vpop.eup %3798  ;;  %v1887_v28 = vmul.f32 %v3797_v17, %v6125_v1  ;;  %3818 = vtanh.f32 %v5618_v5  ;;  %v2571_v56 = vadd.f32 %v2555_v48, %v5579_v16  ;;  %v2557_v43 = vmul.f32 %v6133_v53, %v2522_v49  ;;  %v2526_v17 = vpop.permute.xlu0 %2525 }
 0x29b   : > { %v3801_v4 = vpop.eup %3800  ;;  %v2288_v37 = vadd.f32 %v2272_v63, %v2096_v20  ;;  %v2079_v42 = vmul.f32 %v3799_v11, %v6128_v2  ;;  %3820 = vtanh.f32 %v5624_v26  ;;  %v2574_v45 = vadd.f32 %v2558_v61, %v5584_v57 }
 0x29c   : > { %v3803_v24 = vpop.eup %3802  ;;  %v2271_v27 = vmul.f32 %v3801_v4, %v6130_v40  ;;  %3822 = vtanh.f32 %v5632_v51  ;;  %v2573_v20 = vadd.f32 %v2557_v43, %v2477_v46 }
 0x29d   : > { %v3805_v6 = vpop.eup %3804  ;;  %v2480_v54 = vadd.f32 %v2464_v36, %v2288_v37  ;;  %v2095_v35 = vadd.f32 %v2079_v42, %v1887_v28  ;;  %v2463_v60 = vmul.f32 %v3803_v24, %v6132_v8  ;;  %3824 = vtanh.f32 %v5638_v0 }
 0x29e   : > { %v3807_v58 = vpop.eup %3806  ;;  %2609 = vrot.lane.b32.xlu0 %v3805_v6, %s3902_s16  ;;  %3826 = vtanh.f32 %v2572_v21 }
 0x29f   : > { %v3809_v22 = vpop.eup %3808  ;;  %v2287_v3 = vadd.f32 %v2271_v27, %v2095_v35  ;;  %2615 = vrot.lane.b32.xlu1 %v3807_v58, %s3902_s16  ;;  %3828 = vtanh.f32 %v2571_v56 }
 0x2a0   : > { %v3811_v50 = vpop.eup %3810  ;;  %3830 = vtanh.f32 %v2574_v45 }
 0x2a1   : > { %v5649_v25 = vpop.eup %3812  ;;  %v2479_v30 = vadd.f32 %v2463_v60, %v2287_v3  ;;  %3832 = vtanh.f32 %v2573_v20 }
 0x2a2   : > { %v5654_v19 = vpop.eup %3814  ;;  %2613 = vrot.lane.b32.xlu0 %v3809_v22, %s3902_s16  ;;  %v2560_v47 = vmul.f32 %v5649_v25, %v2528_v41 }
 0x2a3   : > { %v3817_v12 = vpop.eup %3816  ;;  %2619 = vrot.lane.b32.xlu1 %v3811_v50, %s3902_s16  ;;  %v2559_v16 = vmul.f32 %v5654_v19, %v2526_v17 }
 0x2a4   : > { %v3819_v63 = vpop.eup %3818  ;;  %v5662_v15 = vadd.f32 %v2560_v47, %v2480_v54 }
 0x2a5   : > { %v3821_v11 = vpop.eup %3820  ;;  %v5665_v1 = vadd.f32 %v2559_v16, %v2479_v30 }
 0x2a6   : > { %2617 = vrot.lane.b32.xlu0 %v3817_v12, %s3902_s16  ;;  %v3823_v57 = vpop.eup %3822  ;;  %3834 = vtanh.f32 %v5662_v15 }
 0x2a7   : > { %2623 = vrot.lane.b32.xlu1 %v3819_v63, %s3902_s16  ;;  %v3825_v28 = vpop.eup %3824  ;;  %3836 = vtanh.f32 %v5665_v1 }
 0x2a8   : > { %v3827_v46 = vpop.eup %3826 }
 0x2a9   : > { %v3829_v34 = vpop.eup %3828 }
 0x2aa   : > { %2621 = vrot.lane.b32.xlu0 %v3821_v11, %s3902_s16  ;;  %v3831_v4 = vpop.eup %3830 }
 0x2ab   : > { %2627 = vrot.lane.b32.xlu1 %v3823_v57, %s3902_s16  ;;  %v3833_v37 = vpop.eup %3832 }
 0x2ae   : > { %2625 = vrot.lane.b32.xlu0 %v3825_v28, %s3902_s16 }
 0x2af   : > { %2631 = vrot.lane.b32.xlu1 %v3827_v46, %s3902_s16 }
 0x2b0   : > { %v3835_v33 = vpop.eup %3834 }
 0x2b1   : > { %v3837_v36 = vpop.eup %3836 }
 0x2b2   : > { %2629 = vrot.lane.b32.xlu0 %v3829_v34, %s3902_s16 }
 0x2b3   : > { %2635 = vrot.lane.b32.xlu1 %v3831_v4, %s3902_s16 }
 0x2b6   : > { %2633 = vrot.lane.b32.xlu0 %v3833_v37, %s3902_s16 }
 0x2b7   : > { %2639 = vrot.lane.b32.xlu1 %v3835_v33, %s3902_s16 }
 0x2ba   : > { %2637 = vrot.lane.b32.xlu0 %v3837_v36, %s3902_s16 }
 0x2bb   : > { %2759 = vrot.lane.b32.xlu1 %v5592_v32, %s3902_s16  ;;  %v5698_v32 = vpop.permute.xlu1 %2755 }
 0x2be   : > { %2757 = vrot.lane.b32.xlu0 %v5595_v7, %s3902_s16 }
 0x2bf   : > { %2763 = vrot.lane.b32.xlu1 %v5600_v44, %s3902_s16 }
 0x2c2   : > { %2761 = vrot.lane.b32.xlu0 %v5612_v13, %s3902_s16  ;;  %v5702_v13 = vpop.permute.xlu0 %2753 }
 0x2c3   : > { %2767 = vrot.lane.b32.xlu1 %v5618_v5, %s3902_s16 }
 0x2c6   : > { %2765 = vrot.lane.b32.xlu0 %v5624_v26, %s3902_s16 }
 0x2c7   : > { %2771 = vrot.lane.b32.xlu1 %v5632_v51, %s3902_s16 }
 0x2ca   : > { %2769 = vrot.lane.b32.xlu0 %v5638_v0, %s3902_s16 }
 0x2cb   : > { %2775 = vrot.lane.b32.xlu1 %v2572_v21, %s3902_s16 }
 0x2ce   : > { %2773 = vrot.lane.b32.xlu0 %v2571_v56, %s3902_s16 }
 0x2cf   : > { %2779 = vrot.lane.b32.xlu1 %v2574_v45, %s3902_s16 }
 0x2d2   : > { %2777 = vrot.lane.b32.xlu0 %v2573_v20, %s3902_s16 }
 0x303   : > { %v2612_v7 = vpop.permute.xlu1 %2611 }
 0x304   : > { %v2658_v44 = vmul.f32 %v5172_v18, %v2612_v7 }
 0x306   : > { %2691 = vrot.lane.b32.xlu1 %v2658_v44, %s3903_s25 }
 0x310   : > { %v2610_v5 = vpop.permute.xlu0 %2609 }
 0x311   : > { %v2657_v26 = vmul.f32 %v5174_v55, %v2610_v5  ;;  %v2616_v51 = vpop.permute.xlu1 %2615 }
 0x312   : > { %v2660_v2 = vmul.f32 %v6108_v39, %v2616_v51 }
 0x313   : > { %2689 = vrot.lane.b32.xlu0 %v2657_v26, %s3903_s25 }
 0x314   : > { %v2614_v42 = vpop.permute.xlu0 %2613  ;;  %2695 = vrot.lane.b32.xlu1 %v2660_v2, %s3903_s25 }
 0x315   : > { %v2659_v24 = vmul.f32 %v6109_v29, %v2614_v42  ;;  %v2620_v0 = vpop.permute.xlu1 %2619 }
 0x316   : > { %v2662_v18 = vmul.f32 %v6110_v23, %v2620_v0 }
 0x317   : > { %2693 = vrot.lane.b32.xlu0 %v2659_v24, %s3903_s25 }
 0x318   : > { %v2618_v48 = vpop.permute.xlu0 %2617  ;;  %2699 = vrot.lane.b32.xlu1 %v2662_v18, %s3903_s25 }
 0x319   : > { %v2661_v55 = vmul.f32 %v6111_v38, %v2618_v48  ;;  %v2624_v49 = vpop.permute.xlu1 %2623 }
 0x31a   : > { %v2664_v39 = vmul.f32 %v6112_v10, %v2624_v49 }
 0x31b   : > { %2697 = vrot.lane.b32.xlu0 %v2661_v55, %s3903_s25 }
 0x31c   : > { %v2622_v6 = vpop.permute.xlu0 %2621  ;;  %2703 = vrot.lane.b32.xlu1 %v2664_v39, %s3903_s25 }
 0x31d   : > { %v2663_v29 = vmul.f32 %v6117_v59, %v2622_v6  ;;  %v2628_v54 = vpop.permute.xlu1 %2627 }
 0x31e   : > { %v2666_v23 = vmul.f32 %v6120_v9, %v2628_v54 }
 0x31f   : > { %2701 = vrot.lane.b32.xlu0 %v2663_v29, %s3903_s25 }
 0x320   : > { %v2626_v35 = vpop.permute.xlu0 %2625  ;;  %2707 = vrot.lane.b32.xlu1 %v2666_v23, %s3903_s25 }
 0x321   : > { %v2665_v38 = vmul.f32 %v6123_v52, %v2626_v35  ;;  %v2632_v40 = vpop.permute.xlu1 %2631 }
 0x322   : > { %v2668_v10 = vmul.f32 %v6126_v31, %v2632_v40 }
 0x323   : > { %2705 = vrot.lane.b32.xlu0 %v2665_v38, %s3903_s25 }
 0x324   : > { %v2630_v27 = vpop.permute.xlu0 %2629  ;;  %2711 = vrot.lane.b32.xlu1 %v2668_v10, %s3903_s25 }
 0x325   : > { %v2667_v59 = vmul.f32 %v6129_v14, %v2630_v27  ;;  %v2636_v58 = vpop.permute.xlu1 %2635 }
 0x326   : > { %v2670_v9 = vmul.f32 %v6131_v62, %v2636_v58 }
 0x327   : > { %2709 = vrot.lane.b32.xlu0 %v2667_v59, %s3903_s25 }
 0x328   : > { %v2634_v21 = vpop.permute.xlu0 %2633  ;;  %2715 = vrot.lane.b32.xlu1 %v2670_v9, %s3903_s25 }
 0x329   : > { %v2669_v52 = vmul.f32 %v6133_v53, %v2634_v21  ;;  %v2640_v61 = vpop.permute.xlu1 %2639 }
 0x32a   : > { %v2672_v31 = vmul.f32 %v5649_v25, %v2640_v61 }
 0x32b   : > { %2713 = vrot.lane.b32.xlu0 %v2669_v52, %s3903_s25 }
 0x32c   : > { %v2638_v22 = vpop.permute.xlu0 %2637  ;;  %2719 = vrot.lane.b32.xlu1 %v2672_v31, %s3903_s25 }
 0x32d   : > { %v2671_v14 = vmul.f32 %v5654_v19, %v2638_v22  ;;  %v2760_v62 = vpop.permute.xlu1 %2759 }
 0x32f   : > { %2717 = vrot.lane.b32.xlu0 %v2671_v14, %s3903_s25 }
 0x330   : > { %2783 = vrot.lane.b32.xlu1 %v5662_v15, %s3902_s16  ;;  %v2758_v60 = vpop.permute.xlu0 %2757 }
 0x331   : > { %v2764_v3 = vpop.permute.xlu1 %2763 }
 0x333   : > { %2781 = vrot.lane.b32.xlu0 %v5665_v1, %s3902_s16  ;;  %s3121_s16 = sshll.u32 %s3959_s22, 11  ;;  %s2850_s22 = scalar_lea.sflag [#allocation4], %s4128_s12 }
 0x334   : > { %v2762_v50 = vpop.permute.xlu0 %2761  ;;  %s5793_s25 = scalar_lea.hbm %s5847_s5, %s3121_s16 }
 0x335   : > { %v2768_v8 = vpop.permute.xlu1 %2767 }
 0x338   : > { %v2766_v30 = vpop.permute.xlu0 %2765 }
 0x339   : > { %v2772_v41 = vpop.permute.xlu1 %2771 }
 0x33c   : > { %v2770_v53 = vpop.permute.xlu0 %2769 }
 0x33d   : > { %v2776_v25 = vpop.permute.xlu1 %2775 }
 0x340   : > { %v2774_v47 = vpop.permute.xlu0 %2773 }
 0x341   : > { %v2780_v56 = vpop.permute.xlu1 %2779 }
 0x344   : > { %v2778_v17 = vpop.permute.xlu0 %2777 }
 0x378   : > { %v2692_v43 = vpop.permute.xlu1 %2691 }
 0x379   : > { %v2802_v19 = vsel %vm726_vm1, %v2692_v43, %v5698_v32 }
 0x37a   : > { %v2818_v45 = vsel %vm758_vm0, %v2802_v19, 0.0 }
 0x37b   : > { %2834 = vst [vmem:[%s5742_s10 + $0x8] sm:$0xff] %v2818_v45 }
 0x385   : > { %v2690_v12 = vpop.permute.xlu0 %2689 }
 0x386   : > { %v2801_v63 = vsel %vm726_vm1, %v2690_v12, %v5702_v13  ;;  %v2696_v20 = vpop.permute.xlu1 %2695 }
 0x387   : > { %v2817_v16 = vsel %vm758_vm0, %v2801_v63, 0.0  ;;  %v2804_v15 = vsel %vm726_vm1, %v2696_v20, %v2760_v62 }
 0x388   : > { %2833 = vst [vmem:[%s5742_s10] sm:$0xff] %v2817_v16  ;;  %v2820_v11 = vsel %vm758_vm0, %v2804_v15, 0.0 }
 0x389   : > { %2836 = vst [vmem:[%s5742_s10 + $0x18] sm:$0xff] %v2820_v11  ;;  %v2694_v57 = vpop.permute.xlu0 %2693 }
 0x38a   : > { %v2803_v1 = vsel %vm726_vm1, %v2694_v57, %v2758_v60  ;;  %v2700_v28 = vpop.permute.xlu1 %2699 }
 0x38b   : > { %v2819_v46 = vsel %vm758_vm0, %v2803_v1, 0.0  ;;  %v2806_v34 = vsel %vm726_vm1, %v2700_v28, %v2764_v3 }
 0x38c   : > { %2835 = vst [vmem:[%s5742_s10 + $0x10] sm:$0xff] %v2819_v46  ;;  %v2822_v4 = vsel %vm758_vm0, %v2806_v34, 0.0 }
 0x38d   : > { %2838 = vst [vmem:[%s5742_s10 + $0x28] sm:$0xff] %v2822_v4  ;;  %v2698_v37 = vpop.permute.xlu0 %2697 }
 0x38e   : > { %v2805_v33 = vsel %vm726_vm1, %v2698_v37, %v2762_v50  ;;  %v2704_v36 = vpop.permute.xlu1 %2703 }
 0x38f   : > { %v2821_v32 = vsel %vm758_vm0, %v2805_v33, 0.0  ;;  %v2808_v7 = vsel %vm726_vm1, %v2704_v36, %v2768_v8 }
 0x390   : > { %2837 = vst [vmem:[%s5742_s10 + $0x20] sm:$0xff] %v2821_v32  ;;  %v2824_v44 = vsel %vm758_vm0, %v2808_v7, 0.0 }
 0x391   : > { %2840 = vst [vmem:[%s5742_s10 + $0x38] sm:$0xff] %v2824_v44  ;;  %v2702_v13 = vpop.permute.xlu0 %2701 }
 0x392   : > { %v2807_v5 = vsel %vm726_vm1, %v2702_v13, %v2766_v30  ;;  %v2708_v26 = vpop.permute.xlu1 %2707 }
 0x393   : > { %v2823_v51 = vsel %vm758_vm0, %v2807_v5, 0.0  ;;  %v2810_v2 = vsel %vm726_vm1, %v2708_v26, %v2772_v41 }
 0x394   : > { %2839 = vst [vmem:[%s5742_s10 + $0x30] sm:$0xff] %v2823_v51  ;;  %v2826_v42 = vsel %vm758_vm0, %v2810_v2, 0.0 }
 0x395   : > { %2842 = vst [vmem:[%s5742_s10 + $0x48] sm:$0xff] %v2826_v42  ;;  %v2706_v24 = vpop.permute.xlu0 %2705 }
 0x396   : > { %v2809_v0 = vsel %vm726_vm1, %v2706_v24, %v2770_v53  ;;  %v2712_v18 = vpop.permute.xlu1 %2711 }
 0x397   : > { %v2825_v48 = vsel %vm758_vm0, %v2809_v0, 0.0  ;;  %v2812_v55 = vsel %vm726_vm1, %v2712_v18, %v2776_v25 }
 0x398   : > { %2841 = vst [vmem:[%s5742_s10 + $0x40] sm:$0xff] %v2825_v48  ;;  %v2828_v49 = vsel %vm758_vm0, %v2812_v55, 0.0 }
 0x399   : > { %2844 = vst [vmem:[%s5742_s10 + $0x58] sm:$0xff] %v2828_v49  ;;  %v2710_v39 = vpop.permute.xlu0 %2709 }
 0x39a   : > { %v2811_v6 = vsel %vm726_vm1, %v2710_v39, %v2774_v47  ;;  %v2716_v29 = vpop.permute.xlu1 %2715 }
 0x39b   : > { %v2827_v54 = vsel %vm758_vm0, %v2811_v6, 0.0  ;;  %v2814_v23 = vsel %vm726_vm1, %v2716_v29, %v2780_v56 }
 0x39c   : > { %2843 = vst [vmem:[%s5742_s10 + $0x50] sm:$0xff] %v2827_v54  ;;  %v2830_v35 = vsel %vm758_vm0, %v2814_v23, 0.0 }
 0x39d   : > { %2846 = vst [vmem:[%s5742_s10 + $0x68] sm:$0xff] %v2830_v35  ;;  %v2714_v38 = vpop.permute.xlu0 %2713 }
 0x39e   : > { %v2813_v40 = vsel %vm726_vm1, %v2714_v38, %v2778_v17  ;;  %v2720_v10 = vpop.permute.xlu1 %2719 }
 0x39f   : > { %v2829_v27 = vsel %vm758_vm0, %v2813_v40, 0.0 }
 0x3a0   : > { %2845 = vst [vmem:[%s5742_s10 + $0x60] sm:$0xff] %v2829_v27 }
 0x3a1   : > { %v2718_v59 = vpop.permute.xlu0 %2717 }
 0x3a2   : > { %v2784_v58 = vpop.permute.xlu1 %2783 }
 0x3a3   : > { %v2816_v9 = vsel %vm726_vm1, %v2720_v10, %v2784_v58 }
 0x3a4   : > { %v2832_v21 = vsel %vm758_vm0, %v2816_v9, 0.0 }
 0x3a5   : > { %2848 = vst [vmem:[%s5742_s10 + $0x78] sm:$0xff] %v2832_v21  ;;  %v2782_v52 = vpop.permute.xlu0 %2781 }
 0x3a6   : > { %v2815_v61 = vsel %vm726_vm1, %v2718_v59, %v2782_v52 }
 0x3a7   : > { %v2831_v31 = vsel %vm758_vm0, %v2815_v61, 0.0 }
 0x3a8   : > { %2847 = vst [vmem:[%s5742_s10 + $0x70] sm:$0xff] %v2831_v31 }
 0x3a9   : > { %3851 = shalt.err (!%p3848_p7)
}
 0x3aa   : > { %s3852_s8 = scalar_lea.hbm %s5793_s25, 2048  ;;  %s3856_s13 = scalar_lea.hbm %s5847_s5, 4096 }
 0x3ab   : > { %p3853_p10 = scmp.ne.s32.totalorder %s5793_s25, %s3852_s8  ;;  %p3857_p13 = scmp.lt.u32.totalorder %s5793_s25, %s5847_s5 }
 0x3ac   : > { %p3858_p0 = scmp.lt.u32.totalorder %s3856_s13, %s3852_s8  ;;  %p3860_p2 = scmp.lt.u32.totalorder %s3852_s8, %s5793_s25 }
 0x3ad   : > { %p3854_p11 = pnand %p3853_p10, %p3977_p6 }
 0x3ae   : > { %p3859_p1 = por %p3858_p0, %p3857_p13 }
 0x3af   : > { %p3855_p12 = pneg %p3854_p11 }
 0x3b0   : > { %p3861_p3 = por %p3860_p2, %p3859_p1 }
 0x3b2   : > { %p3862_p4 = pnand %p3861_p3, %p3855_p12 }
 0x3b4   : > { %3865 = shalt.err (!%p3862_p4)
}
 0x3b5   : > { %s3906_s16 = smov 128   ;;  %s3907_s17 = smov 8  }
 0x3b6   : > { %3410 = dma.vmem_to_hbm [thread:$0]  (%p3977_p6), %s5795_s15, 2048, %s5793_s25, %s2850_s22, %s3906_s16, %s3906_s16, %s3907_s17  }
 0x3b7 PF: > { %s2878_s23 = sand.u32 1, %s3888_s18   ;;  %p3413_p5 = pnand %p2945_p9, %p3981_p8 }
 0x3b8   : > { %s2879_s26 = scalar_lea.sflag [#allocation4], %s2878_s23 }
 0x3b9   : > { %3883 = dma.done.wait (!%p3413_p5), %s2879_s26, 2048  }
 0x3ba   : > { %3885 = vsyncadd (!%p3413_p5), %s2879_s26, 4294965248  ;;  %p15_p7 = scmp.ge.s32.totalorder %s3963_s24, 4   ;;  %s6134_s18 = smov %s3892_s19 }
 0x3bb   : > { %s6135_s19 = smov %s3896_s20  ;;  %s6136_s20 = smov %s3975_s27 }
 0x3bc   : > { %s6137_s21 = smov %s3963_s24  ;;  %17 = sbr.rel (!%p15_p7) target bundleno = 3 (0x3), region = 121 }
 0x3c3   :  { %2884 = vsyncpa [#allocation4], 1 }
 0x3c4   :  { %2886 = vsyncpa [#allocation4 + $0x1], 1 }

</bundles_post_ra>
